<compile_context>
chip_gen: v5e
topology: v5e:2x2
jax: 0.10.0
libtpu: 0.0.40
codegen_flags: <defaults>
</compile_context>

<pallas_src>
import functools

import jax
import jax.numpy as jnp
from jax.experimental import pallas as pl
from jax.experimental.pallas import tpu as pltpu

EPS = 1e-5  # BatchNorm1d default eps
VMEM_LIMIT_BYTES = 48 * 1024 * 1024  # below v7x's 64 MiB physical VMEM


def _cparams(*dimension_semantics):
    return pltpu.CompilerParams(
        dimension_semantics=tuple(dimension_semantics),
        vmem_limit_bytes=VMEM_LIMIT_BYTES,
    )


# ----------------------------------------------------------------------------
# Pallas kernels
# ----------------------------------------------------------------------------
def _make_conv3_kernel(*, l_out, cin, stride, relu, has_residual, has_shortcut):
    """Fused k=3 conv + folded-BN (+residual) (+ReLU) (+fused 1x1 shortcut).

    Per grid step (= one batch element, one Cout tile) the refs are:
      x_ref   : (Lm, kc)      bf16  padded activation (kc=Cin, or 2*Cin if s=2)
      w_ref   : (3, Cin, tn)  bf16  BN-scale-folded tap weights
      b_ref   : (1, tn)       f32   folded BN bias
      [wsc_ref: (Cin, tn) bf16, bsc_ref: (1, tn) f32]   (1x1 shortcut)
      [res_ref: (L_out, tn)   bf16]                     (residual add)
      o_ref   : (L_out, tn)   bf16
      [sc_ref : (L_out, tn)   bf16]
    """

    def tap(x_ref, k):
        if stride == 1:
            return x_ref[k:k + l_out, :]
        r0 = k // 2
        c0 = (k % 2) * cin
        return x_ref[r0:r0 + l_out, c0:c0 + cin]

    def kernel(*refs):
        it = iter(refs)
        x_ref = next(it)
        w_ref = next(it)
        b_ref = next(it)
        wsc_ref = next(it) if has_shortcut else None
        bsc_ref = next(it) if has_shortcut else None
        res_ref = next(it) if has_residual else None
        o_ref = next(it)
        sc_ref = next(it) if has_shortcut else None

        acc = jnp.dot(tap(x_ref, 0), w_ref[0], preferred_element_type=jnp.float32)
        acc = acc + jnp.dot(tap(x_ref, 1), w_ref[1], preferred_element_type=jnp.float32)
        acc = acc + jnp.dot(tap(x_ref, 2), w_ref[2], preferred_element_type=jnp.float32)
        out = acc + b_ref[...]
        if has_residual:
            out = out + res_ref[...].astype(jnp.float32)
        if relu:
            out = jnp.maximum(out, 0.0)
        o_ref[...] = out.astype(o_ref.dtype)

        if has_shortcut:
            # 1x1 shortcut conv reads the center tap of the same activation tile.
            if stride == 1:
                xc = x_ref[1:1 + l_out, :]
            else:
                xc = x_ref[0:l_out, cin:2 * cin]
            sc = jnp.dot(xc, wsc_ref[...], preferred_element_type=jnp.float32)
            sc_ref[...] = (sc + bsc_ref[...]).astype(sc_ref.dtype)

    return kernel


def _pool_linear_kernel(f_ref, w_ref, b_ref, o_ref, acc_ref, *, inv_len):
    """adaptive_avg_pool1d(., 1) + Linear with an L-reduction grid axis."""

    @pl.when(pl.program_id(0) == 0)
    def _():
        acc_ref[...] = jnp.zeros_like(acc_ref)

    acc_ref[...] += jnp.sum(f_ref[...].astype(jnp.float32), axis=1)

    @pl.when(pl.program_id(0) == pl.num_programs(0) - 1)
    def _():
        pooled = acc_ref[...] * inv_len
        o_ref[...] = jnp.dot(pooled, w_ref[...],
                             preferred_element_type=jnp.float32) + b_ref[...]


# ----------------------------------------------------------------------------
# Wrappers
# ----------------------------------------------------------------------------
def bn_fold(bn):
    gamma, beta, mean, var = bn
    scale = gamma / jnp.sqrt(var + EPS)
    return scale, beta - mean * scale


def conv3_bn(x, w, bn, *, stride, relu, residual=None, shortcut=None):
    """Fused Conv1d(k=3, pad=1, stride) + BN (+residual) (+ReLU) (+1x1 shortcut).

    x: (B, L, Cin) bf16;  w: (Cout, Cin, 3) f32;  bn = (gamma, beta, mean, var).
    Returns (B, L_out, Cout) bf16, plus the shortcut output when requested.
    """
    assert stride in (1, 2)
    B, L, Cin = x.shape
    Cout = w.shape[0]
    L_out = (L - 1) // stride + 1

    # Fold the BN scale into the weight columns; epilogue becomes just `+ bias`.
    scale, bias = bn_fold(bn)
    wk = (jnp.transpose(w, (2, 1, 0)) * scale[None, None, :]).astype(jnp.bfloat16)
    bias = bias.reshape(1, Cout).astype(jnp.float32)

    # Pad L by 1 on each side (conv padding).  For stride=2, fold the stride
    # into the channel axis with a free contiguous reshape so every tap is a
    # static slice inside the kernel.
    if stride == 1:
        xk = jnp.pad(x, ((0, 0), (1, 1), (0, 0)))
        kc = Cin
    else:
        rows = 2 * (L_out + 1)
        xk = jnp.pad(x, ((0, 0), (1, rows - (L + 1)), (0, 0)))
        xk = xk.reshape(B, rows // 2, 2 * Cin)
        kc = 2 * Cin
    xk = xk.astype(jnp.bfloat16)
    Lm = xk.shape[1]

    # Cout <= 256 for this net so one lane tile covers it; tile N for wider nets.
    tn = Cout if Cout <= 256 else 256
    assert Cout % tn == 0
    grid = (B, Cout // tn)

    in_specs = [
        pl.BlockSpec((None, Lm, kc), lambda b, n: (b, 0, 0)),
        pl.BlockSpec((3, Cin, tn), lambda b, n: (0, 0, n)),
        pl.BlockSpec((1, tn), lambda b, n: (0, n)),
    ]
    operands = [xk, wk, bias]

    has_shortcut = shortcut is not None
    if has_shortcut:
        w_sc, bn_sc = shortcut
        sc_scale, sc_bias = bn_fold(bn_sc)
        wsc = (jnp.transpose(w_sc[:, :, 0], (1, 0)) * sc_scale[None, :]).astype(jnp.bfloat16)
        in_specs += [pl.BlockSpec((Cin, tn), lambda b, n: (0, n)),
                     pl.BlockSpec((1, tn), lambda b, n: (0, n))]
        operands += [wsc, sc_bias.reshape(1, Cout).astype(jnp.float32)]

    has_residual = residual is not None
    if has_residual:
        in_specs.append(pl.BlockSpec((None, L_out, tn), lambda b, n: (b, 0, n)))
        operands.append(residual.astype(jnp.bfloat16))

    out_block = pl.BlockSpec((None, L_out, tn), lambda b, n: (b, 0, n))
    out_sds = jax.ShapeDtypeStruct((B, L_out, Cout), jnp.bfloat16)
    if has_shortcut:
        out_specs, out_shape = (out_block, out_block), (out_sds, out_sds)
    else:
        out_specs, out_shape = out_block, out_sds

    kernel = _make_conv3_kernel(l_out=L_out, cin=Cin, stride=stride, relu=relu,
                                has_residual=has_residual,
                                has_shortcut=has_shortcut)
    return pl.pallas_call(
        kernel,
        grid=grid,
        in_specs=in_specs,
        out_specs=out_specs,
        out_shape=out_shape,
        compiler_params=_cparams("parallel", "parallel"),
    )(*operands)


def pool_linear(feat, w, b, *, tl=512):
    """adaptive_avg_pool1d(., 1).squeeze(-1) + Linear, tiled over L."""
    B, L, C = feat.shape
    N = w.shape[1]
    if L <= tl:
        tl = L
        f = feat
    else:
        Lp = pl.cdiv(L, tl) * tl
        f = jnp.pad(feat, ((0, 0), (0, Lp - L), (0, 0)))
    grid = (f.shape[1] // tl,)
    kernel = functools.partial(_pool_linear_kernel, inv_len=1.0 / L)
    return pl.pallas_call(
        kernel,
        grid=grid,
        in_specs=[
            pl.BlockSpec((B, tl, C), lambda i: (0, i, 0)),
            pl.BlockSpec((C, N), lambda i: (0, 0)),
            pl.BlockSpec((1, N), lambda i: (0, 0)),
        ],
        out_specs=pl.BlockSpec((B, N), lambda i: (0, 0)),
        out_shape=jax.ShapeDtypeStruct((B, N), jnp.float32),
        scratch_shapes=[pltpu.VMEM((B, C), jnp.float32)],
        compiler_params=_cparams("arbitrary"),
    )(f.astype(jnp.bfloat16), w.astype(jnp.float32),
      b.reshape(1, N).astype(jnp.float32))


# ----------------------------------------------------------------------------
# Model wiring
# ----------------------------------------------------------------------------
def basic_block(x, p):
    stride = p["stride"]
    if "shortcut_w" in p:
        h, sc = conv3_bn(x, p["conv1_w"], p["bn1"], stride=stride, relu=True,
                         shortcut=(p["shortcut_w"], p["shortcut_bn"]))
    else:
        h = conv3_bn(x, p["conv1_w"], p["bn1"], stride=stride, relu=True)
        sc = x
    return conv3_bn(h, p["conv2_w"], p["bn2"], stride=1, relu=True, residual=sc)


def resnet1d_forward(params, x):
    # Reference permutes (B, L, C) -> (B, C, L) for Conv1d; we stay channels-last.
    h = x.astype(jnp.bfloat16)
    # TODO(synk): the stem's K = channels_num is tiny (e.g. 4) so the MXU is
    # mostly idle there; a VPU outer-product path would be better but is noise.
    h = conv3_bn(h, params["conv1_w"], params["bn1"], stride=1, relu=True)
    for li, layer in enumerate(params["layers"]):
        for blk in layer:
            h = basic_block(h, blk)
        if li == 2:
            # TODO(synk): F.dropout(p=0.25) runs with training=True in the
            # reference; implemented as identity (eval semantics) to stay
            # deterministic.
            pass
    return pool_linear(h, params["linear_w"], params["linear_b"])


# ----------------------------------------------------------------------------
# Deterministic parameter initialization
# ----------------------------------------------------------------------------
def init_bn(key, c):
    k1, k2, k3, k4 = jax.random.split(key, 4)
    gamma = 1.0 + 0.1 * jax.random.normal(k1, (c,), jnp.float32)
    beta = 0.1 * jax.random.normal(k2, (c,), jnp.float32)
    mean = 0.1 * jax.random.normal(k3, (c,), jnp.float32)
    var = 0.5 + 0.1 * jnp.abs(jax.random.normal(k4, (c,), jnp.float32))
    return gamma, beta, mean, var


def init_conv(key, cout, cin, k):
    fan_in = cin * k
    return jax.random.normal(key, (cout, cin, k), jnp.float32) / jnp.sqrt(fan_in)


def init_block(key, cin, cout, stride):
    keys = jax.random.split(key, 6)
    p = {
        "stride": stride,
        "conv1_w": init_conv(keys[0], cout, cin, 3),
        "bn1": init_bn(keys[1], cout),
        "conv2_w": init_conv(keys[2], cout, cout, 3),
        "bn2": init_bn(keys[3], cout),
    }
    if stride != 1 or cin != cout:
        p["shortcut_w"] = init_conv(keys[4], cout, cin, 1)
        p["shortcut_bn"] = init_bn(keys[5], cout)
    return p


def init_resnet1d(key, channels_num, num_blocks):
    keys = jax.random.split(key, 8)
    params = {
        "conv1_w": init_conv(keys[0], 64, channels_num, 3),
        "bn1": init_bn(keys[1], 64),
    }
    in_c = 64
    layer_cfg = [(64, num_blocks[0], 1), (128, num_blocks[1], 2),
                 (128, num_blocks[2], 2), (256, num_blocks[3], 2)]
    layers = []
    for li, (out_c, nb, stride) in enumerate(layer_cfg):
        strides = [stride] + [1] * (nb - 1)
        bkeys = jax.random.split(keys[2 + li], nb)
        blocks = []
        for bi, s in enumerate(strides):
            blocks.append(init_block(bkeys[bi], in_c, out_c, s))
            in_c = out_c
        layers.append(blocks)
    params["layers"] = layers
    params["linear_w"] = jax.random.normal(keys[6], (256, 2), jnp.float32) / jnp.sqrt(256.0)
    params["linear_b"] = 0.1 * jax.random.normal(keys[7], (2,), jnp.float32)
    return params


# ----------------------------------------------------------------------------
if __name__ == "__main__":
    key = jax.random.PRNGKey(0)
    pkey, xkey = jax.random.split(key)

    batch, sample_len, channels_num = 2, 16, 4
    num_blocks = [1, 1, 1, 1]

    params = init_resnet1d(pkey, channels_num, num_blocks)
    x = jax.random.normal(xkey, (batch, sample_len, channels_num), jnp.float32)

    fwd = jax.jit(lambda inp: resnet1d_forward(params, inp))
    out = jax.block_until_ready(fwd(x))
    assert out.shape == (batch, 2) and out.dtype == jnp.float32
    print("KERNEL_OK")
</pallas_src>

<mosaic_0001>
module attributes {stable_mosaic.version = 11 : i64} {
  func.func @kernel(%arg0: i32, %arg1: i32, %arg2: memref<1x18x4xbf16, #tpu.memory_space<vmem>>, %arg3: memref<3x4x64xbf16, #tpu.memory_space<vmem>>, %arg4: memref<1x64xf32, #tpu.memory_space<vmem>>, %arg5: memref<1x16x64xbf16, #tpu.memory_space<vmem>>) attributes {dimension_semantics = [#tpu.dimension_semantics<parallel>, #tpu.dimension_semantics<parallel>], iteration_bounds = array<i64: 2, 1>, scalar_prefetch = 0 : i64, scratch_operands = 0 : i64, tpu.core_type = #tpu.core_type<tc>, window_params = [{transform_indices = @transform_0, window_bounds = array<i64: 1, 18, 4>}, {transform_indices = @transform_1, window_bounds = array<i64: 3, 4, 64>}, {transform_indices = @transform_2, window_bounds = array<i64: 1, 64>}, {transform_indices = @transform_3, window_bounds = array<i64: 1, 16, 64>}]} {
    %c0 = arith.constant 0 : index
    %c0_0 = arith.constant 0 : index
    %c0_1 = arith.constant 0 : index
    %0 = vector.load %arg2[%c0, %c0_0, %c0_1] : memref<1x18x4xbf16, #tpu.memory_space<vmem>>, vector<1x16x4xbf16>
    %1 = vector.shape_cast %0 : vector<1x16x4xbf16> to vector<16x4xbf16>
    %c0_2 = arith.constant 0 : index
    %c0_3 = arith.constant 0 : index
    %c0_4 = arith.constant 0 : index
    %2 = vector.load %arg3[%c0_2, %c0_3, %c0_4] : memref<3x4x64xbf16, #tpu.memory_space<vmem>>, vector<1x4x64xbf16>
    %3 = vector.shape_cast %2 : vector<1x4x64xbf16> to vector<4x64xbf16>
    %cst = arith.constant dense<0.000000e+00> : vector<16x64xf32>
    %4 = tpu.matmul %1, %3, %cst {dimension_numbers = #tpu.dot_dimension_numbers<[1], [0], [0], [1], [0, 0, 1, 1], [], []>} : vector<16x4xbf16>, vector<4x64xbf16>, vector<16x64xf32> -> vector<16x64xf32>
    %c0_5 = arith.constant 0 : index
    %c1 = arith.constant 1 : index
    %c0_6 = arith.constant 0 : index
    %5 = vector.load %arg2[%c0_5, %c1, %c0_6] : memref<1x18x4xbf16, #tpu.memory_space<vmem>>, vector<1x16x4xbf16>
    %6 = vector.shape_cast %5 : vector<1x16x4xbf16> to vector<16x4xbf16>
    %c1_7 = arith.constant 1 : index
    %c0_8 = arith.constant 0 : index
    %c0_9 = arith.constant 0 : index
    %7 = vector.load %arg3[%c1_7, %c0_8, %c0_9] : memref<3x4x64xbf16, #tpu.memory_space<vmem>>, vector<1x4x64xbf16>
    %8 = vector.shape_cast %7 : vector<1x4x64xbf16> to vector<4x64xbf16>
    %cst_10 = arith.constant dense<0.000000e+00> : vector<16x64xf32>
    %9 = tpu.matmul %6, %8, %cst_10 {dimension_numbers = #tpu.dot_dimension_numbers<[1], [0], [0], [1], [0, 0, 1, 1], [], []>} : vector<16x4xbf16>, vector<4x64xbf16>, vector<16x64xf32> -> vector<16x64xf32>
    %10 = arith.addf %4, %9 : vector<16x64xf32>
    %c0_11 = arith.constant 0 : index
    %c2 = arith.constant 2 : index
    %c0_12 = arith.constant 0 : index
    %11 = vector.load %arg2[%c0_11, %c2, %c0_12] : memref<1x18x4xbf16, #tpu.memory_space<vmem>>, vector<1x16x4xbf16>
    %12 = vector.shape_cast %11 : vector<1x16x4xbf16> to vector<16x4xbf16>
    %c2_13 = arith.constant 2 : index
    %c0_14 = arith.constant 0 : index
    %c0_15 = arith.constant 0 : index
    %13 = vector.load %arg3[%c2_13, %c0_14, %c0_15] : memref<3x4x64xbf16, #tpu.memory_space<vmem>>, vector<1x4x64xbf16>
    %14 = vector.shape_cast %13 : vector<1x4x64xbf16> to vector<4x64xbf16>
    %cst_16 = arith.constant dense<0.000000e+00> : vector<16x64xf32>
    %15 = tpu.matmul %12, %14, %cst_16 {dimension_numbers = #tpu.dot_dimension_numbers<[1], [0], [0], [1], [0, 0, 1, 1], [], []>} : vector<16x4xbf16>, vector<4x64xbf16>, vector<16x64xf32> -> vector<16x64xf32>
    %16 = arith.addf %10, %15 : vector<16x64xf32>
    %c0_17 = arith.constant 0 : index
    %c0_18 = arith.constant 0 : index
    %17 = vector.load %arg4[%c0_17, %c0_18] : memref<1x64xf32, #tpu.memory_space<vmem>>, vector<1x64xf32>
    %18 = vector.broadcast %17 : vector<1x64xf32> to vector<16x64xf32>
    %19 = arith.addf %16, %18 : vector<16x64xf32>
    %cst_19 = arith.constant 0.000000e+00 : f32
    %20 = vector.broadcast %cst_19 : f32 to vector<16x64xf32>
    %21 = arith.maximumf %19, %20 : vector<16x64xf32>
    %22 = arith.truncf %21 : vector<16x64xf32> to vector<16x64xbf16>
    %c0_20 = arith.constant 0 : index
    %c0_21 = arith.constant 0 : index
    %c0_22 = arith.constant 0 : index
    %23 = vector.load %arg5[%c0_20, %c0_21, %c0_22] : memref<1x16x64xbf16, #tpu.memory_space<vmem>>, vector<1x16x64xbf16>
    %24 = vector.shape_cast %23 : vector<1x16x64xbf16> to vector<16x64xbf16>
    %25 = vector.shape_cast %22 : vector<16x64xbf16> to vector<1x16x64xbf16>
    tpu.vector_store %arg5[%c0_20, %c0_21, %c0_22], %25 {strides = array<i32>} : memref<1x16x64xbf16, #tpu.memory_space<vmem>>, vector<1x16x64xbf16>,
    return
  }
  func.func @transform_0(%arg0: i32, %arg1: i32) -> (i32, i32, i32) {
    %c0_i32 = arith.constant 0 : i32
    %c0_i32_0 = arith.constant 0 : i32
    %c0_i32_1 = arith.constant 0 : i32
    return %arg0, %c0_i32, %c0_i32_0 : i32, i32, i32
  }
  func.func @transform_1(%arg0: i32, %arg1: i32) -> (i32, i32, i32) {
    %c0_i32 = arith.constant 0 : i32
    %c0_i32_0 = arith.constant 0 : i32
    %c0_i32_1 = arith.constant 0 : i32
    return %c0_i32, %c0_i32_0, %arg1 : i32, i32, i32
  }
  func.func @transform_2(%arg0: i32, %arg1: i32) -> (i32, i32) {
    %c0_i32 = arith.constant 0 : i32
    %c0_i32_0 = arith.constant 0 : i32
    return %c0_i32, %arg1 : i32, i32
  }
  func.func @transform_3(%arg0: i32, %arg1: i32) -> (i32, i32, i32) {
    %c0_i32 = arith.constant 0 : i32
    %c0_i32_0 = arith.constant 0 : i32
    return %arg0, %c0_i32, %arg1 : i32, i32, i32
  }
}

module attributes {stable_mosaic.version = 11 : i64} {
  func.func @kernel(%arg0: i32, %arg1: i32, %arg2: memref<1x18x64xbf16, #tpu.memory_space<vmem>>, %arg3: memref<3x64x64xbf16, #tpu.memory_space<vmem>>, %arg4: memref<1x64xf32, #tpu.memory_space<vmem>>, %arg5: memref<1x16x64xbf16, #tpu.memory_space<vmem>>) attributes {dimension_semantics = [#tpu.dimension_semantics<parallel>, #tpu.dimension_semantics<parallel>], iteration_bounds = array<i64: 2, 1>, scalar_prefetch = 0 : i64, scratch_operands = 0 : i64, tpu.core_type = #tpu.core_type<tc>, window_params = [{transform_indices = @transform_0, window_bounds = array<i64: 1, 18, 64>}, {transform_indices = @transform_1, window_bounds = array<i64: 3, 64, 64>}, {transform_indices = @transform_2, window_bounds = array<i64: 1, 64>}, {transform_indices = @transform_3, window_bounds = array<i64: 1, 16, 64>}]} {
    %c0 = arith.constant 0 : index
    %c0_0 = arith.constant 0 : index
    %c0_1 = arith.constant 0 : index
    %0 = vector.load %arg2[%c0, %c0_0, %c0_1] : memref<1x18x64xbf16, #tpu.memory_space<vmem>>, vector<1x16x64xbf16>
    %1 = vector.shape_cast %0 : vector<1x16x64xbf16> to vector<16x64xbf16>
    %c0_2 = arith.constant 0 : index
    %c0_3 = arith.constant 0 : index
    %c0_4 = arith.constant 0 : index
    %2 = vector.load %arg3[%c0_2, %c0_3, %c0_4] : memref<3x64x64xbf16, #tpu.memory_space<vmem>>, vector<1x64x64xbf16>
    %3 = vector.shape_cast %2 : vector<1x64x64xbf16> to vector<64x64xbf16>
    %cst = arith.constant dense<0.000000e+00> : vector<16x64xf32>
    %4 = tpu.matmul %1, %3, %cst {dimension_numbers = #tpu.dot_dimension_numbers<[1], [0], [0], [1], [0, 0, 1, 1], [], []>} : vector<16x64xbf16>, vector<64x64xbf16>, vector<16x64xf32> -> vector<16x64xf32>
    %c0_5 = arith.constant 0 : index
    %c1 = arith.constant 1 : index
    %c0_6 = arith.constant 0 : index
    %5 = vector.load %arg2[%c0_5, %c1, %c0_6] : memref<1x18x64xbf16, #tpu.memory_space<vmem>>, vector<1x16x64xbf16>
    %6 = vector.shape_cast %5 : vector<1x16x64xbf16> to vector<16x64xbf16>
    %c1_7 = arith.constant 1 : index
    %c0_8 = arith.constant 0 : index
    %c0_9 = arith.constant 0 : index
    %7 = vector.load %arg3[%c1_7, %c0_8, %c0_9] : memref<3x64x64xbf16, #tpu.memory_space<vmem>>, vector<1x64x64xbf16>
    %8 = vector.shape_cast %7 : vector<1x64x64xbf16> to vector<64x64xbf16>
    %cst_10 = arith.constant dense<0.000000e+00> : vector<16x64xf32>
    %9 = tpu.matmul %6, %8, %cst_10 {dimension_numbers = #tpu.dot_dimension_numbers<[1], [0], [0], [1], [0, 0, 1, 1], [], []>} : vector<16x64xbf16>, vector<64x64xbf16>, vector<16x64xf32> -> vector<16x64xf32>
    %10 = arith.addf %4, %9 : vector<16x64xf32>
    %c0_11 = arith.constant 0 : index
    %c2 = arith.constant 2 : index
    %c0_12 = arith.constant 0 : index
    %11 = vector.load %arg2[%c0_11, %c2, %c0_12] : memref<1x18x64xbf16, #tpu.memory_space<vmem>>, vector<1x16x64xbf16>
    %12 = vector.shape_cast %11 : vector<1x16x64xbf16> to vector<16x64xbf16>
    %c2_13 = arith.constant 2 : index
    %c0_14 = arith.constant 0 : index
    %c0_15 = arith.constant 0 : index
    %13 = vector.load %arg3[%c2_13, %c0_14, %c0_15] : memref<3x64x64xbf16, #tpu.memory_space<vmem>>, vector<1x64x64xbf16>
    %14 = vector.shape_cast %13 : vector<1x64x64xbf16> to vector<64x64xbf16>
    %cst_16 = arith.constant dense<0.000000e+00> : vector<16x64xf32>
    %15 = tpu.matmul %12, %14, %cst_16 {dimension_numbers = #tpu.dot_dimension_numbers<[1], [0], [0], [1], [0, 0, 1, 1], [], []>} : vector<16x64xbf16>, vector<64x64xbf16>, vector<16x64xf32> -> vector<16x64xf32>
    %16 = arith.addf %10, %15 : vector<16x64xf32>
    %c0_17 = arith.constant 0 : index
    %c0_18 = arith.constant 0 : index
    %17 = vector.load %arg4[%c0_17, %c0_18] : memref<1x64xf32, #tpu.memory_space<vmem>>, vector<1x64xf32>
    %18 = vector.broadcast %17 : vector<1x64xf32> to vector<16x64xf32>
    %19 = arith.addf %16, %18 : vector<16x64xf32>
    %cst_19 = arith.constant 0.000000e+00 : f32
    %20 = vector.broadcast %cst_19 : f32 to vector<16x64xf32>
    %21 = arith.maximumf %19, %20 : vector<16x64xf32>
    %22 = arith.truncf %21 : vector<16x64xf32> to vector<16x64xbf16>
    %c0_20 = arith.constant 0 : index
    %c0_21 = arith.constant 0 : index
    %c0_22 = arith.constant 0 : index
    %23 = vector.load %arg5[%c0_20, %c0_21, %c0_22] : memref<1x16x64xbf16, #tpu.memory_space<vmem>>, vector<1x16x64xbf16>
    %24 = vector.shape_cast %23 : vector<1x16x64xbf16> to vector<16x64xbf16>
    %25 = vector.shape_cast %22 : vector<16x64xbf16> to vector<1x16x64xbf16>
    tpu.vector_store %arg5[%c0_20, %c0_21, %c0_22], %25 {strides = array<i32>} : memref<1x16x64xbf16, #tpu.memory_space<vmem>>, vector<1x16x64xbf16>,
    return
  }
  func.func @transform_0(%arg0: i32, %arg1: i32) -> (i32, i32, i32) {
    %c0_i32 = arith.constant 0 : i32
    %c0_i32_0 = arith.constant 0 : i32
    %c0_i32_1 = arith.constant 0 : i32
    return %arg0, %c0_i32, %c0_i32_0 : i32, i32, i32
  }
  func.func @transform_1(%arg0: i32, %arg1: i32) -> (i32, i32, i32) {
    %c0_i32 = arith.constant 0 : i32
    %c0_i32_0 = arith.constant 0 : i32
    %c0_i32_1 = arith.constant 0 : i32
    return %c0_i32, %c0_i32_0, %arg1 : i32, i32, i32
  }
  func.func @transform_2(%arg0: i32, %arg1: i32) -> (i32, i32) {
    %c0_i32 = arith.constant 0 : i32
    %c0_i32_0 = arith.constant 0 : i32
    return %c0_i32, %arg1 : i32, i32
  }
  func.func @transform_3(%arg0: i32, %arg1: i32) -> (i32, i32, i32) {
    %c0_i32 = arith.constant 0 : i32
    %c0_i32_0 = arith.constant 0 : i32
    return %arg0, %c0_i32, %arg1 : i32, i32, i32
  }
}

module attributes {stable_mosaic.version = 11 : i64} {
  func.func @kernel(%arg0: i32, %arg1: i32, %arg2: memref<1x18x64xbf16, #tpu.memory_space<vmem>>, %arg3: memref<3x64x64xbf16, #tpu.memory_space<vmem>>, %arg4: memref<1x64xf32, #tpu.memory_space<vmem>>, %arg5: memref<1x16x64xbf16, #tpu.memory_space<vmem>>, %arg6: memref<1x16x64xbf16, #tpu.memory_space<vmem>>) attributes {dimension_semantics = [#tpu.dimension_semantics<parallel>, #tpu.dimension_semantics<parallel>], iteration_bounds = array<i64: 2, 1>, scalar_prefetch = 0 : i64, scratch_operands = 0 : i64, tpu.core_type = #tpu.core_type<tc>, window_params = [{transform_indices = @transform_0, window_bounds = array<i64: 1, 18, 64>}, {transform_indices = @transform_1, window_bounds = array<i64: 3, 64, 64>}, {transform_indices = @transform_2, window_bounds = array<i64: 1, 64>}, {transform_indices = @transform_3, window_bounds = array<i64: 1, 16, 64>}, {transform_indices = @transform_4, window_bounds = array<i64: 1, 16, 64>}]} {
    %c0 = arith.constant 0 : index
    %c0_0 = arith.constant 0 : index
    %c0_1 = arith.constant 0 : index
    %0 = vector.load %arg2[%c0, %c0_0, %c0_1] : memref<1x18x64xbf16, #tpu.memory_space<vmem>>, vector<1x16x64xbf16>
    %1 = vector.shape_cast %0 : vector<1x16x64xbf16> to vector<16x64xbf16>
    %c0_2 = arith.constant 0 : index
    %c0_3 = arith.constant 0 : index
    %c0_4 = arith.constant 0 : index
    %2 = vector.load %arg3[%c0_2, %c0_3, %c0_4] : memref<3x64x64xbf16, #tpu.memory_space<vmem>>, vector<1x64x64xbf16>
    %3 = vector.shape_cast %2 : vector<1x64x64xbf16> to vector<64x64xbf16>
    %cst = arith.constant dense<0.000000e+00> : vector<16x64xf32>
    %4 = tpu.matmul %1, %3, %cst {dimension_numbers = #tpu.dot_dimension_numbers<[1], [0], [0], [1], [0, 0, 1, 1], [], []>} : vector<16x64xbf16>, vector<64x64xbf16>, vector<16x64xf32> -> vector<16x64xf32>
    %c0_5 = arith.constant 0 : index
    %c1 = arith.constant 1 : index
    %c0_6 = arith.constant 0 : index
    %5 = vector.load %arg2[%c0_5, %c1, %c0_6] : memref<1x18x64xbf16, #tpu.memory_space<vmem>>, vector<1x16x64xbf16>
    %6 = vector.shape_cast %5 : vector<1x16x64xbf16> to vector<16x64xbf16>
    %c1_7 = arith.constant 1 : index
    %c0_8 = arith.constant 0 : index
    %c0_9 = arith.constant 0 : index
    %7 = vector.load %arg3[%c1_7, %c0_8, %c0_9] : memref<3x64x64xbf16, #tpu.memory_space<vmem>>, vector<1x64x64xbf16>
    %8 = vector.shape_cast %7 : vector<1x64x64xbf16> to vector<64x64xbf16>
    %cst_10 = arith.constant dense<0.000000e+00> : vector<16x64xf32>
    %9 = tpu.matmul %6, %8, %cst_10 {dimension_numbers = #tpu.dot_dimension_numbers<[1], [0], [0], [1], [0, 0, 1, 1], [], []>} : vector<16x64xbf16>, vector<64x64xbf16>, vector<16x64xf32> -> vector<16x64xf32>
    %10 = arith.addf %4, %9 : vector<16x64xf32>
    %c0_11 = arith.constant 0 : index
    %c2 = arith.constant 2 : index
    %c0_12 = arith.constant 0 : index
    %11 = vector.load %arg2[%c0_11, %c2, %c0_12] : memref<1x18x64xbf16, #tpu.memory_space<vmem>>, vector<1x16x64xbf16>
    %12 = vector.shape_cast %11 : vector<1x16x64xbf16> to vector<16x64xbf16>
    %c2_13 = arith.constant 2 : index
    %c0_14 = arith.constant 0 : index
    %c0_15 = arith.constant 0 : index
    %13 = vector.load %arg3[%c2_13, %c0_14, %c0_15] : memref<3x64x64xbf16, #tpu.memory_space<vmem>>, vector<1x64x64xbf16>
    %14 = vector.shape_cast %13 : vector<1x64x64xbf16> to vector<64x64xbf16>
    %cst_16 = arith.constant dense<0.000000e+00> : vector<16x64xf32>
    %15 = tpu.matmul %12, %14, %cst_16 {dimension_numbers = #tpu.dot_dimension_numbers<[1], [0], [0], [1], [0, 0, 1, 1], [], []>} : vector<16x64xbf16>, vector<64x64xbf16>, vector<16x64xf32> -> vector<16x64xf32>
    %16 = arith.addf %10, %15 : vector<16x64xf32>
    %c0_17 = arith.constant 0 : index
    %c0_18 = arith.constant 0 : index
    %17 = vector.load %arg4[%c0_17, %c0_18] : memref<1x64xf32, #tpu.memory_space<vmem>>, vector<1x64xf32>
    %18 = vector.broadcast %17 : vector<1x64xf32> to vector<16x64xf32>
    %19 = arith.addf %16, %18 : vector<16x64xf32>
    %c0_19 = arith.constant 0 : index
    %c0_20 = arith.constant 0 : index
    %c0_21 = arith.constant 0 : index
    %20 = vector.load %arg5[%c0_19, %c0_20, %c0_21] : memref<1x16x64xbf16, #tpu.memory_space<vmem>>, vector<1x16x64xbf16>
    %21 = vector.shape_cast %20 : vector<1x16x64xbf16> to vector<16x64xbf16>
    %22 = arith.extf %21 : vector<16x64xbf16> to vector<16x64xf32>
    %23 = arith.addf %19, %22 : vector<16x64xf32>
    %cst_22 = arith.constant 0.000000e+00 : f32
    %24 = vector.broadcast %cst_22 : f32 to vector<16x64xf32>
    %25 = arith.maximumf %23, %24 : vector<16x64xf32>
    %26 = arith.truncf %25 : vector<16x64xf32> to vector<16x64xbf16>
    %c0_23 = arith.constant 0 : index
    %c0_24 = arith.constant 0 : index
    %c0_25 = arith.constant 0 : index
    %27 = vector.load %arg6[%c0_23, %c0_24, %c0_25] : memref<1x16x64xbf16, #tpu.memory_space<vmem>>, vector<1x16x64xbf16>
    %28 = vector.shape_cast %27 : vector<1x16x64xbf16> to vector<16x64xbf16>
    %29 = vector.shape_cast %26 : vector<16x64xbf16> to vector<1x16x64xbf16>
    tpu.vector_store %arg6[%c0_23, %c0_24, %c0_25], %29 {strides = array<i32>} : memref<1x16x64xbf16, #tpu.memory_space<vmem>>, vector<1x16x64xbf16>,
    return
  }
  func.func @transform_0(%arg0: i32, %arg1: i32) -> (i32, i32, i32) {
    %c0_i32 = arith.constant 0 : i32
    %c0_i32_0 = arith.constant 0 : i32
    %c0_i32_1 = arith.constant 0 : i32
    return %arg0, %c0_i32, %c0_i32_0 : i32, i32, i32
  }
  func.func @transform_1(%arg0: i32, %arg1: i32) -> (i32, i32, i32) {
    %c0_i32 = arith.constant 0 : i32
    %c0_i32_0 = arith.constant 0 : i32
    %c0_i32_1 = arith.constant 0 : i32
    return %c0_i32, %c0_i32_0, %arg1 : i32, i32, i32
  }
  func.func @transform_2(%arg0: i32, %arg1: i32) -> (i32, i32) {
    %c0_i32 = arith.constant 0 : i32
    %c0_i32_0 = arith.constant 0 : i32
    return %c0_i32, %arg1 : i32, i32
  }
  func.func @transform_3(%arg0: i32, %arg1: i32) -> (i32, i32, i32) {
    %c0_i32 = arith.constant 0 : i32
    %c0_i32_0 = arith.constant 0 : i32
    return %arg0, %c0_i32, %arg1 : i32, i32, i32
  }
  func.func @transform_4(%arg0: i32, %arg1: i32) -> (i32, i32, i32) {
    %c0_i32 = arith.constant 0 : i32
    %c0_i32_0 = arith.constant 0 : i32
    return %arg0, %c0_i32, %arg1 : i32, i32, i32
  }
}

module attributes {stable_mosaic.version = 11 : i64} {
  func.func @kernel(%arg0: i32, %arg1: i32, %arg2: memref<1x9x128xbf16, #tpu.memory_space<vmem>>, %arg3: memref<3x64x128xbf16, #tpu.memory_space<vmem>>, %arg4: memref<1x128xf32, #tpu.memory_space<vmem>>, %arg5: memref<64x128xbf16, #tpu.memory_space<vmem>>, %arg6: memref<1x128xf32, #tpu.memory_space<vmem>>, %arg7: memref<1x8x128xbf16, #tpu.memory_space<vmem>>, %arg8: memref<1x8x128xbf16, #tpu.memory_space<vmem>>) attributes {dimension_semantics = [#tpu.dimension_semantics<parallel>, #tpu.dimension_semantics<parallel>], iteration_bounds = array<i64: 2, 1>, scalar_prefetch = 0 : i64, scratch_operands = 0 : i64, tpu.core_type = #tpu.core_type<tc>, window_params = [{transform_indices = @transform_0, window_bounds = array<i64: 1, 9, 128>}, {transform_indices = @transform_1, window_bounds = array<i64: 3, 64, 128>}, {transform_indices = @transform_2, window_bounds = array<i64: 1, 128>}, {transform_indices = @transform_3, window_bounds = array<i64: 64, 128>}, {transform_indices = @transform_4, window_bounds = array<i64: 1, 128>}, {transform_indices = @transform_5, window_bounds = array<i64: 1, 8, 128>}, {transform_indices = @transform_6, window_bounds = array<i64: 1, 8, 128>}]} {
    %c0 = arith.constant 0 : index
    %c0_0 = arith.constant 0 : index
    %c0_1 = arith.constant 0 : index
    %0 = vector.load %arg2[%c0, %c0_0, %c0_1] : memref<1x9x128xbf16, #tpu.memory_space<vmem>>, vector<1x8x64xbf16>
    %1 = vector.shape_cast %0 : vector<1x8x64xbf16> to vector<8x64xbf16>
    %c0_2 = arith.constant 0 : index
    %c0_3 = arith.constant 0 : index
    %c0_4 = arith.constant 0 : index
    %2 = vector.load %arg3[%c0_2, %c0_3, %c0_4] : memref<3x64x128xbf16, #tpu.memory_space<vmem>>, vector<1x64x128xbf16>
    %3 = vector.shape_cast %2 : vector<1x64x128xbf16> to vector<64x128xbf16>
    %cst = arith.constant dense<0.000000e+00> : vector<8x128xf32>
    %4 = tpu.matmul %1, %3, %cst {dimension_numbers = #tpu.dot_dimension_numbers<[1], [0], [0], [1], [0, 0, 1, 1], [], []>} : vector<8x64xbf16>, vector<64x128xbf16>, vector<8x128xf32> -> vector<8x128xf32>
    %c0_5 = arith.constant 0 : index
    %c0_6 = arith.constant 0 : index
    %c64 = arith.constant 64 : index
    %5 = vector.load %arg2[%c0_5, %c0_6, %c64] : memref<1x9x128xbf16, #tpu.memory_space<vmem>>, vector<1x8x64xbf16>
    %6 = vector.shape_cast %5 : vector<1x8x64xbf16> to vector<8x64xbf16>
    %c1 = arith.constant 1 : index
    %c0_7 = arith.constant 0 : index
    %c0_8 = arith.constant 0 : index
    %7 = vector.load %arg3[%c1, %c0_7, %c0_8] : memref<3x64x128xbf16, #tpu.memory_space<vmem>>, vector<1x64x128xbf16>
    %8 = vector.shape_cast %7 : vector<1x64x128xbf16> to vector<64x128xbf16>
    %cst_9 = arith.constant dense<0.000000e+00> : vector<8x128xf32>
    %9 = tpu.matmul %6, %8, %cst_9 {dimension_numbers = #tpu.dot_dimension_numbers<[1], [0], [0], [1], [0, 0, 1, 1], [], []>} : vector<8x64xbf16>, vector<64x128xbf16>, vector<8x128xf32> -> vector<8x128xf32>
    %10 = arith.addf %4, %9 : vector<8x128xf32>
    %c0_10 = arith.constant 0 : index
    %c1_11 = arith.constant 1 : index
    %c0_12 = arith.constant 0 : index
    %11 = vector.load %arg2[%c0_10, %c1_11, %c0_12] : memref<1x9x128xbf16, #tpu.memory_space<vmem>>, vector<1x8x64xbf16>
    %12 = vector.shape_cast %11 : vector<1x8x64xbf16> to vector<8x64xbf16>
    %c2 = arith.constant 2 : index
    %c0_13 = arith.constant 0 : index
    %c0_14 = arith.constant 0 : index
    %13 = vector.load %arg3[%c2, %c0_13, %c0_14] : memref<3x64x128xbf16, #tpu.memory_space<vmem>>, vector<1x64x128xbf16>
    %14 = vector.shape_cast %13 : vector<1x64x128xbf16> to vector<64x128xbf16>
    %cst_15 = arith.constant dense<0.000000e+00> : vector<8x128xf32>
    %15 = tpu.matmul %12, %14, %cst_15 {dimension_numbers = #tpu.dot_dimension_numbers<[1], [0], [0], [1], [0, 0, 1, 1], [], []>} : vector<8x64xbf16>, vector<64x128xbf16>, vector<8x128xf32> -> vector<8x128xf32>
    %16 = arith.addf %10, %15 : vector<8x128xf32>
    %c0_16 = arith.constant 0 : index
    %c0_17 = arith.constant 0 : index
    %17 = vector.load %arg4[%c0_16, %c0_17] : memref<1x128xf32, #tpu.memory_space<vmem>>, vector<1x128xf32>
    %18 = vector.broadcast %17 : vector<1x128xf32> to vector<8x128xf32>
    %19 = arith.addf %16, %18 : vector<8x128xf32>
    %cst_18 = arith.constant 0.000000e+00 : f32
    %20 = vector.broadcast %cst_18 : f32 to vector<8x128xf32>
    %21 = arith.maximumf %19, %20 : vector<8x128xf32>
    %22 = arith.truncf %21 : vector<8x128xf32> to vector<8x128xbf16>
    %c0_19 = arith.constant 0 : index
    %c0_20 = arith.constant 0 : index
    %c0_21 = arith.constant 0 : index
    %23 = vector.load %arg7[%c0_19, %c0_20, %c0_21] : memref<1x8x128xbf16, #tpu.memory_space<vmem>>, vector<1x8x128xbf16>
    %24 = vector.shape_cast %23 : vector<1x8x128xbf16> to vector<8x128xbf16>
    %25 = vector.shape_cast %22 : vector<8x128xbf16> to vector<1x8x128xbf16>
    tpu.vector_store %arg7[%c0_19, %c0_20, %c0_21], %25 {strides = array<i32>} : memref<1x8x128xbf16, #tpu.memory_space<vmem>>, vector<1x8x128xbf16>,
    %c0_22 = arith.constant 0 : index
    %c0_23 = arith.constant 0 : index
    %c64_24 = arith.constant 64 : index
    %26 = vector.load %arg2[%c0_22, %c0_23, %c64_24] : memref<1x9x128xbf16, #tpu.memory_space<vmem>>, vector<1x8x64xbf16>
    %27 = vector.shape_cast %26 : vector<1x8x64xbf16> to vector<8x64xbf16>
    %c0_25 = arith.constant 0 : index
    %c0_26 = arith.constant 0 : index
    %28 = vector.load %arg5[%c0_25, %c0_26] : memref<64x128xbf16, #tpu.memory_space<vmem>>, vector<64x128xbf16>
    %cst_27 = arith.constant dense<0.000000e+00> : vector<8x128xf32>
    %29 = tpu.matmul %27, %28, %cst_27 {dimension_numbers = #tpu.dot_dimension_numbers<[1], [0], [0], [1], [0, 0, 1, 1], [], []>} : vector<8x64xbf16>, vector<64x128xbf16>, vector<8x128xf32> -> vector<8x128xf32>
    %c0_28 = arith.constant 0 : index
    %c0_29 = arith.constant 0 : index
    %30 = vector.load %arg6[%c0_28, %c0_29] : memref<1x128xf32, #tpu.memory_space<vmem>>, vector<1x128xf32>
    %31 = vector.broadcast %30 : vector<1x128xf32> to vector<8x128xf32>
    %32 = arith.addf %29, %31 : vector<8x128xf32>
    %33 = arith.truncf %32 : vector<8x128xf32> to vector<8x128xbf16>
    %c0_30 = arith.constant 0 : index
    %c0_31 = arith.constant 0 : index
    %c0_32 = arith.constant 0 : index
    %34 = vector.load %arg8[%c0_30, %c0_31, %c0_32] : memref<1x8x128xbf16, #tpu.memory_space<vmem>>, vector<1x8x128xbf16>
    %35 = vector.shape_cast %34 : vector<1x8x128xbf16> to vector<8x128xbf16>
    %36 = vector.shape_cast %33 : vector<8x128xbf16> to vector<1x8x128xbf16>
    tpu.vector_store %arg8[%c0_30, %c0_31, %c0_32], %36 {strides = array<i32>} : memref<1x8x128xbf16, #tpu.memory_space<vmem>>, vector<1x8x128xbf16>,
    return
  }
  func.func @transform_0(%arg0: i32, %arg1: i32) -> (i32, i32, i32) {
    %c0_i32 = arith.constant 0 : i32
    %c0_i32_0 = arith.constant 0 : i32
    %c0_i32_1 = arith.constant 0 : i32
    return %arg0, %c0_i32, %c0_i32_0 : i32, i32, i32
  }
  func.func @transform_1(%arg0: i32, %arg1: i32) -> (i32, i32, i32) {
    %c0_i32 = arith.constant 0 : i32
    %c0_i32_0 = arith.constant 0 : i32
    %c0_i32_1 = arith.constant 0 : i32
    return %c0_i32, %c0_i32_0, %arg1 : i32, i32, i32
  }
  func.func @transform_2(%arg0: i32, %arg1: i32) -> (i32, i32) {
    %c0_i32 = arith.constant 0 : i32
    %c0_i32_0 = arith.constant 0 : i32
    return %c0_i32, %arg1 : i32, i32
  }
  func.func @transform_3(%arg0: i32, %arg1: i32) -> (i32, i32) {
    %c0_i32 = arith.constant 0 : i32
    %c0_i32_0 = arith.constant 0 : i32
    return %c0_i32, %arg1 : i32, i32
  }
  func.func @transform_4(%arg0: i32, %arg1: i32) -> (i32, i32) {
    %c0_i32 = arith.constant 0 : i32
    %c0_i32_0 = arith.constant 0 : i32
    return %c0_i32, %arg1 : i32, i32
  }
  func.func @transform_5(%arg0: i32, %arg1: i32) -> (i32, i32, i32) {
    %c0_i32 = arith.constant 0 : i32
    %c0_i32_0 = arith.constant 0 : i32
    return %arg0, %c0_i32, %arg1 : i32, i32, i32
  }
  func.func @transform_6(%arg0: i32, %arg1: i32) -> (i32, i32, i32) {
    %c0_i32 = arith.constant 0 : i32
    %c0_i32_0 = arith.constant 0 : i32
    return %arg0, %c0_i32, %arg1 : i32, i32, i32
  }
}

module attributes {stable_mosaic.version = 11 : i64} {
  func.func @kernel(%arg0: i32, %arg1: i32, %arg2: memref<1x10x128xbf16, #tpu.memory_space<vmem>>, %arg3: memref<3x128x128xbf16, #tpu.memory_space<vmem>>, %arg4: memref<1x128xf32, #tpu.memory_space<vmem>>, %arg5: memref<1x8x128xbf16, #tpu.memory_space<vmem>>, %arg6: memref<1x8x128xbf16, #tpu.memory_space<vmem>>) attributes {dimension_semantics = [#tpu.dimension_semantics<parallel>, #tpu.dimension_semantics<parallel>], iteration_bounds = array<i64: 2, 1>, scalar_prefetch = 0 : i64, scratch_operands = 0 : i64, tpu.core_type = #tpu.core_type<tc>, window_params = [{transform_indices = @transform_0, window_bounds = array<i64: 1, 10, 128>}, {transform_indices = @transform_1, window_bounds = array<i64: 3, 128, 128>}, {transform_indices = @transform_2, window_bounds = array<i64: 1, 128>}, {transform_indices = @transform_3, window_bounds = array<i64: 1, 8, 128>}, {transform_indices = @transform_4, window_bounds = array<i64: 1, 8, 128>}]} {
    %c0 = arith.constant 0 : index
    %c0_0 = arith.constant 0 : index
    %c0_1 = arith.constant 0 : index
    %0 = vector.load %arg2[%c0, %c0_0, %c0_1] : memref<1x10x128xbf16, #tpu.memory_space<vmem>>, vector<1x8x128xbf16>
    %1 = vector.shape_cast %0 : vector<1x8x128xbf16> to vector<8x128xbf16>
    %c0_2 = arith.constant 0 : index
    %c0_3 = arith.constant 0 : index
    %c0_4 = arith.constant 0 : index
    %2 = vector.load %arg3[%c0_2, %c0_3, %c0_4] : memref<3x128x128xbf16, #tpu.memory_space<vmem>>, vector<1x128x128xbf16>
    %3 = vector.shape_cast %2 : vector<1x128x128xbf16> to vector<128x128xbf16>
    %cst = arith.constant dense<0.000000e+00> : vector<8x128xf32>
    %4 = tpu.matmul %1, %3, %cst {dimension_numbers = #tpu.dot_dimension_numbers<[1], [0], [0], [1], [0, 0, 1, 1], [], []>} : vector<8x128xbf16>, vector<128x128xbf16>, vector<8x128xf32> -> vector<8x128xf32>
    %c0_5 = arith.constant 0 : index
    %c1 = arith.constant 1 : index
    %c0_6 = arith.constant 0 : index
    %5 = vector.load %arg2[%c0_5, %c1, %c0_6] : memref<1x10x128xbf16, #tpu.memory_space<vmem>>, vector<1x8x128xbf16>
    %6 = vector.shape_cast %5 : vector<1x8x128xbf16> to vector<8x128xbf16>
    %c1_7 = arith.constant 1 : index
    %c0_8 = arith.constant 0 : index
    %c0_9 = arith.constant 0 : index
    %7 = vector.load %arg3[%c1_7, %c0_8, %c0_9] : memref<3x128x128xbf16, #tpu.memory_space<vmem>>, vector<1x128x128xbf16>
    %8 = vector.shape_cast %7 : vector<1x128x128xbf16> to vector<128x128xbf16>
    %cst_10 = arith.constant dense<0.000000e+00> : vector<8x128xf32>
    %9 = tpu.matmul %6, %8, %cst_10 {dimension_numbers = #tpu.dot_dimension_numbers<[1], [0], [0], [1], [0, 0, 1, 1], [], []>} : vector<8x128xbf16>, vector<128x128xbf16>, vector<8x128xf32> -> vector<8x128xf32>
    %10 = arith.addf %4, %9 : vector<8x128xf32>
    %c0_11 = arith.constant 0 : index
    %c2 = arith.constant 2 : index
    %c0_12 = arith.constant 0 : index
    %11 = vector.load %arg2[%c0_11, %c2, %c0_12] : memref<1x10x128xbf16, #tpu.memory_space<vmem>>, vector<1x8x128xbf16>
    %12 = vector.shape_cast %11 : vector<1x8x128xbf16> to vector<8x128xbf16>
    %c2_13 = arith.constant 2 : index
    %c0_14 = arith.constant 0 : index
    %c0_15 = arith.constant 0 : index
    %13 = vector.load %arg3[%c2_13, %c0_14, %c0_15] : memref<3x128x128xbf16, #tpu.memory_space<vmem>>, vector<1x128x128xbf16>
    %14 = vector.shape_cast %13 : vector<1x128x128xbf16> to vector<128x128xbf16>
    %cst_16 = arith.constant dense<0.000000e+00> : vector<8x128xf32>
    %15 = tpu.matmul %12, %14, %cst_16 {dimension_numbers = #tpu.dot_dimension_numbers<[1], [0], [0], [1], [0, 0, 1, 1], [], []>} : vector<8x128xbf16>, vector<128x128xbf16>, vector<8x128xf32> -> vector<8x128xf32>
    %16 = arith.addf %10, %15 : vector<8x128xf32>
    %c0_17 = arith.constant 0 : index
    %c0_18 = arith.constant 0 : index
    %17 = vector.load %arg4[%c0_17, %c0_18] : memref<1x128xf32, #tpu.memory_space<vmem>>, vector<1x128xf32>
    %18 = vector.broadcast %17 : vector<1x128xf32> to vector<8x128xf32>
    %19 = arith.addf %16, %18 : vector<8x128xf32>
    %c0_19 = arith.constant 0 : index
    %c0_20 = arith.constant 0 : index
    %c0_21 = arith.constant 0 : index
    %20 = vector.load %arg5[%c0_19, %c0_20, %c0_21] : memref<1x8x128xbf16, #tpu.memory_space<vmem>>, vector<1x8x128xbf16>
    %21 = vector.shape_cast %20 : vector<1x8x128xbf16> to vector<8x128xbf16>
    %22 = arith.extf %21 : vector<8x128xbf16> to vector<8x128xf32>
    %23 = arith.addf %19, %22 : vector<8x128xf32>
    %cst_22 = arith.constant 0.000000e+00 : f32
    %24 = vector.broadcast %cst_22 : f32 to vector<8x128xf32>
    %25 = arith.maximumf %23, %24 : vector<8x128xf32>
    %26 = arith.truncf %25 : vector<8x128xf32> to vector<8x128xbf16>
    %c0_23 = arith.constant 0 : index
    %c0_24 = arith.constant 0 : index
    %c0_25 = arith.constant 0 : index
    %27 = vector.load %arg6[%c0_23, %c0_24, %c0_25] : memref<1x8x128xbf16, #tpu.memory_space<vmem>>, vector<1x8x128xbf16>
    %28 = vector.shape_cast %27 : vector<1x8x128xbf16> to vector<8x128xbf16>
    %29 = vector.shape_cast %26 : vector<8x128xbf16> to vector<1x8x128xbf16>
    tpu.vector_store %arg6[%c0_23, %c0_24, %c0_25], %29 {strides = array<i32>} : memref<1x8x128xbf16, #tpu.memory_space<vmem>>, vector<1x8x128xbf16>,
    return
  }
  func.func @transform_0(%arg0: i32, %arg1: i32) -> (i32, i32, i32) {
    %c0_i32 = arith.constant 0 : i32
    %c0_i32_0 = arith.constant 0 : i32
    %c0_i32_1 = arith.constant 0 : i32
    return %arg0, %c0_i32, %c0_i32_0 : i32, i32, i32
  }
  func.func @transform_1(%arg0: i32, %arg1: i32) -> (i32, i32, i32) {
    %c0_i32 = arith.constant 0 : i32
    %c0_i32_0 = arith.constant 0 : i32
    %c0_i32_1 = arith.constant 0 : i32
    return %c0_i32, %c0_i32_0, %arg1 : i32, i32, i32
  }
  func.func @transform_2(%arg0: i32, %arg1: i32) -> (i32, i32) {
    %c0_i32 = arith.constant 0 : i32
    %c0_i32_0 = arith.constant 0 : i32
    return %c0_i32, %arg1 : i32, i32
  }
  func.func @transform_3(%arg0: i32, %arg1: i32) -> (i32, i32, i32) {
    %c0_i32 = arith.constant 0 : i32
    %c0_i32_0 = arith.constant 0 : i32
    return %arg0, %c0_i32, %arg1 : i32, i32, i32
  }
  func.func @transform_4(%arg0: i32, %arg1: i32) -> (i32, i32, i32) {
    %c0_i32 = arith.constant 0 : i32
    %c0_i32_0 = arith.constant 0 : i32
    return %arg0, %c0_i32, %arg1 : i32, i32, i32
  }
}

module attributes {stable_mosaic.version = 11 : i64} {
  func.func @kernel(%arg0: i32, %arg1: i32, %arg2: memref<1x5x256xbf16, #tpu.memory_space<vmem>>, %arg3: memref<3x128x128xbf16, #tpu.memory_space<vmem>>, %arg4: memref<1x128xf32, #tpu.memory_space<vmem>>, %arg5: memref<128x128xbf16, #tpu.memory_space<vmem>>, %arg6: memref<1x128xf32, #tpu.memory_space<vmem>>, %arg7: memref<1x4x128xbf16, #tpu.memory_space<vmem>>, %arg8: memref<1x4x128xbf16, #tpu.memory_space<vmem>>) attributes {dimension_semantics = [#tpu.dimension_semantics<parallel>, #tpu.dimension_semantics<parallel>], iteration_bounds = array<i64: 2, 1>, scalar_prefetch = 0 : i64, scratch_operands = 0 : i64, tpu.core_type = #tpu.core_type<tc>, window_params = [{transform_indices = @transform_0, window_bounds = array<i64: 1, 5, 256>}, {transform_indices = @transform_1, window_bounds = array<i64: 3, 128, 128>}, {transform_indices = @transform_2, window_bounds = array<i64: 1, 128>}, {transform_indices = @transform_3, window_bounds = array<i64: 128, 128>}, {transform_indices = @transform_4, window_bounds = array<i64: 1, 128>}, {transform_indices = @transform_5, window_bounds = array<i64: 1, 4, 128>}, {transform_indices = @transform_6, window_bounds = array<i64: 1, 4, 128>}]} {
    %c0 = arith.constant 0 : index
    %c0_0 = arith.constant 0 : index
    %c0_1 = arith.constant 0 : index
    %0 = vector.load %arg2[%c0, %c0_0, %c0_1] : memref<1x5x256xbf16, #tpu.memory_space<vmem>>, vector<1x4x128xbf16>
    %1 = vector.shape_cast %0 : vector<1x4x128xbf16> to vector<4x128xbf16>
    %c0_2 = arith.constant 0 : index
    %c0_3 = arith.constant 0 : index
    %c0_4 = arith.constant 0 : index
    %2 = vector.load %arg3[%c0_2, %c0_3, %c0_4] : memref<3x128x128xbf16, #tpu.memory_space<vmem>>, vector<1x128x128xbf16>
    %3 = vector.shape_cast %2 : vector<1x128x128xbf16> to vector<128x128xbf16>
    %cst = arith.constant dense<0.000000e+00> : vector<4x128xf32>
    %4 = tpu.matmul %1, %3, %cst {dimension_numbers = #tpu.dot_dimension_numbers<[1], [0], [0], [1], [0, 0, 1, 1], [], []>} : vector<4x128xbf16>, vector<128x128xbf16>, vector<4x128xf32> -> vector<4x128xf32>
    %c0_5 = arith.constant 0 : index
    %c0_6 = arith.constant 0 : index
    %c128 = arith.constant 128 : index
    %5 = vector.load %arg2[%c0_5, %c0_6, %c128] : memref<1x5x256xbf16, #tpu.memory_space<vmem>>, vector<1x4x128xbf16>
    %6 = vector.shape_cast %5 : vector<1x4x128xbf16> to vector<4x128xbf16>
    %c1 = arith.constant 1 : index
    %c0_7 = arith.constant 0 : index
    %c0_8 = arith.constant 0 : index
    %7 = vector.load %arg3[%c1, %c0_7, %c0_8] : memref<3x128x128xbf16, #tpu.memory_space<vmem>>, vector<1x128x128xbf16>
    %8 = vector.shape_cast %7 : vector<1x128x128xbf16> to vector<128x128xbf16>
    %cst_9 = arith.constant dense<0.000000e+00> : vector<4x128xf32>
    %9 = tpu.matmul %6, %8, %cst_9 {dimension_numbers = #tpu.dot_dimension_numbers<[1], [0], [0], [1], [0, 0, 1, 1], [], []>} : vector<4x128xbf16>, vector<128x128xbf16>, vector<4x128xf32> -> vector<4x128xf32>
    %10 = arith.addf %4, %9 : vector<4x128xf32>
    %c0_10 = arith.constant 0 : index
    %c1_11 = arith.constant 1 : index
    %c0_12 = arith.constant 0 : index
    %11 = vector.load %arg2[%c0_10, %c1_11, %c0_12] : memref<1x5x256xbf16, #tpu.memory_space<vmem>>, vector<1x4x128xbf16>
    %12 = vector.shape_cast %11 : vector<1x4x128xbf16> to vector<4x128xbf16>
    %c2 = arith.constant 2 : index
    %c0_13 = arith.constant 0 : index
    %c0_14 = arith.constant 0 : index
    %13 = vector.load %arg3[%c2, %c0_13, %c0_14] : memref<3x128x128xbf16, #tpu.memory_space<vmem>>, vector<1x128x128xbf16>
    %14 = vector.shape_cast %13 : vector<1x128x128xbf16> to vector<128x128xbf16>
    %cst_15 = arith.constant dense<0.000000e+00> : vector<4x128xf32>
    %15 = tpu.matmul %12, %14, %cst_15 {dimension_numbers = #tpu.dot_dimension_numbers<[1], [0], [0], [1], [0, 0, 1, 1], [], []>} : vector<4x128xbf16>, vector<128x128xbf16>, vector<4x128xf32> -> vector<4x128xf32>
    %16 = arith.addf %10, %15 : vector<4x128xf32>
    %c0_16 = arith.constant 0 : index
    %c0_17 = arith.constant 0 : index
    %17 = vector.load %arg4[%c0_16, %c0_17] : memref<1x128xf32, #tpu.memory_space<vmem>>, vector<1x128xf32>
    %18 = vector.broadcast %17 : vector<1x128xf32> to vector<4x128xf32>
    %19 = arith.addf %16, %18 : vector<4x128xf32>
    %cst_18 = arith.constant 0.000000e+00 : f32
    %20 = vector.broadcast %cst_18 : f32 to vector<4x128xf32>
    %21 = arith.maximumf %19, %20 : vector<4x128xf32>
    %22 = arith.truncf %21 : vector<4x128xf32> to vector<4x128xbf16>
    %c0_19 = arith.constant 0 : index
    %c0_20 = arith.constant 0 : index
    %c0_21 = arith.constant 0 : index
    %23 = vector.load %arg7[%c0_19, %c0_20, %c0_21] : memref<1x4x128xbf16, #tpu.memory_space<vmem>>, vector<1x4x128xbf16>
    %24 = vector.shape_cast %23 : vector<1x4x128xbf16> to vector<4x128xbf16>
    %25 = vector.shape_cast %22 : vector<4x128xbf16> to vector<1x4x128xbf16>
    tpu.vector_store %arg7[%c0_19, %c0_20, %c0_21], %25 {strides = array<i32>} : memref<1x4x128xbf16, #tpu.memory_space<vmem>>, vector<1x4x128xbf16>,
    %c0_22 = arith.constant 0 : index
    %c0_23 = arith.constant 0 : index
    %c128_24 = arith.constant 128 : index
    %26 = vector.load %arg2[%c0_22, %c0_23, %c128_24] : memref<1x5x256xbf16, #tpu.memory_space<vmem>>, vector<1x4x128xbf16>
    %27 = vector.shape_cast %26 : vector<1x4x128xbf16> to vector<4x128xbf16>
    %c0_25 = arith.constant 0 : index
    %c0_26 = arith.constant 0 : index
    %28 = vector.load %arg5[%c0_25, %c0_26] : memref<128x128xbf16, #tpu.memory_space<vmem>>, vector<128x128xbf16>
    %cst_27 = arith.constant dense<0.000000e+00> : vector<4x128xf32>
    %29 = tpu.matmul %27, %28, %cst_27 {dimension_numbers = #tpu.dot_dimension_numbers<[1], [0], [0], [1], [0, 0, 1, 1], [], []>} : vector<4x128xbf16>, vector<128x128xbf16>, vector<4x128xf32> -> vector<4x128xf32>
    %c0_28 = arith.constant 0 : index
    %c0_29 = arith.constant 0 : index
    %30 = vector.load %arg6[%c0_28, %c0_29] : memref<1x128xf32, #tpu.memory_space<vmem>>, vector<1x128xf32>
    %31 = vector.broadcast %30 : vector<1x128xf32> to vector<4x128xf32>
    %32 = arith.addf %29, %31 : vector<4x128xf32>
    %33 = arith.truncf %32 : vector<4x128xf32> to vector<4x128xbf16>
    %c0_30 = arith.constant 0 : index
    %c0_31 = arith.constant 0 : index
    %c0_32 = arith.constant 0 : index
    %34 = vector.load %arg8[%c0_30, %c0_31, %c0_32] : memref<1x4x128xbf16, #tpu.memory_space<vmem>>, vector<1x4x128xbf16>
    %35 = vector.shape_cast %34 : vector<1x4x128xbf16> to vector<4x128xbf16>
    %36 = vector.shape_cast %33 : vector<4x128xbf16> to vector<1x4x128xbf16>
    tpu.vector_store %arg8[%c0_30, %c0_31, %c0_32], %36 {strides = array<i32>} : memref<1x4x128xbf16, #tpu.memory_space<vmem>>, vector<1x4x128xbf16>,
    return
  }
  func.func @transform_0(%arg0: i32, %arg1: i32) -> (i32, i32, i32) {
    %c0_i32 = arith.constant 0 : i32
    %c0_i32_0 = arith.constant 0 : i32
    %c0_i32_1 = arith.constant 0 : i32
    return %arg0, %c0_i32, %c0_i32_0 : i32, i32, i32
  }
  func.func @transform_1(%arg0: i32, %arg1: i32) -> (i32, i32, i32) {
    %c0_i32 = arith.constant 0 : i32
    %c0_i32_0 = arith.constant 0 : i32
    %c0_i32_1 = arith.constant 0 : i32
    return %c0_i32, %c0_i32_0, %arg1 : i32, i32, i32
  }
  func.func @transform_2(%arg0: i32, %arg1: i32) -> (i32, i32) {
    %c0_i32 = arith.constant 0 : i32
    %c0_i32_0 = arith.constant 0 : i32
    return %c0_i32, %arg1 : i32, i32
  }
  func.func @transform_3(%arg0: i32, %arg1: i32) -> (i32, i32) {
    %c0_i32 = arith.constant 0 : i32
    %c0_i32_0 = arith.constant 0 : i32
    return %c0_i32, %arg1 : i32, i32
  }
  func.func @transform_4(%arg0: i32, %arg1: i32) -> (i32, i32) {
    %c0_i32 = arith.constant 0 : i32
    %c0_i32_0 = arith.constant 0 : i32
    return %c0_i32, %arg1 : i32, i32
  }
  func.func @transform_5(%arg0: i32, %arg1: i32) -> (i32, i32, i32) {
    %c0_i32 = arith.constant 0 : i32
    %c0_i32_0 = arith.constant 0 : i32
    return %arg0, %c0_i32, %arg1 : i32, i32, i32
  }
  func.func @transform_6(%arg0: i32, %arg1: i32) -> (i32, i32, i32) {
    %c0_i32 = arith.constant 0 : i32
    %c0_i32_0 = arith.constant 0 : i32
    return %arg0, %c0_i32, %arg1 : i32, i32, i32
  }
}

module attributes {stable_mosaic.version = 11 : i64} {
  func.func @kernel(%arg0: i32, %arg1: i32, %arg2: memref<1x6x128xbf16, #tpu.memory_space<vmem>>, %arg3: memref<3x128x128xbf16, #tpu.memory_space<vmem>>, %arg4: memref<1x128xf32, #tpu.memory_space<vmem>>, %arg5: memref<1x4x128xbf16, #tpu.memory_space<vmem>>, %arg6: memref<1x4x128xbf16, #tpu.memory_space<vmem>>) attributes {dimension_semantics = [#tpu.dimension_semantics<parallel>, #tpu.dimension_semantics<parallel>], iteration_bounds = array<i64: 2, 1>, scalar_prefetch = 0 : i64, scratch_operands = 0 : i64, tpu.core_type = #tpu.core_type<tc>, window_params = [{transform_indices = @transform_0, window_bounds = array<i64: 1, 6, 128>}, {transform_indices = @transform_1, window_bounds = array<i64: 3, 128, 128>}, {transform_indices = @transform_2, window_bounds = array<i64: 1, 128>}, {transform_indices = @transform_3, window_bounds = array<i64: 1, 4, 128>}, {transform_indices = @transform_4, window_bounds = array<i64: 1, 4, 128>}]} {
    %c0 = arith.constant 0 : index
    %c0_0 = arith.constant 0 : index
    %c0_1 = arith.constant 0 : index
    %0 = vector.load %arg2[%c0, %c0_0, %c0_1] : memref<1x6x128xbf16, #tpu.memory_space<vmem>>, vector<1x4x128xbf16>
    %1 = vector.shape_cast %0 : vector<1x4x128xbf16> to vector<4x128xbf16>
    %c0_2 = arith.constant 0 : index
    %c0_3 = arith.constant 0 : index
    %c0_4 = arith.constant 0 : index
    %2 = vector.load %arg3[%c0_2, %c0_3, %c0_4] : memref<3x128x128xbf16, #tpu.memory_space<vmem>>, vector<1x128x128xbf16>
    %3 = vector.shape_cast %2 : vector<1x128x128xbf16> to vector<128x128xbf16>
    %cst = arith.constant dense<0.000000e+00> : vector<4x128xf32>
    %4 = tpu.matmul %1, %3, %cst {dimension_numbers = #tpu.dot_dimension_numbers<[1], [0], [0], [1], [0, 0, 1, 1], [], []>} : vector<4x128xbf16>, vector<128x128xbf16>, vector<4x128xf32> -> vector<4x128xf32>
    %c0_5 = arith.constant 0 : index
    %c1 = arith.constant 1 : index
    %c0_6 = arith.constant 0 : index
    %5 = vector.load %arg2[%c0_5, %c1, %c0_6] : memref<1x6x128xbf16, #tpu.memory_space<vmem>>, vector<1x4x128xbf16>
    %6 = vector.shape_cast %5 : vector<1x4x128xbf16> to vector<4x128xbf16>
    %c1_7 = arith.constant 1 : index
    %c0_8 = arith.constant 0 : index
    %c0_9 = arith.constant 0 : index
    %7 = vector.load %arg3[%c1_7, %c0_8, %c0_9] : memref<3x128x128xbf16, #tpu.memory_space<vmem>>, vector<1x128x128xbf16>
    %8 = vector.shape_cast %7 : vector<1x128x128xbf16> to vector<128x128xbf16>
    %cst_10 = arith.constant dense<0.000000e+00> : vector<4x128xf32>
    %9 = tpu.matmul %6, %8, %cst_10 {dimension_numbers = #tpu.dot_dimension_numbers<[1], [0], [0], [1], [0, 0, 1, 1], [], []>} : vector<4x128xbf16>, vector<128x128xbf16>, vector<4x128xf32> -> vector<4x128xf32>
    %10 = arith.addf %4, %9 : vector<4x128xf32>
    %c0_11 = arith.constant 0 : index
    %c2 = arith.constant 2 : index
    %c0_12 = arith.constant 0 : index
    %11 = vector.load %arg2[%c0_11, %c2, %c0_12] : memref<1x6x128xbf16, #tpu.memory_space<vmem>>, vector<1x4x128xbf16>
    %12 = vector.shape_cast %11 : vector<1x4x128xbf16> to vector<4x128xbf16>
    %c2_13 = arith.constant 2 : index
    %c0_14 = arith.constant 0 : index
    %c0_15 = arith.constant 0 : index
    %13 = vector.load %arg3[%c2_13, %c0_14, %c0_15] : memref<3x128x128xbf16, #tpu.memory_space<vmem>>, vector<1x128x128xbf16>
    %14 = vector.shape_cast %13 : vector<1x128x128xbf16> to vector<128x128xbf16>
    %cst_16 = arith.constant dense<0.000000e+00> : vector<4x128xf32>
    %15 = tpu.matmul %12, %14, %cst_16 {dimension_numbers = #tpu.dot_dimension_numbers<[1], [0], [0], [1], [0, 0, 1, 1], [], []>} : vector<4x128xbf16>, vector<128x128xbf16>, vector<4x128xf32> -> vector<4x128xf32>
    %16 = arith.addf %10, %15 : vector<4x128xf32>
    %c0_17 = arith.constant 0 : index
    %c0_18 = arith.constant 0 : index
    %17 = vector.load %arg4[%c0_17, %c0_18] : memref<1x128xf32, #tpu.memory_space<vmem>>, vector<1x128xf32>
    %18 = vector.broadcast %17 : vector<1x128xf32> to vector<4x128xf32>
    %19 = arith.addf %16, %18 : vector<4x128xf32>
    %c0_19 = arith.constant 0 : index
    %c0_20 = arith.constant 0 : index
    %c0_21 = arith.constant 0 : index
    %20 = vector.load %arg5[%c0_19, %c0_20, %c0_21] : memref<1x4x128xbf16, #tpu.memory_space<vmem>>, vector<1x4x128xbf16>
    %21 = vector.shape_cast %20 : vector<1x4x128xbf16> to vector<4x128xbf16>
    %22 = arith.extf %21 : vector<4x128xbf16> to vector<4x128xf32>
    %23 = arith.addf %19, %22 : vector<4x128xf32>
    %cst_22 = arith.constant 0.000000e+00 : f32
    %24 = vector.broadcast %cst_22 : f32 to vector<4x128xf32>
    %25 = arith.maximumf %23, %24 : vector<4x128xf32>
    %26 = arith.truncf %25 : vector<4x128xf32> to vector<4x128xbf16>
    %c0_23 = arith.constant 0 : index
    %c0_24 = arith.constant 0 : index
    %c0_25 = arith.constant 0 : index
    %27 = vector.load %arg6[%c0_23, %c0_24, %c0_25] : memref<1x4x128xbf16, #tpu.memory_space<vmem>>, vector<1x4x128xbf16>
    %28 = vector.shape_cast %27 : vector<1x4x128xbf16> to vector<4x128xbf16>
    %29 = vector.shape_cast %26 : vector<4x128xbf16> to vector<1x4x128xbf16>
    tpu.vector_store %arg6[%c0_23, %c0_24, %c0_25], %29 {strides = array<i32>} : memref<1x4x128xbf16, #tpu.memory_space<vmem>>, vector<1x4x128xbf16>,
    return
  }
  func.func @transform_0(%arg0: i32, %arg1: i32) -> (i32, i32, i32) {
    %c0_i32 = arith.constant 0 : i32
    %c0_i32_0 = arith.constant 0 : i32
    %c0_i32_1 = arith.constant 0 : i32
    return %arg0, %c0_i32, %c0_i32_0 : i32, i32, i32
  }
  func.func @transform_1(%arg0: i32, %arg1: i32) -> (i32, i32, i32) {
    %c0_i32 = arith.constant 0 : i32
    %c0_i32_0 = arith.constant 0 : i32
    %c0_i32_1 = arith.constant 0 : i32
    return %c0_i32, %c0_i32_0, %arg1 : i32, i32, i32
  }
  func.func @transform_2(%arg0: i32, %arg1: i32) -> (i32, i32) {
    %c0_i32 = arith.constant 0 : i32
    %c0_i32_0 = arith.constant 0 : i32
    return %c0_i32, %arg1 : i32, i32
  }
  func.func @transform_3(%arg0: i32, %arg1: i32) -> (i32, i32, i32) {
    %c0_i32 = arith.constant 0 : i32
    %c0_i32_0 = arith.constant 0 : i32
    return %arg0, %c0_i32, %arg1 : i32, i32, i32
  }
  func.func @transform_4(%arg0: i32, %arg1: i32) -> (i32, i32, i32) {
    %c0_i32 = arith.constant 0 : i32
    %c0_i32_0 = arith.constant 0 : i32
    return %arg0, %c0_i32, %arg1 : i32, i32, i32
  }
}

module attributes {stable_mosaic.version = 11 : i64} {
  func.func @kernel(%arg0: i32, %arg1: i32, %arg2: memref<1x3x256xbf16, #tpu.memory_space<vmem>>, %arg3: memref<3x128x256xbf16, #tpu.memory_space<vmem>>, %arg4: memref<1x256xf32, #tpu.memory_space<vmem>>, %arg5: memref<128x256xbf16, #tpu.memory_space<vmem>>, %arg6: memref<1x256xf32, #tpu.memory_space<vmem>>, %arg7: memref<1x2x256xbf16, #tpu.memory_space<vmem>>, %arg8: memref<1x2x256xbf16, #tpu.memory_space<vmem>>) attributes {dimension_semantics = [#tpu.dimension_semantics<parallel>, #tpu.dimension_semantics<parallel>], iteration_bounds = array<i64: 2, 1>, scalar_prefetch = 0 : i64, scratch_operands = 0 : i64, tpu.core_type = #tpu.core_type<tc>, window_params = [{transform_indices = @transform_0, window_bounds = array<i64: 1, 3, 256>}, {transform_indices = @transform_1, window_bounds = array<i64: 3, 128, 256>}, {transform_indices = @transform_2, window_bounds = array<i64: 1, 256>}, {transform_indices = @transform_3, window_bounds = array<i64: 128, 256>}, {transform_indices = @transform_4, window_bounds = array<i64: 1, 256>}, {transform_indices = @transform_5, window_bounds = array<i64: 1, 2, 256>}, {transform_indices = @transform_6, window_bounds = array<i64: 1, 2, 256>}]} {
    %c0 = arith.constant 0 : index
    %c0_0 = arith.constant 0 : index
    %c0_1 = arith.constant 0 : index
    %0 = vector.load %arg2[%c0, %c0_0, %c0_1] : memref<1x3x256xbf16, #tpu.memory_space<vmem>>, vector<1x2x128xbf16>
    %1 = vector.shape_cast %0 : vector<1x2x128xbf16> to vector<2x128xbf16>
    %c0_2 = arith.constant 0 : index
    %c0_3 = arith.constant 0 : index
    %c0_4 = arith.constant 0 : index
    %2 = vector.load %arg3[%c0_2, %c0_3, %c0_4] : memref<3x128x256xbf16, #tpu.memory_space<vmem>>, vector<1x128x256xbf16>
    %3 = vector.shape_cast %2 : vector<1x128x256xbf16> to vector<128x256xbf16>
    %cst = arith.constant dense<0.000000e+00> : vector<2x256xf32>
    %4 = tpu.matmul %1, %3, %cst {dimension_numbers = #tpu.dot_dimension_numbers<[1], [0], [0], [1], [0, 0, 1, 1], [], []>} : vector<2x128xbf16>, vector<128x256xbf16>, vector<2x256xf32> -> vector<2x256xf32>
    %c0_5 = arith.constant 0 : index
    %c0_6 = arith.constant 0 : index
    %c128 = arith.constant 128 : index
    %5 = vector.load %arg2[%c0_5, %c0_6, %c128] : memref<1x3x256xbf16, #tpu.memory_space<vmem>>, vector<1x2x128xbf16>
    %6 = vector.shape_cast %5 : vector<1x2x128xbf16> to vector<2x128xbf16>
    %c1 = arith.constant 1 : index
    %c0_7 = arith.constant 0 : index
    %c0_8 = arith.constant 0 : index
    %7 = vector.load %arg3[%c1, %c0_7, %c0_8] : memref<3x128x256xbf16, #tpu.memory_space<vmem>>, vector<1x128x256xbf16>
    %8 = vector.shape_cast %7 : vector<1x128x256xbf16> to vector<128x256xbf16>
    %cst_9 = arith.constant dense<0.000000e+00> : vector<2x256xf32>
    %9 = tpu.matmul %6, %8, %cst_9 {dimension_numbers = #tpu.dot_dimension_numbers<[1], [0], [0], [1], [0, 0, 1, 1], [], []>} : vector<2x128xbf16>, vector<128x256xbf16>, vector<2x256xf32> -> vector<2x256xf32>
    %10 = arith.addf %4, %9 : vector<2x256xf32>
    %c0_10 = arith.constant 0 : index
    %c1_11 = arith.constant 1 : index
    %c0_12 = arith.constant 0 : index
    %11 = vector.load %arg2[%c0_10, %c1_11, %c0_12] : memref<1x3x256xbf16, #tpu.memory_space<vmem>>, vector<1x2x128xbf16>
    %12 = vector.shape_cast %11 : vector<1x2x128xbf16> to vector<2x128xbf16>
    %c2 = arith.constant 2 : index
    %c0_13 = arith.constant 0 : index
    %c0_14 = arith.constant 0 : index
    %13 = vector.load %arg3[%c2, %c0_13, %c0_14] : memref<3x128x256xbf16, #tpu.memory_space<vmem>>, vector<1x128x256xbf16>
    %14 = vector.shape_cast %13 : vector<1x128x256xbf16> to vector<128x256xbf16>
    %cst_15 = arith.constant dense<0.000000e+00> : vector<2x256xf32>
    %15 = tpu.matmul %12, %14, %cst_15 {dimension_numbers = #tpu.dot_dimension_numbers<[1], [0], [0], [1], [0, 0, 1, 1], [], []>} : vector<2x128xbf16>, vector<128x256xbf16>, vector<2x256xf32> -> vector<2x256xf32>
    %16 = arith.addf %10, %15 : vector<2x256xf32>
    %c0_16 = arith.constant 0 : index
    %c0_17 = arith.constant 0 : index
    %17 = vector.load %arg4[%c0_16, %c0_17] : memref<1x256xf32, #tpu.memory_space<vmem>>, vector<1x256xf32>
    %18 = vector.broadcast %17 : vector<1x256xf32> to vector<2x256xf32>
    %19 = arith.addf %16, %18 : vector<2x256xf32>
    %cst_18 = arith.constant 0.000000e+00 : f32
    %20 = vector.broadcast %cst_18 : f32 to vector<2x256xf32>
    %21 = arith.maximumf %19, %20 : vector<2x256xf32>
    %22 = arith.truncf %21 : vector<2x256xf32> to vector<2x256xbf16>
    %c0_19 = arith.constant 0 : index
    %c0_20 = arith.constant 0 : index
    %c0_21 = arith.constant 0 : index
    %23 = vector.load %arg7[%c0_19, %c0_20, %c0_21] : memref<1x2x256xbf16, #tpu.memory_space<vmem>>, vector<1x2x256xbf16>
    %24 = vector.shape_cast %23 : vector<1x2x256xbf16> to vector<2x256xbf16>
    %25 = vector.shape_cast %22 : vector<2x256xbf16> to vector<1x2x256xbf16>
    tpu.vector_store %arg7[%c0_19, %c0_20, %c0_21], %25 {strides = array<i32>} : memref<1x2x256xbf16, #tpu.memory_space<vmem>>, vector<1x2x256xbf16>,
    %c0_22 = arith.constant 0 : index
    %c0_23 = arith.constant 0 : index
    %c128_24 = arith.constant 128 : index
    %26 = vector.load %arg2[%c0_22, %c0_23, %c128_24] : memref<1x3x256xbf16, #tpu.memory_space<vmem>>, vector<1x2x128xbf16>
    %27 = vector.shape_cast %26 : vector<1x2x128xbf16> to vector<2x128xbf16>
    %c0_25 = arith.constant 0 : index
    %c0_26 = arith.constant 0 : index
    %28 = vector.load %arg5[%c0_25, %c0_26] : memref<128x256xbf16, #tpu.memory_space<vmem>>, vector<128x256xbf16>
    %cst_27 = arith.constant dense<0.000000e+00> : vector<2x256xf32>
    %29 = tpu.matmul %27, %28, %cst_27 {dimension_numbers = #tpu.dot_dimension_numbers<[1], [0], [0], [1], [0, 0, 1, 1], [], []>} : vector<2x128xbf16>, vector<128x256xbf16>, vector<2x256xf32> -> vector<2x256xf32>
    %c0_28 = arith.constant 0 : index
    %c0_29 = arith.constant 0 : index
    %30 = vector.load %arg6[%c0_28, %c0_29] : memref<1x256xf32, #tpu.memory_space<vmem>>, vector<1x256xf32>
    %31 = vector.broadcast %30 : vector<1x256xf32> to vector<2x256xf32>
    %32 = arith.addf %29, %31 : vector<2x256xf32>
    %33 = arith.truncf %32 : vector<2x256xf32> to vector<2x256xbf16>
    %c0_30 = arith.constant 0 : index
    %c0_31 = arith.constant 0 : index
    %c0_32 = arith.constant 0 : index
    %34 = vector.load %arg8[%c0_30, %c0_31, %c0_32] : memref<1x2x256xbf16, #tpu.memory_space<vmem>>, vector<1x2x256xbf16>
    %35 = vector.shape_cast %34 : vector<1x2x256xbf16> to vector<2x256xbf16>
    %36 = vector.shape_cast %33 : vector<2x256xbf16> to vector<1x2x256xbf16>
    tpu.vector_store %arg8[%c0_30, %c0_31, %c0_32], %36 {strides = array<i32>} : memref<1x2x256xbf16, #tpu.memory_space<vmem>>, vector<1x2x256xbf16>,
    return
  }
  func.func @transform_0(%arg0: i32, %arg1: i32) -> (i32, i32, i32) {
    %c0_i32 = arith.constant 0 : i32
    %c0_i32_0 = arith.constant 0 : i32
    %c0_i32_1 = arith.constant 0 : i32
    return %arg0, %c0_i32, %c0_i32_0 : i32, i32, i32
  }
  func.func @transform_1(%arg0: i32, %arg1: i32) -> (i32, i32, i32) {
    %c0_i32 = arith.constant 0 : i32
    %c0_i32_0 = arith.constant 0 : i32
    %c0_i32_1 = arith.constant 0 : i32
    return %c0_i32, %c0_i32_0, %arg1 : i32, i32, i32
  }
  func.func @transform_2(%arg0: i32, %arg1: i32) -> (i32, i32) {
    %c0_i32 = arith.constant 0 : i32
    %c0_i32_0 = arith.constant 0 : i32
    return %c0_i32, %arg1 : i32, i32
  }
  func.func @transform_3(%arg0: i32, %arg1: i32) -> (i32, i32) {
    %c0_i32 = arith.constant 0 : i32
    %c0_i32_0 = arith.constant 0 : i32
    return %c0_i32, %arg1 : i32, i32
  }
  func.func @transform_4(%arg0: i32, %arg1: i32) -> (i32, i32) {
    %c0_i32 = arith.constant 0 : i32
    %c0_i32_0 = arith.constant 0 : i32
    return %c0_i32, %arg1 : i32, i32
  }
  func.func @transform_5(%arg0: i32, %arg1: i32) -> (i32, i32, i32) {
    %c0_i32 = arith.constant 0 : i32
    %c0_i32_0 = arith.constant 0 : i32
    return %arg0, %c0_i32, %arg1 : i32, i32, i32
  }
  func.func @transform_6(%arg0: i32, %arg1: i32) -> (i32, i32, i32) {
    %c0_i32 = arith.constant 0 : i32
    %c0_i32_0 = arith.constant 0 : i32
    return %arg0, %c0_i32, %arg1 : i32, i32, i32
  }
}

module attributes {stable_mosaic.version = 11 : i64} {
  func.func @kernel(%arg0: i32, %arg1: i32, %arg2: memref<1x4x256xbf16, #tpu.memory_space<vmem>>, %arg3: memref<3x256x256xbf16, #tpu.memory_space<vmem>>, %arg4: memref<1x256xf32, #tpu.memory_space<vmem>>, %arg5: memref<1x2x256xbf16, #tpu.memory_space<vmem>>, %arg6: memref<1x2x256xbf16, #tpu.memory_space<vmem>>) attributes {dimension_semantics = [#tpu.dimension_semantics<parallel>, #tpu.dimension_semantics<parallel>], iteration_bounds = array<i64: 2, 1>, scalar_prefetch = 0 : i64, scratch_operands = 0 : i64, tpu.core_type = #tpu.core_type<tc>, window_params = [{transform_indices = @transform_0, window_bounds = array<i64: 1, 4, 256>}, {transform_indices = @transform_1, window_bounds = array<i64: 3, 256, 256>}, {transform_indices = @transform_2, window_bounds = array<i64: 1, 256>}, {transform_indices = @transform_3, window_bounds = array<i64: 1, 2, 256>}, {transform_indices = @transform_4, window_bounds = array<i64: 1, 2, 256>}]} {
    %c0 = arith.constant 0 : index
    %c0_0 = arith.constant 0 : index
    %c0_1 = arith.constant 0 : index
    %0 = vector.load %arg2[%c0, %c0_0, %c0_1] : memref<1x4x256xbf16, #tpu.memory_space<vmem>>, vector<1x2x256xbf16>
    %1 = vector.shape_cast %0 : vector<1x2x256xbf16> to vector<2x256xbf16>
    %c0_2 = arith.constant 0 : index
    %c0_3 = arith.constant 0 : index
    %c0_4 = arith.constant 0 : index
    %2 = vector.load %arg3[%c0_2, %c0_3, %c0_4] : memref<3x256x256xbf16, #tpu.memory_space<vmem>>, vector<1x256x256xbf16>
    %3 = vector.shape_cast %2 : vector<1x256x256xbf16> to vector<256x256xbf16>
    %cst = arith.constant dense<0.000000e+00> : vector<2x256xf32>
    %4 = tpu.matmul %1, %3, %cst {dimension_numbers = #tpu.dot_dimension_numbers<[1], [0], [0], [1], [0, 0, 1, 1], [], []>} : vector<2x256xbf16>, vector<256x256xbf16>, vector<2x256xf32> -> vector<2x256xf32>
    %c0_5 = arith.constant 0 : index
    %c1 = arith.constant 1 : index
    %c0_6 = arith.constant 0 : index
    %5 = vector.load %arg2[%c0_5, %c1, %c0_6] : memref<1x4x256xbf16, #tpu.memory_space<vmem>>, vector<1x2x256xbf16>
    %6 = vector.shape_cast %5 : vector<1x2x256xbf16> to vector<2x256xbf16>
    %c1_7 = arith.constant 1 : index
    %c0_8 = arith.constant 0 : index
    %c0_9 = arith.constant 0 : index
    %7 = vector.load %arg3[%c1_7, %c0_8, %c0_9] : memref<3x256x256xbf16, #tpu.memory_space<vmem>>, vector<1x256x256xbf16>
    %8 = vector.shape_cast %7 : vector<1x256x256xbf16> to vector<256x256xbf16>
    %cst_10 = arith.constant dense<0.000000e+00> : vector<2x256xf32>
    %9 = tpu.matmul %6, %8, %cst_10 {dimension_numbers = #tpu.dot_dimension_numbers<[1], [0], [0], [1], [0, 0, 1, 1], [], []>} : vector<2x256xbf16>, vector<256x256xbf16>, vector<2x256xf32> -> vector<2x256xf32>
    %10 = arith.addf %4, %9 : vector<2x256xf32>
    %c0_11 = arith.constant 0 : index
    %c2 = arith.constant 2 : index
    %c0_12 = arith.constant 0 : index
    %11 = vector.load %arg2[%c0_11, %c2, %c0_12] : memref<1x4x256xbf16, #tpu.memory_space<vmem>>, vector<1x2x256xbf16>
    %12 = vector.shape_cast %11 : vector<1x2x256xbf16> to vector<2x256xbf16>
    %c2_13 = arith.constant 2 : index
    %c0_14 = arith.constant 0 : index
    %c0_15 = arith.constant 0 : index
    %13 = vector.load %arg3[%c2_13, %c0_14, %c0_15] : memref<3x256x256xbf16, #tpu.memory_space<vmem>>, vector<1x256x256xbf16>
    %14 = vector.shape_cast %13 : vector<1x256x256xbf16> to vector<256x256xbf16>
    %cst_16 = arith.constant dense<0.000000e+00> : vector<2x256xf32>
    %15 = tpu.matmul %12, %14, %cst_16 {dimension_numbers = #tpu.dot_dimension_numbers<[1], [0], [0], [1], [0, 0, 1, 1], [], []>} : vector<2x256xbf16>, vector<256x256xbf16>, vector<2x256xf32> -> vector<2x256xf32>
    %16 = arith.addf %10, %15 : vector<2x256xf32>
    %c0_17 = arith.constant 0 : index
    %c0_18 = arith.constant 0 : index
    %17 = vector.load %arg4[%c0_17, %c0_18] : memref<1x256xf32, #tpu.memory_space<vmem>>, vector<1x256xf32>
    %18 = vector.broadcast %17 : vector<1x256xf32> to vector<2x256xf32>
    %19 = arith.addf %16, %18 : vector<2x256xf32>
    %c0_19 = arith.constant 0 : index
    %c0_20 = arith.constant 0 : index
    %c0_21 = arith.constant 0 : index
    %20 = vector.load %arg5[%c0_19, %c0_20, %c0_21] : memref<1x2x256xbf16, #tpu.memory_space<vmem>>, vector<1x2x256xbf16>
    %21 = vector.shape_cast %20 : vector<1x2x256xbf16> to vector<2x256xbf16>
    %22 = arith.extf %21 : vector<2x256xbf16> to vector<2x256xf32>
    %23 = arith.addf %19, %22 : vector<2x256xf32>
    %cst_22 = arith.constant 0.000000e+00 : f32
    %24 = vector.broadcast %cst_22 : f32 to vector<2x256xf32>
    %25 = arith.maximumf %23, %24 : vector<2x256xf32>
    %26 = arith.truncf %25 : vector<2x256xf32> to vector<2x256xbf16>
    %c0_23 = arith.constant 0 : index
    %c0_24 = arith.constant 0 : index
    %c0_25 = arith.constant 0 : index
    %27 = vector.load %arg6[%c0_23, %c0_24, %c0_25] : memref<1x2x256xbf16, #tpu.memory_space<vmem>>, vector<1x2x256xbf16>
    %28 = vector.shape_cast %27 : vector<1x2x256xbf16> to vector<2x256xbf16>
    %29 = vector.shape_cast %26 : vector<2x256xbf16> to vector<1x2x256xbf16>
    tpu.vector_store %arg6[%c0_23, %c0_24, %c0_25], %29 {strides = array<i32>} : memref<1x2x256xbf16, #tpu.memory_space<vmem>>, vector<1x2x256xbf16>,
    return
  }
  func.func @transform_0(%arg0: i32, %arg1: i32) -> (i32, i32, i32) {
    %c0_i32 = arith.constant 0 : i32
    %c0_i32_0 = arith.constant 0 : i32
    %c0_i32_1 = arith.constant 0 : i32
    return %arg0, %c0_i32, %c0_i32_0 : i32, i32, i32
  }
  func.func @transform_1(%arg0: i32, %arg1: i32) -> (i32, i32, i32) {
    %c0_i32 = arith.constant 0 : i32
    %c0_i32_0 = arith.constant 0 : i32
    %c0_i32_1 = arith.constant 0 : i32
    return %c0_i32, %c0_i32_0, %arg1 : i32, i32, i32
  }
  func.func @transform_2(%arg0: i32, %arg1: i32) -> (i32, i32) {
    %c0_i32 = arith.constant 0 : i32
    %c0_i32_0 = arith.constant 0 : i32
    return %c0_i32, %arg1 : i32, i32
  }
  func.func @transform_3(%arg0: i32, %arg1: i32) -> (i32, i32, i32) {
    %c0_i32 = arith.constant 0 : i32
    %c0_i32_0 = arith.constant 0 : i32
    return %arg0, %c0_i32, %arg1 : i32, i32, i32
  }
  func.func @transform_4(%arg0: i32, %arg1: i32) -> (i32, i32, i32) {
    %c0_i32 = arith.constant 0 : i32
    %c0_i32_0 = arith.constant 0 : i32
    return %arg0, %c0_i32, %arg1 : i32, i32, i32
  }
}

module attributes {stable_mosaic.version = 11 : i64} {
  func.func @_pool_linear_kernel(%arg0: i32, %arg1: memref<2x2x256xbf16, #tpu.memory_space<vmem>>, %arg2: memref<256x2xf32, #tpu.memory_space<vmem>>, %arg3: memref<1x2xf32, #tpu.memory_space<vmem>>, %arg4: memref<2x2xf32, #tpu.memory_space<vmem>>, %arg5: memref<2x256xf32, #tpu.memory_space<vmem>>) attributes {dimension_semantics = [#tpu.dimension_semantics<arbitrary>], iteration_bounds = array<i64: 1>, scalar_prefetch = 0 : i64, scratch_operands = 1 : i64, tpu.core_type = #tpu.core_type<tc>, window_params = [{transform_indices = @transform_0, window_bounds = array<i64: 2, 2, 256>}, {pipeline_mode = #tpu.pipeline_mode<synchronous>, transform_indices = @transform_1, window_bounds = array<i64: 256, 2>}, {pipeline_mode = #tpu.pipeline_mode<synchronous>, transform_indices = @transform_2, window_bounds = array<i64: 1, 2>}, {pipeline_mode = #tpu.pipeline_mode<synchronous>, transform_indices = @transform_3, window_bounds = array<i64: 2, 2>}]} {
    %c0_i32 = arith.constant 0 : i32
    %0 = arith.cmpi eq, %arg0, %c0_i32 : i32
    %1 = arith.extui %0 : i1 to i32
    %c0_i32_0 = arith.constant 0 : i32
    %2 = arith.cmpi ne, %1, %c0_i32_0 : i32
    scf.if %2 {
      %cst_9 = arith.constant 0.000000e+00 : f32
      %12 = vector.broadcast %cst_9 : f32 to vector<2x256xf32>
      %c0_10 = arith.constant 0 : index
      %c0_11 = arith.constant 0 : index
      %13 = vector.load %arg5[%c0_10, %c0_11] : memref<2x256xf32, #tpu.memory_space<vmem>>, vector<2x256xf32>
      tpu.vector_store %arg5[%c0_10, %c0_11], %12 {strides = array<i32>} : memref<2x256xf32, #tpu.memory_space<vmem>>, vector<2x256xf32>,
    } else {
    }
    %c0 = arith.constant 0 : index
    %c0_1 = arith.constant 0 : index
    %3 = vector.load %arg5[%c0, %c0_1] : memref<2x256xf32, #tpu.memory_space<vmem>>, vector<2x256xf32>
    %c0_2 = arith.constant 0 : index
    %c0_3 = arith.constant 0 : index
    %c0_4 = arith.constant 0 : index
    %4 = vector.load %arg1[%c0_2, %c0_3, %c0_4] : memref<2x2x256xbf16, #tpu.memory_space<vmem>>, vector<2x2x256xbf16>
    %5 = arith.extf %4 : vector<2x2x256xbf16> to vector<2x2x256xf32>
    %cst = arith.constant dense<0.000000e+00> : vector<2x256xf32>
    %6 = vector.multi_reduction <add>, %5, %cst [1] : vector<2x2x256xf32> to vector<2x256xf32>
    %7 = arith.addf %3, %6 : vector<2x256xf32>
    %c0_5 = arith.constant 0 : index
    %c0_6 = arith.constant 0 : index
    %8 = vector.load %arg5[%c0_5, %c0_6] : memref<2x256xf32, #tpu.memory_space<vmem>>, vector<2x256xf32>
    tpu.vector_store %arg5[%c0_5, %c0_6], %7 {strides = array<i32>} : memref<2x256xf32, #tpu.memory_space<vmem>>, vector<2x256xf32>,
    %c0_i32_7 = arith.constant 0 : i32
    %9 = arith.cmpi eq, %arg0, %c0_i32_7 : i32
    %10 = arith.extui %9 : i1 to i32
    %c0_i32_8 = arith.constant 0 : i32
    %11 = arith.cmpi ne, %10, %c0_i32_8 : i32
    scf.if %11 {
      %c0_9 = arith.constant 0 : index
      %c0_10 = arith.constant 0 : index
      %12 = vector.load %arg5[%c0_9, %c0_10] : memref<2x256xf32, #tpu.memory_space<vmem>>, vector<2x256xf32>
      %cst_11 = arith.constant 5.000000e-01 : f32
      %13 = vector.broadcast %cst_11 : f32 to vector<2x256xf32>
      %14 = arith.mulf %12, %13 : vector<2x256xf32>
      %c0_12 = arith.constant 0 : index
      %c0_13 = arith.constant 0 : index
      %15 = vector.load %arg2[%c0_12, %c0_13] : memref<256x2xf32, #tpu.memory_space<vmem>>, vector<256x2xf32>
      %cst_14 = arith.constant dense<0.000000e+00> : vector<2x2xf32>
      %16 = tpu.matmul %14, %15, %cst_14 {dimension_numbers = #tpu.dot_dimension_numbers<[1], [0], [0], [1], [0, 0, 1, 1], [], []>} : vector<2x256xf32>, vector<256x2xf32>, vector<2x2xf32> -> vector<2x2xf32>
      %c0_15 = arith.constant 0 : index
      %c0_16 = arith.constant 0 : index
      %17 = vector.load %arg3[%c0_15, %c0_16] : memref<1x2xf32, #tpu.memory_space<vmem>>, vector<1x2xf32>
      %18 = vector.broadcast %17 : vector<1x2xf32> to vector<2x2xf32>
      %19 = arith.addf %16, %18 : vector<2x2xf32>
      %c0_17 = arith.constant 0 : index
      %c0_18 = arith.constant 0 : index
      %20 = vector.load %arg4[%c0_17, %c0_18] : memref<2x2xf32, #tpu.memory_space<vmem>>, vector<2x2xf32>
      tpu.vector_store %arg4[%c0_17, %c0_18], %19 {strides = array<i32>} : memref<2x2xf32, #tpu.memory_space<vmem>>, vector<2x2xf32>,
    } else {
    }
    return
  }
  func.func @transform_0(%arg0: i32) -> (i32, i32, i32) {
    %c0_i32 = arith.constant 0 : i32
    %c0_i32_0 = arith.constant 0 : i32
    %c0_i32_1 = arith.constant 0 : i32
    return %c0_i32, %arg0, %c0_i32_0 : i32, i32, i32
  }
  func.func @transform_1(%arg0: i32) -> (i32, i32) {
    %c0_i32 = arith.constant 0 : i32
    %c0_i32_0 = arith.constant 0 : i32
    %c0_i32_1 = arith.constant 0 : i32
    return %c0_i32, %c0_i32_0 : i32, i32
  }
  func.func @transform_2(%arg0: i32) -> (i32, i32) {
    %c0_i32 = arith.constant 0 : i32
    %c0_i32_0 = arith.constant 0 : i32
    %c0_i32_1 = arith.constant 0 : i32
    return %c0_i32, %c0_i32_0 : i32, i32
  }
  func.func @transform_3(%arg0: i32) -> (i32, i32) {
    %c0_i32 = arith.constant 0 : i32
    %c0_i32_0 = arith.constant 0 : i32
    %c0_i32_1 = arith.constant 0 : i32
    return %c0_i32, %c0_i32_0 : i32, i32
  }
}

</mosaic_0001>

<bundles_post_ra>
// kernel: _lambda_.10
= control target key start
LH: loop header
LB: loop body
LE: loop exit
PB: predicated region body
PF: predicated region fallthrough
CT: control target
= control target key end

     0   :  { %s536_s12 = smov 0   ;;  %s538_s13 = smov 0   ;;  %s588_s0 = inlined_call_operand.vmem [shape: bf16[2,18,4], index: 0, kind: input, shape index: {}]   ;;  %s589_s1 = inlined_call_operand.vmem [shape: bf16[3,4,64], index: 1, kind: input, shape index: {}]   ;;  %s590_s2 = inlined_call_operand.vmem [shape: f32[1,64], index: 2, kind: input, shape index: {}]   ;;  %s591_s3 = inlined_call_operand.vmem [shape: bf16[2,16,64], index: 3, kind: output, shape index: {}]  }
   0x1   :  { %s540_s14 = smov 0  }
   0x2 LB: > { %s25_s15 = sadd.s32 1, %s510_s13  ;;  %p447_p0 = scmp.ge.s32.totalorder %s514_s14, 1  ;;  %s514_s14 = sphi %s540_s14, %s13_s14   ;;  %s510_s13 = sphi %s538_s13, %s593_s13   ;;  %s506_s12 = sphi %s536_s12, %s592_s12  }
   0x3   : > { %p27_p1 = scmp.ge.s32.totalorder %s25_s15, 2  ;;  %p168_p2 = scmp.lt.s32.totalorder %s514_s14, 3 }
   0x5   : > { %s595_s15 = smov (%p27_p1, %s25_s15), 0  ;;  %p169_p3 = pnand %p447_p0, %p168_p2 }
   0x6   : > { %p202_p4 = scmp.lt.s32.totalorder (!%p169_p3), %s506_s12, 1 }
   0x7   : > { %172 = sbr.rel (%p169_p3) target bundleno = 173 (0xad), region = 32 }
   0xc   : > { %v225_v0 = vld [vmem:[%s589_s1] sm:$0x3]  ;;  %vm254_vm0 = vcmask 1041408   ;;  %v454_v2 = vld [vmem:[%s589_s1 + $0x4] sm:$0x3]  ;;  %s597_s12 = smov (!%p202_p4, %s506_s12), 1 }
   0xd   : > { %v275_v1 = vsel %vm254_vm0, %v225_v0, 0  ;;  %v451_v3 = vld [vmem:[%s589_s1 + $0x2] sm:$0x3]  ;;  %v305_v4 = vsel %vm254_vm0, %v454_v2, 0  ;;  %s466_s22 = smul.u32 12, %s597_s12  ;;  %vm250_vm1 = vcmask 31744  }
   0xe   : > { %284 = vmatpush.bf16.msra.mxu1 %v275_v1  ;;  %v256_v5 = vsel %vm254_vm0, %v451_v3, 0  ;;  %314 = vmatpush.bf16.msra.mxu2 %v305_v4  ;;  %vm297_vm2 = vcmask 1046528   ;;  %vm237_vm3 = vsmask.f32 7424  ;;  %v491_v26 = vld [vmem:[%s590_s2] ss:$0 sm:$0xff] }
   0xf   : > { %265 = vmatpush.bf16.msra.mxu0 %v256_v5  ;;  %s206_s25 = scalar_lea.vmem %s588_s0, %s466_s22  ;;  %s458_s28 = sshll.u32 %s597_s12, 3  ;;  %vm333_vm4 = vcmask 519168  }
  0x10   : > { %v460_v6 = vld [vmem:[%s206_s25] sm:$0xff]   ;;  %v226_v8 = vld [vmem:[%s206_s25 + $0x8] sm:$0x1]  ;;  %s221_s4 = scalar_lea.vmem %s591_s3, %s458_s28 }
  0x11   : > { %v463_v7 = vld [vmem:[%s206_s25] sm:$0xf0]  ;;  %v239_v9 = vshrl.u32 %v460_v6, 16  ;;  %v241_v10 = vshll.u32 %v460_v6, 16  ;;  %453 = vmatmul.msk.bf16.vlgmr.msra.gmra.mxu1 %vm250_vm1, %v460_v6  ;;  %v234_v11 = vunpack.c.l.b16 %v226_v8  ;;  %v464_v12 = vld [vmem:[%s206_s25] sm:$0xe] }
  0x12   : > { %v465_v13 = vor.u32 %v464_v12, %v463_v7 }
  0x13   : > { %v243_v14 = vrot.slane %v241_v10, 1  ;;  %v236_v15 = vpack.c.b16 %v234_v11, %v234_v11 }
  0x14   : > { %v298_v16 = vrot.slane %v465_v13, 1 }
  0x15   : > { %v244_v17 = vor.u32 %v243_v14, %v239_v9  ;;  %v299_v18 = vrot.slane %v236_v15, 1  ;;  %v246_v19 = vshll.u32 %v236_v15, 16 }
  0x17   : > { %v300_v20 = vsel %vm297_vm2, %v298_v16, %v299_v18  ;;  %v248_v21 = vrot.slane %v246_v19, 1 }
  0x18   : > { %455 = vmatmul.msk.bf16.vlgmr.msra.gmra.mxu2 %vm250_vm1, %v300_v20 }
  0x19   : > { %v249_v22 = vsel %vm237_vm3, %v244_v17, %v248_v21 }
  0x1a   : > { %452 = vmatmul.msk.bf16.vlgmr.msra.gmra.mxu0 %vm250_vm1, %v249_v22 }
  0x8e   : > { %v286_v23 = vpop.f32.mrf.mxu1 }
  0x96   : > { %v288_v32 = vpop.f32.mrf.mxu1 }
  0x97   : > { %v267_v24 = vpop.f32.mrf.mxu0 }
  0x98   : > { %v287_v25 = vadd.f32 %v286_v23, %v267_v24 }
  0x9b   : > { %v316_v27 = vpop.f32.mrf.mxu2 }
  0x9c   : > { %v321_v28 = vadd.f32 %v316_v27, %v287_v25 }
  0x9e   : > { %v327_v29 = vadd.f32 %v491_v26, %v321_v28 }
  0x9f   : > { %v269_v30 = vpop.f32.mrf.mxu0 }
  0xa0   : > { %v329_v31 = vmax.f32 %v327_v29, 0.0  ;;  %v289_v34 = vadd.f32 %v288_v32, %v269_v30 }
  0xa2   : > { %v331_v33 = vpack.c.bf16 %v329_v31, %v329_v31 }
  0xa3   : > { %v318_v35 = vpop.f32.mrf.mxu2 }
  0xa4   : > { %334 = vst.msk [vmem:[%s221_s4] sm:$0xf] %vm333_vm4, %v331_v33  ;;  %v322_v36 = vadd.f32 %v318_v35, %v289_v34 }
  0xa6   : > { %v328_v37 = vadd.f32 %v491_v26, %v322_v36 }
  0xa8   : > { %v330_v38 = vmax.f32 %v328_v37, 0.0 }
  0xaa   : > { %v332_v39 = vpack.c.bf16 %v330_v38, %v330_v38 }
  0xac   : > { %335 = vst.msk [vmem:[%s221_s4 + $0x4] sm:$0xf] %vm333_vm4, %v332_v39 }
  0xad PF: > { %s13_s14 = sadd.s32 1, %s514_s14   ;;  %s592_s12 = smov %s510_s13 }
  0xae   : > { %p10_p5 = scmp.ge.s32.totalorder %s13_s14, 4   ;;  %s593_s13 = smov %s595_s15 }
  0xb0   :  { %12 = sbr.rel (!%p10_p5) target bundleno = 2 (0x2), region = 70 }

// kernel: _lambda_.11
= control target key start
LH: loop header
LB: loop body
LE: loop exit
PB: predicated region body
PF: predicated region fallthrough
CT: control target
= control target key end

     0   :  { %8 = vsyncpa [#allocation3], 0  ;;  %s734_s12 = smov 0   ;;  %s736_s13 = smov 0   ;;  %s778_s0 = inlined_call_operand.vmem [shape: bf16[2,18,64], index: 0, kind: input, shape index: {}]   ;;  %s779_s1 = inlined_call_operand.hbm [shape: bf16[3,64,64], index: 1, kind: input, shape index: {}]   ;;  %s780_s2 = inlined_call_operand.vmem [shape: f32[1,64], index: 2, kind: input, shape index: {}]   ;;  %s781_s3 = inlined_call_operand.vmem [shape: bf16[2,16,64], index: 3, kind: output, shape index: {}]  }
   0x1   :  { %s738_s14 = smov 0  }
   0x2 LB: > { %s530_s15 = sadd.s32 4294967295, %s709_s14   ;;  %s26_s16 = sadd.s32 1, %s705_s13  ;;  %s709_s14 = sphi %s738_s14, %s14_s14   ;;  %s705_s13 = sphi %s736_s13, %s783_s13   ;;  %s701_s12 = sphi %s734_s12, %s782_s12  }
   0x3   : > { %p28_p0 = scmp.ge.s32.totalorder %s26_s16, 2  ;;  %p532_p1 = scmp.ge.s32.totalorder %s709_s14, 1 }
   0x4   : > { %p137_p2 = scmp.lt.s32.totalorder %s709_s14, 3  ;;  %p623_p4 = scmp.eq.s32.totalorder %s530_s15, 0 }
   0x5   : > { %s785_s16 = smov (%p28_p0, %s26_s16), 0  ;;  %s150_s19 = sshll.u32 %s779_s1, 4  ;;  %s151_s19 = int_to_ptr.hbm [resolvable:$true] %s150_s19 }
   0x6   : > { %p138_p3 = pnand %p532_p1, %p137_p2  ;;  %s711_s20 = smov [#allocation2]  }
   0x7   : > { %s152_s21 = sshll.u32 %s711_s20, 4  ;;  %s712_s22 = smov 64   ;;  %s153_s21 = int_to_ptr.vmem [resolvable:$true] %s152_s21 }
   0x8   : > { %p619_p5 = pneg %p138_p3  ;;  %s713_s23 = smov 4  }
   0x9   : > { %182 = sbr.rel (%p138_p3) target bundleno = 182 (0xb6), region = 32 }
   0xa   : > { %p620_p6 = pnand %p623_p4, %p619_p5 }
   0xc   : > { %622 = dma.hbm_to_vmem [thread:$0]  (!%p620_p6), %s151_s19, 1536, %s153_s21, [#allocation3], %s712_s22, %s712_s22, %s713_s23  }
   0xe   : > { %696 = dma.done.wait (%p623_p4), [#allocation3], 1536  }
   0xf   : > { %698 = vsyncadd (%p623_p4), [#allocation3], 4294965760  ;;  %p213_p7 = scmp.lt.s32.totalorder %s701_s12, 1  ;;  %v602_v0 = vld [vmem:[#allocation2 + $0x38] sm:$0xff]  ;;  %v601_v3 = vld [vmem:[#allocation2 + $0x30] sm:$0xff]  ;;  %vm366_vm1 = vcmask 1046528  }
  0x10   : > { %v598_v1 = vld [vmem:[#allocation2 + $0x18] sm:$0xff]  ;;  %303 = vmatpush.bf16.msra.mxu0 %v602_v0  ;;  %v597_v4 = vld [vmem:[#allocation2 + $0x10] sm:$0xff]  ;;  %v600_v12 = vld [vmem:[#allocation2 + $0x28] sm:$0xff]  ;;  %vm258_vm0 = vsmask.f32 7424  ;;  %vm295_vm2 = vcmask 523264  }
  0x11   : > { %s787_s12 = smov (!%p213_p7, %s701_s12), 1  ;;  %v606_v2 = vld [vmem:[#allocation2 + $0x58] sm:$0xff]  ;;  %343 = vmatpush.bf16.msra.mxu1 %v598_v1  ;;  %v605_v5 = vld [vmem:[#allocation2 + $0x50] sm:$0xff]  ;;  %v596_v13 = vld [vmem:[#allocation2 + $0x8] sm:$0xff]  ;;  %vm423_vm3 = vcmask 519168  }
  0x12   : > { %s614_s24 = smul.u32 12, %s787_s12  ;;  %401 = vmatpush.bf16.msra.mxu2 %v606_v2  ;;  %v604_v15 = vld [vmem:[#allocation2 + $0x48] sm:$0xff]  ;;  %v599_v20 = vld [vmem:[#allocation2 + $0x20] sm:$0xff]  ;;  %s594_s30 = sshll.u32 %s787_s12, 3 }
  0x13   : > { %v595_v21 = vld [vmem:[#allocation2] sm:$0xff]  ;;  %s228_s6 = scalar_lea.vmem %s781_s3, %s594_s30 }
  0x14   : > { %s217_s27 = scalar_lea.vmem %s778_s0, %s614_s24  ;;  %304 = vmatpush.bf16.msra.mxu0 %v601_v3  ;;  %v603_v23 = vld [vmem:[#allocation2 + $0x40] sm:$0xff] }
  0x15   : > { %v608_v6 = vld [vmem:[%s217_s27] sm:$0xff]   ;;  %v240_v7 = vld [vmem:[%s217_s27 + $0x8] sm:$0x1]  ;;  %344 = vmatpush.bf16.msra.mxu1 %v597_v4 }
  0x16   : > { %v611_v8 = vld [vmem:[%s217_s27] sm:$0xf0]  ;;  %v255_v9 = vunpack.c.l.b16 %v240_v7  ;;  %v262_v10 = vshll.u32 %v608_v6, 16  ;;  %v612_v11 = vld [vmem:[%s217_s27] sm:$0xe]  ;;  %v260_v14 = vshrl.u32 %v608_v6, 16  ;;  %402 = vmatpush.bf16.msra.mxu2 %v605_v5 }
  0x17   : > { %v613_v18 = vor.u32 %v612_v11, %v611_v8  ;;  %v652_v32 = vld [vmem:[%s780_s2] ss:$0 sm:$0xff] }
  0x18   : > { %v257_v16 = vpack.c.b16 %v255_v9, %v255_v9  ;;  %v264_v17 = vrot.slane %v262_v10, 1  ;;  %305 = vmatpush.bf16.msra.mxu0 %v600_v12 }
  0x19   : > { %345 = vmatpush.bf16.msra.mxu1 %v596_v13  ;;  %v367_v25 = vrot.slane %v613_v18, 1 }
  0x1a   : > { %v267_v19 = vshll.u32 %v257_v16, 16  ;;  %v265_v22 = vor.u32 %v264_v17, %v260_v14  ;;  %403 = vmatpush.bf16.msra.mxu2 %v604_v15  ;;  %v368_v26 = vrot.slane %v257_v16, 1 }
  0x1c   : > { %v269_v24 = vrot.slane %v267_v19, 1  ;;  %306 = vmatpush.bf16.msra.mxu0 %v599_v20  ;;  %v369_v28 = vsel %vm366_vm1, %v367_v25, %v368_v26 }
  0x1d   : > { %346 = vmatpush.bf16.msra.mxu1 %v595_v21 }
  0x1e   : > { %v270_v27 = vsel %vm258_vm0, %v265_v22, %v269_v24  ;;  %404 = vmatpush.bf16.msra.mxu2 %v603_v23 }
  0x1f   : > { %557 = vmatmul.msk.bf16.vlgmr.msra.gmra.mxu0 %vm295_vm2, %v270_v27 }
  0x20   : > { %574 = vmatmul.msk.bf16.vlgmr.msra.gmra.mxu1 %vm295_vm2, %v608_v6 }
  0x21   : > { %591 = vmatmul.msk.bf16.vlgmr.msra.gmra.mxu2 %vm295_vm2, %v369_v28 }
  0x9c   : > { %v308_v29 = vpop.f32.mrf.mxu0 }
  0x9d   : > { %v348_v30 = vpop.f32.mrf.mxu1 }
  0x9e   : > { %v349_v31 = vadd.f32 %v348_v30, %v308_v29 }
  0xa4   : > { %v406_v33 = vpop.f32.mrf.mxu2  ;;  %v310_v36 = vpop.f32.mrf.mxu0 }
  0xa5   : > { %v411_v34 = vadd.f32 %v406_v33, %v349_v31  ;;  %v350_v37 = vpop.f32.mrf.mxu1 }
  0xa6   : > { %v351_v40 = vadd.f32 %v350_v37, %v310_v36 }
  0xa7   : > { %v417_v35 = vadd.f32 %v652_v32, %v411_v34 }
  0xa9   : > { %v419_v38 = vmax.f32 %v417_v35, 0.0 }
  0xab   : > { %v421_v39 = vpack.c.bf16 %v419_v38, %v419_v38 }
  0xac   : > { %v408_v41 = vpop.f32.mrf.mxu2 }
  0xad   : > { %424 = vst.msk [vmem:[%s228_s6] sm:$0xf] %vm423_vm3, %v421_v39  ;;  %v412_v42 = vadd.f32 %v408_v41, %v351_v40 }
  0xaf   : > { %v418_v43 = vadd.f32 %v652_v32, %v412_v42 }
  0xb1   : > { %v420_v44 = vmax.f32 %v418_v43, 0.0 }
  0xb3   : > { %v422_v45 = vpack.c.bf16 %v420_v44, %v420_v44 }
  0xb5   : > { %425 = vst.msk [vmem:[%s228_s6 + $0x4] sm:$0xf] %vm423_vm3, %v422_v45 }
  0xb6 PF: > { %s14_s14 = sadd.s32 1, %s709_s14   ;;  %s782_s12 = smov %s705_s13 }
  0xb7   : > { %p11_p8 = scmp.ge.s32.totalorder %s14_s14, 4   ;;  %s783_s13 = smov %s785_s16 }
  0xb9   :  { %13 = sbr.rel (!%p11_p8) target bundleno = 2 (0x2), region = 73 }
  0xbe   :  { %453 = vsyncpa [#allocation3], 1 }
  0xbf   :  { %455 = vsyncpa [#allocation3 + $0x1], 1 }

// kernel: _lambda_.12
= control target key start
LH: loop header
LB: loop body
LE: loop exit
PB: predicated region body
PF: predicated region fallthrough
CT: control target
= control target key end

     0   :  { %9 = vsyncpa [#allocation3], 0  ;;  %s828_s15 = smov 0   ;;  %s830_s16 = smov 0   ;;  %s875_s0 = inlined_call_operand.vmem [shape: bf16[2,18,64], index: 0, kind: input, shape index: {}]   ;;  %s876_s1 = inlined_call_operand.hbm [shape: bf16[3,64,64], index: 1, kind: input, shape index: {}]   ;;  %s877_s2 = inlined_call_operand.vmem [shape: f32[1,64], index: 2, kind: input, shape index: {}]   ;;  %s878_s3 = inlined_call_operand.vmem [shape: bf16[2,16,64], index: 3, kind: input, shape index: {}]   ;;  %s879_s4 = inlined_call_operand.vmem [shape: bf16[2,16,64], index: 4, kind: output, shape index: {}]  }
   0x1   :  { %s832_s17 = smov 0  }
   0x2 LB: > { %s612_s18 = sadd.s32 4294967295, %s798_s17   ;;  %s27_s19 = sadd.s32 1, %s794_s16  ;;  %s798_s17 = sphi %s832_s17, %s15_s17   ;;  %s794_s16 = sphi %s830_s16, %s881_s16   ;;  %s790_s15 = sphi %s828_s15, %s880_s15  }
   0x3   : > { %p29_p0 = scmp.ge.s32.totalorder %s27_s19, 2  ;;  %p614_p1 = scmp.ge.s32.totalorder %s798_s17, 1 }
   0x4   : > { %p166_p2 = scmp.lt.s32.totalorder %s798_s17, 3  ;;  %p712_p4 = scmp.eq.s32.totalorder %s612_s18, 0 }
   0x5   : > { %s883_s19 = smov (%p29_p0, %s27_s19), 0  ;;  %s179_s22 = sshll.u32 %s876_s1, 4  ;;  %s180_s22 = int_to_ptr.hbm [resolvable:$true] %s179_s22 }
   0x6   : > { %p167_p3 = pnand %p614_p1, %p166_p2  ;;  %s800_s23 = smov [#allocation2]  }
   0x7   : > { %s181_s24 = sshll.u32 %s800_s23, 4  ;;  %s801_s25 = smov 64   ;;  %s182_s24 = int_to_ptr.vmem [resolvable:$true] %s181_s24 }
   0x8   : > { %p708_p5 = pneg %p167_p3  ;;  %s802_s26 = smov 4  }
   0x9   : > { %222 = sbr.rel (%p167_p3) target bundleno = 184 (0xb8), region = 36 }
   0xa   : > { %p709_p6 = pnand %p712_p4, %p708_p5 }
   0xc   : > { %711 = dma.hbm_to_vmem [thread:$0]  (!%p709_p6), %s180_s22, 1536, %s182_s24, [#allocation3], %s801_s25, %s801_s25, %s802_s26  }
   0xe   : > { %785 = dma.done.wait (%p712_p4), [#allocation3], 1536  }
   0xf   : > { %787 = vsyncadd (%p712_p4), [#allocation3], 4294965760  ;;  %p263_p7 = scmp.lt.s32.totalorder %s790_s15, 1  ;;  %v687_v0 = vld [vmem:[#allocation2 + $0x38] sm:$0xff]  ;;  %v686_v3 = vld [vmem:[#allocation2 + $0x30] sm:$0xff]  ;;  %vm424_vm1 = vcmask 1046528  }
  0x10   : > { %v683_v1 = vld [vmem:[#allocation2 + $0x18] sm:$0xff]  ;;  %361 = vmatpush.bf16.msra.mxu0 %v687_v0  ;;  %v682_v4 = vld [vmem:[#allocation2 + $0x10] sm:$0xff]  ;;  %v685_v12 = vld [vmem:[#allocation2 + $0x28] sm:$0xff]  ;;  %vm316_vm0 = vsmask.f32 7424  ;;  %vm353_vm2 = vcmask 523264  }
  0x11   : > { %s885_s15 = smov (!%p263_p7, %s790_s15), 1  ;;  %v691_v2 = vld [vmem:[#allocation2 + $0x58] sm:$0xff]  ;;  %401 = vmatpush.bf16.msra.mxu1 %v683_v1  ;;  %v690_v5 = vld [vmem:[#allocation2 + $0x50] sm:$0xff]  ;;  %v681_v13 = vld [vmem:[#allocation2 + $0x8] sm:$0xff]  ;;  %vm487_vm3 = vcmask 519168  }
  0x12   : > { %s703_s27 = smul.u32 12, %s885_s15  ;;  %459 = vmatpush.bf16.msra.mxu2 %v691_v2  ;;  %v689_v15 = vld [vmem:[#allocation2 + $0x48] sm:$0xff]  ;;  %v684_v20 = vld [vmem:[#allocation2 + $0x20] sm:$0xff]  ;;  %s678_s5 = sshll.u32 %s885_s15, 3 }
  0x13   : > { %v680_v21 = vld [vmem:[#allocation2] sm:$0xff]  ;;  %s278_s8 = scalar_lea.vmem %s878_s3, %s678_s5  ;;  %s286_s13 = scalar_lea.vmem %s879_s4, %s678_s5 }
  0x14   : > { %s267_s30 = scalar_lea.vmem %s875_s0, %s703_s27  ;;  %362 = vmatpush.bf16.msra.mxu0 %v686_v3  ;;  %v688_v23 = vld [vmem:[#allocation2 + $0x40] sm:$0xff] }
  0x15   : > { %v693_v6 = vld [vmem:[%s267_s30] sm:$0xff]   ;;  %v298_v7 = vld [vmem:[%s267_s30 + $0x8] sm:$0x1]  ;;  %402 = vmatpush.bf16.msra.mxu1 %v682_v4 }
  0x16   : > { %v700_v8 = vld [vmem:[%s267_s30] sm:$0xf0]  ;;  %v313_v9 = vunpack.c.l.b16 %v298_v7  ;;  %v320_v10 = vshll.u32 %v693_v6, 16  ;;  %v701_v11 = vld [vmem:[%s267_s30] sm:$0xe]  ;;  %v318_v14 = vshrl.u32 %v693_v6, 16  ;;  %460 = vmatpush.bf16.msra.mxu2 %v690_v5 }
  0x17   : > { %v702_v18 = vor.u32 %v701_v11, %v700_v8  ;;  %v697_v32 = vld [vmem:[%s278_s8] sm:$0xff]  }
  0x18   : > { %v315_v16 = vpack.c.b16 %v313_v9, %v313_v9  ;;  %v322_v17 = vrot.slane %v320_v10, 1  ;;  %363 = vmatpush.bf16.msra.mxu0 %v685_v12  ;;  %v741_v33 = vld [vmem:[%s877_s2] ss:$0 sm:$0xff]  ;;  %v698_v36 = vunpack.c.l.bf16 %v697_v32  ;;  %v699_v46 = vunpack.c.h.bf16 %v697_v32 }
  0x19   : > { %403 = vmatpush.bf16.msra.mxu1 %v681_v13  ;;  %v425_v25 = vrot.slane %v702_v18, 1 }
  0x1a   : > { %v325_v19 = vshll.u32 %v315_v16, 16  ;;  %v323_v22 = vor.u32 %v322_v17, %v318_v14  ;;  %461 = vmatpush.bf16.msra.mxu2 %v689_v15  ;;  %v426_v26 = vrot.slane %v315_v16, 1 }
  0x1c   : > { %v327_v24 = vrot.slane %v325_v19, 1  ;;  %364 = vmatpush.bf16.msra.mxu0 %v684_v20  ;;  %v427_v28 = vsel %vm424_vm1, %v425_v25, %v426_v26 }
  0x1d   : > { %404 = vmatpush.bf16.msra.mxu1 %v680_v21 }
  0x1e   : > { %v328_v27 = vsel %vm316_vm0, %v323_v22, %v327_v24  ;;  %462 = vmatpush.bf16.msra.mxu2 %v688_v23 }
  0x1f   : > { %641 = vmatmul.msk.bf16.vlgmr.msra.gmra.mxu0 %vm353_vm2, %v328_v27 }
  0x20   : > { %658 = vmatmul.msk.bf16.vlgmr.msra.gmra.mxu1 %vm353_vm2, %v693_v6 }
  0x21   : > { %675 = vmatmul.msk.bf16.vlgmr.msra.gmra.mxu2 %vm353_vm2, %v427_v28 }
  0x9c   : > { %v366_v29 = vpop.f32.mrf.mxu0 }
  0x9d   : > { %v406_v30 = vpop.f32.mrf.mxu1 }
  0x9e   : > { %v407_v31 = vadd.f32 %v406_v30, %v366_v29 }
  0xa4   : > { %v464_v34 = vpop.f32.mrf.mxu2  ;;  %v368_v38 = vpop.f32.mrf.mxu0 }
  0xa5   : > { %v469_v35 = vadd.f32 %v464_v34, %v407_v31  ;;  %v408_v39 = vpop.f32.mrf.mxu1 }
  0xa6   : > { %v409_v42 = vadd.f32 %v408_v39, %v368_v38 }
  0xa7   : > { %v475_v37 = vadd.f32 %v741_v33, %v469_v35 }
  0xa9   : > { %v481_v40 = vadd.f32 %v698_v36, %v475_v37 }
  0xab   : > { %v483_v41 = vmax.f32 %v481_v40, 0.0 }
  0xac   : > { %v466_v43 = vpop.f32.mrf.mxu2 }
  0xad   : > { %v485_v44 = vpack.c.bf16 %v483_v41, %v483_v41  ;;  %v470_v45 = vadd.f32 %v466_v43, %v409_v42 }
  0xaf   : > { %488 = vst.msk [vmem:[%s286_s13] sm:$0xf] %vm487_vm3, %v485_v44  ;;  %v476_v47 = vadd.f32 %v741_v33, %v470_v45 }
  0xb1   : > { %v482_v48 = vadd.f32 %v699_v46, %v476_v47 }
  0xb3   : > { %v484_v49 = vmax.f32 %v482_v48, 0.0 }
  0xb5   : > { %v486_v50 = vpack.c.bf16 %v484_v49, %v484_v49 }
  0xb7   : > { %489 = vst.msk [vmem:[%s286_s13 + $0x4] sm:$0xf] %vm487_vm3, %v486_v50 }
  0xb8 PF: > { %s15_s17 = sadd.s32 1, %s798_s17   ;;  %s880_s15 = smov %s794_s16 }
  0xb9   : > { %p12_p8 = scmp.ge.s32.totalorder %s15_s17, 4   ;;  %s881_s16 = smov %s883_s19 }
  0xbb   :  { %14 = sbr.rel (!%p12_p8) target bundleno = 2 (0x2), region = 80 }
  0xc0   :  { %517 = vsyncpa [#allocation3], 1 }
  0xc1   :  { %519 = vsyncpa [#allocation3 + $0x1], 1 }

// kernel: _lambda_.13
= control target key start
LH: loop header
LB: loop body
LE: loop exit
PB: predicated region body
PF: predicated region fallthrough
CT: control target
= control target key end

     0   :  { %12 = vsyncpa [#allocation3], 0  ;;  %s1133_s0 = inlined_call_operand.vmem [shape: bf16[2,9,128], index: 0, kind: input, shape index: {}]   ;;  %s1134_s1 = inlined_call_operand.hbm [shape: bf16[3,64,128], index: 1, kind: input, shape index: {}]   ;;  %s1135_s2 = inlined_call_operand.vmem [shape: f32[1,128], index: 2, kind: input, shape index: {}]   ;;  %s1136_s3 = inlined_call_operand.hbm [shape: bf16[64,128], index: 3, kind: input, shape index: {}]   ;;  %s1137_s4 = inlined_call_operand.vmem [shape: f32[1,128], index: 4, kind: input, shape index: {}]   ;;  %s1138_s5 = inlined_call_operand.vmem [shape: bf16[2,8,128], index: 5, kind: output, shape index: {0}]   ;;  %s1139_s6 = inlined_call_operand.vmem [shape: bf16[2,8,128], index: 6, kind: output, shape index: {1}]  }
   0x1   :  { %13 = vsyncpa [#allocation5], 0  ;;  %s1054_s21 = smov 0   ;;  %s1056_s22 = smov 0  }
   0x2   :  { %s1058_s23 = smov 0  }
   0x3 LB: > { %s765_s24 = sadd.s32 4294967295, %s1012_s23   ;;  %s31_s25 = sadd.s32 1, %s1008_s22  ;;  %s1012_s23 = sphi %s1058_s23, %s19_s23   ;;  %s1008_s22 = sphi %s1056_s22, %s1143_s22   ;;  %s1004_s21 = sphi %s1054_s21, %s1142_s21  }
   0x4   : > { %p33_p0 = scmp.ge.s32.totalorder %s31_s25, 2  ;;  %p767_p1 = scmp.ge.s32.totalorder %s1012_s23, 1 }
   0x5   : > { %p222_p2 = scmp.lt.s32.totalorder %s1012_s23, 3  ;;  %p1079_p4 = scmp.eq.s32.totalorder %s765_s24, 0 }
   0x6   : > { %s1145_s25 = smov (%p33_p0, %s31_s25), 0  ;;  %s235_s30 = sshll.u32 %s1134_s1, 4  ;;  %s236_s30 = int_to_ptr.hbm [resolvable:$true] %s235_s30 }
   0x7   : > { %p1075_p3 = pnand %p767_p1, %p222_p2  ;;  %s1014_s7 = smov [#allocation2]  }
   0x8   : > { %s237_s8 = sshll.u32 %s1014_s7, 4  ;;  %s257_s11 = sshll.u32 %s1136_s3, 4  ;;  %s238_s8 = int_to_ptr.vmem [resolvable:$true] %s237_s8  ;;  %s258_s11 = int_to_ptr.hbm [resolvable:$true] %s257_s11 }
   0x9   : > { %p880_p5 = pneg %p1075_p3  ;;  %s1015_s12 = smov 64  }
   0xa   : > { %s1016_s13 = smov 4   ;;  %s1017_s14 = smov [#allocation4]  }
   0xb   : > { %p881_p6 = pnand %p1079_p4, %p880_p5  ;;  %s259_s15 = sshll.u32 %s1017_s14, 4  ;;  %s260_s15 = int_to_ptr.vmem [resolvable:$true] %s259_s15 }
   0xc   : > { %289 = sbr.rel (%p1075_p3) target bundleno = 290 (0x122), region = 40 }
   0xd   : > { %883 = dma.hbm_to_vmem [thread:$0]  (!%p881_p6), %s236_s30, 1536, %s238_s8, [#allocation3], %s1015_s12, %s1015_s12, %s1016_s13  }
   0xe   : > { %886 = dma.hbm_to_vmem [thread:$0]  (!%p881_p6), %s258_s11, 512, %s260_s15, [#allocation5], %s1015_s12, %s1015_s12, %s1016_s13  }
  0x11   : > { %995 = dma.done.wait (%p1079_p4), [#allocation3], 1536  }
  0x12   : > { %997 = vsyncadd (%p1079_p4), [#allocation3], 4294965760 }
  0x13   : > { %999 = dma.done.wait (%p1079_p4), [#allocation5], 512  }
  0x14   : > { %1001 = vsyncadd (%p1079_p4), [#allocation5], 4294966784  ;;  %p340_p7 = scmp.lt.s32.totalorder %s1004_s21, 1  ;;  %v867_v1 = vld [vmem:[#allocation2 + $0x58] sm:$0xff]  ;;  %v866_v6 = vld [vmem:[#allocation2 + $0x50] sm:$0xff]  ;;  %s1018_s20 = smov 64  }
  0x15   : > { %v858_v3 = vld [vmem:[#allocation2 + $0x18] sm:$0xff]  ;;  %524 = vmatpush.bf16.msra.mxu2 %v867_v1  ;;  %v857_v8 = vld [vmem:[#allocation2 + $0x10] sm:$0xff]  ;;  %v865_v16 = vld [vmem:[#allocation2 + $0x48] sm:$0xff]  ;;  %vm413_vm0 = vcmask 523264  }
  0x16   : > { %s1147_s21 = smov (!%p340_p7, %s1004_s21), 1  ;;  %v871_v4 = vld [vmem:[#allocation4 + $0x18] sm:$0xff]  ;;  %461 = vmatpush.bf16.msra.mxu1 %v858_v3  ;;  %v870_v9 = vld [vmem:[#allocation4 + $0x10] sm:$0xff]  ;;  %v856_v17 = vld [vmem:[#allocation2 + $0x8] sm:$0xff] }
  0x17   : > { %s854_s16 = sshll.u32 %s1147_s21, 3  ;;  %591 = vmatpush.bf16.msra.mxu3 %v871_v4  ;;  %v862_v10 = vld [vmem:[#allocation2 + $0x38] sm:$0xff]  ;;  %v861_v15 = vld [vmem:[#allocation2 + $0x30] sm:$0xff]  ;;  %v869_v18 = vld [vmem:[#allocation4 + $0x8] sm:$0xff]  ;;  %s778_s27 = sshll.u32 %s1147_s21, 2 }
  0x18   : > { %s344_s19 = scalar_lea.vmem %s1133_s0, %s854_s16  ;;  %421 = vmatpush.bf16.msra.mxu0 %v862_v10  ;;  %v864_v23 = vld [vmem:[#allocation2 + $0x40] sm:$0xff]  ;;  %v860_v27 = vld [vmem:[#allocation2 + $0x28] sm:$0xff]  ;;  %s364_s30 = scalar_lea.vmem %s1139_s6, %s778_s27 }
  0x19   : > { %v542_v0 = vld [vmem:[%s344_s19] sm:$0xf]  ;;  %v863_v12 = vld [vmem:[%s344_s19] sm:$0x10]  ;;  %525 = vmatpush.bf16.msra.mxu2 %v866_v6  ;;  %s357_s10 = scalar_lea.vmem %s1138_s5, %s778_s27 }
  0x1a   : > { %v556_v2 = vunpack.c.l.b16 %v542_v0  ;;  %v366_v5 = vld [vmem:[%s344_s19] sm:$0xf]  ;;  %462 = vmatpush.bf16.msra.mxu1 %v857_v8 }
  0x1b   : > { %v816_v11 = vld [vmem:[%s344_s19] sm:$0xf]  ;;  %v385_v13 = vunpack.c.l.b16 %v366_v5  ;;  %592 = vmatpush.bf16.msra.mxu3 %v870_v9 }
  0x1c   : > { %v557_v7 = vpack.c.b16 %v556_v2, %v556_v2  ;;  %v817_v14 = vor.u32 %v863_v12, %v816_v11  ;;  %422 = vmatpush.bf16.msra.mxu0 %v861_v15  ;;  %v855_v24 = vld [vmem:[#allocation2] sm:$0xff] }
  0x1d   : > { %v386_v20 = vpack.c.b16 %v385_v13, %v385_v13  ;;  %526 = vmatpush.bf16.msra.mxu2 %v865_v16  ;;  %v868_v25 = vld [vmem:[#allocation4] sm:$0xff] }
  0x1e   : > { %558 = vrot.lane.b32.xlu0 %v557_v7, %s1018_s20  ;;  %v489_v19 = vshll.u32 %v817_v14, 16  ;;  %v487_v21 = vshrl.u32 %v817_v14, 16  ;;  %463 = vmatpush.bf16.msra.mxu1 %v856_v17  ;;  %v859_v28 = vld [vmem:[#allocation2 + $0x20] sm:$0xff] }
  0x1f   : > { %593 = vmatpush.bf16.msra.mxu3 %v869_v18  ;;  %v920_v35 = vld [vmem:[%s1137_s4] ss:$0 sm:$0xff] }
  0x20   : > { %v491_v22 = vrot.slane %v489_v19, 1  ;;  %423 = vmatpush.bf16.msra.mxu0 %v860_v27  ;;  %v921_v41 = vld [vmem:[%s1135_s2] ss:$0 sm:$0xff] }
  0x21   : > { %527 = vmatpush.bf16.msra.mxu2 %v864_v23 }
  0x22   : > { %v492_v26 = vor.u32 %v491_v22, %v487_v21  ;;  %464 = vmatpush.bf16.msra.mxu1 %v855_v24 }
  0x23   : > { %594 = vmatpush.bf16.msra.mxu3 %v868_v25 }
  0x24   : > { %834 = vmatmul.msk.bf16.vlgmr.msra.gmra.mxu2 %vm413_vm0, %v492_v26  ;;  %424 = vmatpush.bf16.msra.mxu0 %v859_v28 }
  0x25   : > { %813 = vmatmul.msk.bf16.vlgmr.msra.gmra.mxu1 %vm413_vm0, %v366_v5 }
  0x26   : > { %387 = vrot.lane.b32.xlu0 %v386_v20, %s1018_s20 }
  0x90   : > { %v559_v29 = vpop.permute.xlu0 %558 }
  0x91   : > { %851 = vmatmul.msk.bf16.vlgmr.msra.gmra.mxu3 %vm413_vm0, %v559_v29 }
  0x98   : > { %v388_v30 = vpop.permute.xlu0 %387 }
  0x99   : > { %796 = vmatmul.msk.bf16.vlgmr.msra.gmra.mxu0 %vm413_vm0, %v388_v30 }
  0xa2   : > { %v466_v31 = vpop.f32.mrf.mxu1 }
  0xa7   : > { %v529_v32 = vpop.f32.mrf.mxu2 }
  0xaa   : > { %v468_v33 = vpop.f32.mrf.mxu1 }
  0xaf   : > { %v531_v34 = vpop.f32.mrf.mxu2 }
 0x114   : > { %v596_v36 = vpop.f32.mrf.mxu3 }
 0x115   : > { %v597_v37 = vadd.f32 %v920_v35, %v596_v36 }
 0x116   : > { %v426_v38 = vpop.f32.mrf.mxu0 }
 0x117   : > { %v600_v39 = vpack.c.bf16 %v597_v37, %v597_v37  ;;  %v467_v40 = vadd.f32 %v466_v31, %v426_v38 }
 0x119   : > { %601 = vst [vmem:[%s364_s30] sm:$0xf] %v600_v39  ;;  %v533_v42 = vadd.f32 %v529_v32, %v467_v40 }
 0x11b   : > { %v538_v43 = vadd.f32 %v921_v41, %v533_v42 }
 0x11c   : > { %v598_v44 = vpop.f32.mrf.mxu3 }
 0x11d   : > { %v539_v45 = vmax.f32 %v538_v43, 0.0 }
 0x11e   : > { %v428_v46 = vpop.f32.mrf.mxu0 }
 0x11f   : > { %v540_v47 = vpack.c.bf16 %v539_v45, %v539_v45 }
 0x121   : > { %541 = vst [vmem:[%s357_s10] sm:$0xf] %v540_v47 }
 0x122 PF: > { %s19_s23 = sadd.s32 1, %s1012_s23   ;;  %s1142_s21 = smov %s1008_s22 }
 0x123   : > { %p16_p8 = scmp.ge.s32.totalorder %s19_s23, 4   ;;  %s1143_s22 = smov %s1145_s25 }
 0x125   :  { %18 = sbr.rel (!%p16_p8) target bundleno = 3 (0x3), region = 101 }
 0x12a   :  { %647 = vsyncpa [#allocation3], 1 }
 0x12b   :  { %649 = vsyncpa [#allocation3 + $0x1], 1 }
 0x12c   :  { %650 = vsyncpa [#allocation5], 1 }

// kernel: _lambda_.14
= control target key start
LH: loop header
LB: loop body
LE: loop exit
PB: predicated region body
PF: predicated region fallthrough
CT: control target
= control target key end

     0   :  { %9 = vsyncpa [#allocation3], 0  ;;  %s920_s15 = smov 0   ;;  %s922_s16 = smov 0   ;;  %s967_s0 = inlined_call_operand.vmem [shape: bf16[2,10,128], index: 0, kind: input, shape index: {}]   ;;  %s968_s1 = inlined_call_operand.hbm [shape: bf16[3,128,128], index: 1, kind: input, shape index: {}]   ;;  %s969_s2 = inlined_call_operand.vmem [shape: f32[1,128], index: 2, kind: input, shape index: {}]   ;;  %s970_s3 = inlined_call_operand.vmem [shape: bf16[2,8,128], index: 3, kind: input, shape index: {}]   ;;  %s971_s4 = inlined_call_operand.vmem [shape: bf16[2,8,128], index: 4, kind: output, shape index: {}]  }
   0x1   :  { %s924_s17 = smov 0  }
   0x2 LB: > { %s661_s18 = sadd.s32 4294967295, %s890_s17   ;;  %s27_s19 = sadd.s32 1, %s886_s16  ;;  %s890_s17 = sphi %s924_s17, %s15_s17   ;;  %s886_s16 = sphi %s922_s16, %s973_s16   ;;  %s882_s15 = sphi %s920_s15, %s972_s15  }
   0x3   : > { %p29_p0 = scmp.ge.s32.totalorder %s27_s19, 2  ;;  %p663_p1 = scmp.ge.s32.totalorder %s890_s17, 1 }
   0x4   : > { %p166_p2 = scmp.lt.s32.totalorder %s890_s17, 3  ;;  %p804_p4 = scmp.eq.s32.totalorder %s661_s18, 0 }
   0x5   : > { %s975_s19 = smov (%p29_p0, %s27_s19), 0  ;;  %s179_s22 = sshll.u32 %s968_s1, 4  ;;  %s180_s22 = int_to_ptr.hbm [resolvable:$true] %s179_s22 }
   0x6   : > { %p167_p3 = pnand %p663_p1, %p166_p2  ;;  %s892_s23 = smov [#allocation2]  }
   0x7   : > { %s181_s24 = sshll.u32 %s892_s23, 4  ;;  %s893_s25 = smov 64   ;;  %s182_s24 = int_to_ptr.vmem [resolvable:$true] %s181_s24 }
   0x8   : > { %p800_p5 = pneg %p167_p3  ;;  %s894_s26 = smov 4  }
   0x9   : > { %221 = sbr.rel (%p167_p3) target bundleno = 192 (0xc0), region = 36 }
   0xa   : > { %p801_p6 = pnand %p804_p4, %p800_p5 }
   0xc   : > { %803 = dma.hbm_to_vmem [thread:$0]  (!%p801_p6), %s180_s22, 3072, %s182_s24, [#allocation3], %s893_s25, %s893_s25, %s894_s26  }
   0xe   : > { %877 = dma.done.wait (%p804_p4), [#allocation3], 3072  }
   0xf   : > { %879 = vsyncadd (%p804_p4), [#allocation3], 4294964224  ;;  %p260_p7 = scmp.lt.s32.totalorder %s882_s15, 1  ;;  %v787_v0 = vld [vmem:[#allocation2 + $0x78] sm:$0xff]  ;;  %v786_v3 = vld [vmem:[#allocation2 + $0x70] sm:$0xff] }
  0x10   : > { %v779_v1 = vld [vmem:[#allocation2 + $0x38] sm:$0xff]  ;;  %378 = vmatpush.bf16.msra.mxu0 %v787_v0  ;;  %v778_v4 = vld [vmem:[#allocation2 + $0x30] sm:$0xff]  ;;  %v785_v6 = vld [vmem:[#allocation2 + $0x68] sm:$0xff] }
  0x11   : > { %v795_v2 = vld [vmem:[#allocation2 + $0xb8] sm:$0xff]  ;;  %s977_s15 = smov (!%p260_p7, %s882_s15), 1  ;;  %439 = vmatpush.bf16.msra.mxu1 %v779_v1  ;;  %v794_v5 = vld [vmem:[#allocation2 + $0xb0] sm:$0xff]  ;;  %v777_v7 = vld [vmem:[#allocation2 + $0x28] sm:$0xff] }
  0x12   : > { %523 = vmatpush.bf16.msra.mxu2 %v795_v2  ;;  %s771_s27 = sshll.u32 %s977_s15, 3  ;;  %v793_v8 = vld [vmem:[#allocation2 + $0xa8] sm:$0xff]  ;;  %v784_v9 = vld [vmem:[#allocation2 + $0x60] sm:$0xff]  ;;  %v783_v16 = vld [vmem:[#allocation2 + $0x58] sm:$0xff]  ;;  %s671_s5 = sshll.u32 %s977_s15, 2 }
  0x13   : > { %s264_s30 = scalar_lea.vmem %s967_s0, %s771_s27  ;;  %v776_v10 = vld [vmem:[#allocation2 + $0x20] sm:$0xff]  ;;  %v775_v17 = vld [vmem:[#allocation2 + $0x18] sm:$0xff]  ;;  %v782_v20 = vld [vmem:[#allocation2 + $0x50] sm:$0xff]  ;;  %s274_s8 = scalar_lea.vmem %s970_s3, %s671_s5 }
  0x14   : > { %379 = vmatpush.bf16.msra.mxu0 %v786_v3  ;;  %v282_v11 = vld [vmem:[%s264_s30] sm:$0xf]  ;;  %v299_v12 = vld [vmem:[%s264_s30 + $0x4] sm:$0x1]  ;;  %v791_v18 = vld [vmem:[#allocation2 + $0x98] sm:$0xff]  ;;  %s281_s13 = scalar_lea.vmem %s971_s4, %s671_s5 }
  0x15   : > { %440 = vmatpush.bf16.msra.mxu1 %v778_v4  ;;  %v792_v13 = vld [vmem:[#allocation2 + $0xa0] sm:$0xff]  ;;  %v319_v14 = vunpack.c.l.b16 %v282_v11  ;;  %v320_v15 = vunpack.c.l.b16 %v299_v12  ;;  %v774_v21 = vld [vmem:[#allocation2 + $0x10] sm:$0xff]  ;;  %v781_v25 = vld [vmem:[#allocation2 + $0x48] sm:$0xff] }
  0x16   : > { %524 = vmatpush.bf16.msra.mxu2 %v794_v5  ;;  %v790_v22 = vld [vmem:[#allocation2 + $0x90] sm:$0xff]  ;;  %v452_v23 = vld [vmem:[%s264_s30] sm:$0xe]  ;;  %v773_v26 = vld [vmem:[#allocation2 + $0x8] sm:$0xff] }
  0x17   : > { %v321_v19 = vpack.c.b16 %v320_v15, %v319_v14  ;;  %v471_v27 = vunpack.c.l.b16 %v452_v23  ;;  %v789_v28 = vld [vmem:[#allocation2 + $0x88] sm:$0xff]  ;;  %v780_v31 = vld [vmem:[#allocation2 + $0x40] sm:$0xff] }
  0x18   : > { %380 = vmatpush.bf16.msra.mxu0 %v785_v6  ;;  %v772_v32 = vld [vmem:[#allocation2] sm:$0xff] }
  0x19   : > { %441 = vmatpush.bf16.msra.mxu1 %v777_v7  ;;  %v325_v24 = vshll.u32 %v321_v19, 16  ;;  %v323_v29 = vshrl.u32 %v321_v19, 16  ;;  %v472_v33 = vpack.c.b16 %v320_v15, %v471_v27  ;;  %v788_v34 = vld [vmem:[#allocation2 + $0x80] sm:$0xff] }
  0x1a   : > { %525 = vmatpush.bf16.msra.mxu2 %v793_v8  ;;  %v542_v40 = vld [vmem:[%s274_s8] sm:$0xf] }
  0x1b   : > { %v327_v30 = vrot.slane %v325_v24, 1  ;;  %v473_v36 = vrot.slane %v472_v33, 1  ;;  %v833_v41 = vld [vmem:[%s969_s2] ss:$0 sm:$0xff]  ;;  %v543_v44 = vunpack.c.l.bf16 %v542_v40 }
  0x1c   : > { %381 = vmatpush.bf16.msra.mxu0 %v784_v9 }
  0x1d   : > { %442 = vmatpush.bf16.msra.mxu1 %v776_v10  ;;  %v328_v35 = vor.u32 %v327_v30, %v323_v29 }
  0x1e   : > { %526 = vmatpush.bf16.msra.mxu2 %v792_v13 }
  0x20   : > { %382 = vmatpush.bf16.msra.mxu0 %v783_v16 }
  0x21   : > { %443 = vmatpush.bf16.msra.mxu1 %v775_v17 }
  0x22   : > { %527 = vmatpush.bf16.msra.mxu2 %v791_v18 }
  0x24   : > { %383 = vmatpush.bf16.msra.mxu0 %v782_v20 }
  0x25   : > { %444 = vmatpush.bf16.msra.mxu1 %v774_v21 }
  0x26   : > { %528 = vmatpush.bf16.msra.mxu2 %v790_v22 }
  0x28   : > { %384 = vmatpush.bf16.msra.mxu0 %v781_v25 }
  0x29   : > { %445 = vmatpush.bf16.msra.mxu1 %v773_v26 }
  0x2a   : > { %529 = vmatpush.bf16.msra.mxu2 %v789_v28 }
  0x2c   : > { %385 = vmatpush.bf16.msra.mxu0 %v780_v31 }
  0x2d   : > { %446 = vmatpush.bf16.msra.mxu1 %v772_v32 }
  0x2e   : > { %530 = vmatpush.bf16.msra.mxu2 %v788_v34 }
  0x2f   : > { %386 = vmatmul.bf16.vlgmr.msra.gmra.mxu0 %v328_v35 }
  0x30   : > { %447 = vmatmul.bf16.vlgmr.msra.gmra.mxu1 %v282_v11 }
  0x31   : > { %531 = vmatmul.bf16.vlgmr.msra.gmra.mxu2 %v473_v36 }
  0xac   : > { %v387_v37 = vpop.f32.mrf.mxu0 }
  0xad   : > { %v448_v38 = vpop.f32.mrf.mxu1 }
  0xae   : > { %v449_v39 = vadd.f32 %v448_v38, %v387_v37 }
  0xb4   : > { %v532_v42 = vpop.f32.mrf.mxu2  ;;  %v389_v45 = vpop.f32.mrf.mxu0 }
  0xb5   : > { %v536_v43 = vadd.f32 %v532_v42, %v449_v39  ;;  %v450_v46 = vpop.f32.mrf.mxu1 }
  0xb7   : > { %v541_v47 = vadd.f32 %v833_v41, %v536_v43 }
  0xb9   : > { %v544_v48 = vadd.f32 %v543_v44, %v541_v47 }
  0xbb   : > { %v545_v49 = vmax.f32 %v544_v48, 0.0 }
  0xbc   : > { %v534_v50 = vpop.f32.mrf.mxu2 }
  0xbd   : > { %v546_v51 = vpack.c.bf16 %v545_v49, %v545_v49 }
  0xbf   : > { %547 = vst [vmem:[%s281_s13] sm:$0xf] %v546_v51 }
  0xc0 PF: > { %s15_s17 = sadd.s32 1, %s890_s17   ;;  %s972_s15 = smov %s886_s16 }
  0xc1   : > { %p12_p8 = scmp.ge.s32.totalorder %s15_s17, 4   ;;  %s973_s16 = smov %s975_s19 }
  0xc3   :  { %14 = sbr.rel (!%p12_p8) target bundleno = 2 (0x2), region = 80 }
  0xc8   :  { %573 = vsyncpa [#allocation3], 1 }
  0xc9   :  { %575 = vsyncpa [#allocation3 + $0x1], 1 }

// kernel: _lambda_.15
= control target key start
LH: loop header
LB: loop body
LE: loop exit
PB: predicated region body
PF: predicated region fallthrough
CT: control target
= control target key end

     0   :  { %12 = vsyncpa [#allocation3], 0  ;;  %s1311_s0 = inlined_call_operand.vmem [shape: bf16[2,5,256], index: 0, kind: input, shape index: {}]   ;;  %s1312_s1 = inlined_call_operand.hbm [shape: bf16[3,128,128], index: 1, kind: input, shape index: {}]   ;;  %s1313_s2 = inlined_call_operand.vmem [shape: f32[1,128], index: 2, kind: input, shape index: {}]   ;;  %s1314_s3 = inlined_call_operand.hbm [shape: bf16[128,128], index: 3, kind: input, shape index: {}]   ;;  %s1315_s4 = inlined_call_operand.vmem [shape: f32[1,128], index: 4, kind: input, shape index: {}]   ;;  %s1316_s5 = inlined_call_operand.vmem [shape: bf16[2,4,128], index: 5, kind: output, shape index: {0}]   ;;  %s1317_s6 = inlined_call_operand.vmem [shape: bf16[2,4,128], index: 6, kind: output, shape index: {1}]  }
   0x1   :  { %13 = vsyncpa [#allocation5], 0  ;;  %s1226_s21 = smov 0   ;;  %s1228_s22 = smov 0  }
   0x2   :  { %s1230_s23 = smov 0  }
   0x3 LB: > { %s868_s24 = sadd.s32 4294967295, %s1185_s23   ;;  %s31_s25 = sadd.s32 1, %s1181_s22  ;;  %s1185_s23 = sphi %s1230_s23, %s19_s23   ;;  %s1181_s22 = sphi %s1228_s22, %s1321_s22   ;;  %s1177_s21 = sphi %s1226_s21, %s1320_s21  }
   0x4   : > { %p33_p0 = scmp.ge.s32.totalorder %s31_s25, 2  ;;  %p870_p1 = scmp.ge.s32.totalorder %s1185_s23, 1 }
   0x5   : > { %p222_p2 = scmp.lt.s32.totalorder %s1185_s23, 3  ;;  %p1251_p4 = scmp.eq.s32.totalorder %s868_s24, 0 }
   0x6   : > { %s1323_s25 = smov (%p33_p0, %s31_s25), 0  ;;  %s235_s30 = sshll.u32 %s1312_s1, 4  ;;  %s236_s30 = int_to_ptr.hbm [resolvable:$true] %s235_s30 }
   0x7   : > { %p1247_p3 = pnand %p870_p1, %p222_p2  ;;  %s1187_s7 = smov [#allocation2]  }
   0x8   : > { %s237_s8 = sshll.u32 %s1187_s7, 4  ;;  %s257_s11 = sshll.u32 %s1314_s3, 4  ;;  %s238_s8 = int_to_ptr.vmem [resolvable:$true] %s237_s8  ;;  %s258_s11 = int_to_ptr.hbm [resolvable:$true] %s257_s11 }
   0x9   : > { %p1054_p5 = pneg %p1247_p3  ;;  %s1188_s12 = smov 64  }
   0xa   : > { %s1189_s13 = smov 4   ;;  %s1190_s14 = smov [#allocation4]  }
   0xb   : > { %p1055_p6 = pnand %p1251_p4, %p1054_p5  ;;  %s259_s15 = sshll.u32 %s1190_s14, 4  ;;  %s260_s15 = int_to_ptr.vmem [resolvable:$true] %s259_s15 }
   0xc   : > { %289 = sbr.rel (%p1247_p3) target bundleno = 195 (0xc3), region = 40 }
   0xd   : > { %1057 = dma.hbm_to_vmem [thread:$0]  (!%p1055_p6), %s236_s30, 3072, %s238_s8, [#allocation3], %s1188_s12, %s1188_s12, %s1189_s13  }
   0xe   : > { %1060 = dma.hbm_to_vmem [thread:$0]  (!%p1055_p6), %s258_s11, 1024, %s260_s15, [#allocation5], %s1188_s12, %s1188_s12, %s1189_s13  }
  0x11   : > { %1168 = dma.done.wait (%p1251_p4), [#allocation3], 3072  }
  0x12   : > { %1170 = vsyncadd (%p1251_p4), [#allocation3], 4294964224 }
  0x13   : > { %1172 = dma.done.wait (%p1251_p4), [#allocation5], 1024  }
  0x14   : > { %1174 = vsyncadd (%p1251_p4), [#allocation5], 4294966272  ;;  %p340_p7 = scmp.lt.s32.totalorder %s1177_s21, 1  ;;  %v1029_v0 = vld [vmem:[#allocation2 + $0x78] sm:$0xff]  ;;  %v1028_v4 = vld [vmem:[#allocation2 + $0x70] sm:$0xff] }
  0x15   : > { %v1021_v1 = vld [vmem:[#allocation2 + $0x38] sm:$0xff]  ;;  %448 = vmatpush.bf16.msra.mxu0 %v1029_v0  ;;  %v1020_v5 = vld [vmem:[#allocation2 + $0x30] sm:$0xff]  ;;  %v1027_v8 = vld [vmem:[#allocation2 + $0x68] sm:$0xff] }
  0x16   : > { %v1037_v2 = vld [vmem:[#allocation2 + $0xb8] sm:$0xff]  ;;  %s1325_s21 = smov (!%p340_p7, %s1177_s21), 1  ;;  %509 = vmatpush.bf16.msra.mxu1 %v1021_v1  ;;  %v1036_v6 = vld [vmem:[#allocation2 + $0xb0] sm:$0xff]  ;;  %v1019_v9 = vld [vmem:[#allocation2 + $0x28] sm:$0xff] }
  0x17   : > { %v1045_v3 = vld [vmem:[#allocation4 + $0x38] sm:$0xff]  ;;  %599 = vmatpush.bf16.msra.mxu2 %v1037_v2  ;;  %v1044_v7 = vld [vmem:[#allocation4 + $0x30] sm:$0xff]  ;;  %s1013_s16 = sshll.u32 %s1325_s21, 3  ;;  %v1035_v10 = vld [vmem:[#allocation2 + $0xa8] sm:$0xff]  ;;  %s881_s26 = sshll.u32 %s1325_s21, 1 }
  0x18   : > { %690 = vmatpush.bf16.msra.mxu3 %v1045_v3  ;;  %v1043_v11 = vld [vmem:[#allocation4 + $0x28] sm:$0xff]  ;;  %s1283_s19 = scalar_lea.vmem %s1311_s0, %s1013_s16  ;;  %v1026_v12 = vld [vmem:[#allocation2 + $0x60] sm:$0xff]  ;;  %v1025_v17 = vld [vmem:[#allocation2 + $0x58] sm:$0xff]  ;;  %s364_s7 = scalar_lea.vmem %s1317_s6, %s881_s26 }
  0x19   : > { %449 = vmatpush.bf16.msra.mxu0 %v1028_v4  ;;  %v1018_v13 = vld [vmem:[#allocation2 + $0x20] sm:$0xff]  ;;  %v1017_v18 = vld [vmem:[#allocation2 + $0x18] sm:$0xff]  ;;  %v1024_v22 = vld [vmem:[#allocation2 + $0x50] sm:$0xff]  ;;  %s357_s9 = scalar_lea.vmem %s1316_s5, %s881_s26 }
  0x1a   : > { %510 = vmatpush.bf16.msra.mxu1 %v1020_v5  ;;  %v1034_v14 = vld [vmem:[#allocation2 + $0xa0] sm:$0xff]  ;;  %v1033_v20 = vld [vmem:[#allocation2 + $0x98] sm:$0xff]  ;;  %v1016_v23 = vld [vmem:[#allocation2 + $0x10] sm:$0xff] }
  0x1b   : > { %600 = vmatpush.bf16.msra.mxu2 %v1036_v6  ;;  %v1042_v15 = vld [vmem:[#allocation4 + $0x20] sm:$0xff]  ;;  %v1041_v21 = vld [vmem:[#allocation4 + $0x18] sm:$0xff]  ;;  %v1032_v25 = vld [vmem:[#allocation2 + $0x90] sm:$0xff] }
  0x1c   : > { %691 = vmatpush.bf16.msra.mxu3 %v1044_v7  ;;  %v522_v16 = vld [vmem:[%s1283_s19] sm:$0x7]  ;;  %v1040_v26 = vld [vmem:[#allocation4 + $0x10] sm:$0xff]  ;;  %v1023_v27 = vld [vmem:[#allocation2 + $0x48] sm:$0xff] }
  0x1d   : > { %450 = vmatpush.bf16.msra.mxu0 %v1027_v8  ;;  %v541_v19 = vunpack.c.l.b16 %v522_v16  ;;  %v1015_v28 = vld [vmem:[#allocation2 + $0x8] sm:$0xff]  ;;  %v1022_v32 = vld [vmem:[#allocation2 + $0x40] sm:$0xff] }
  0x1e   : > { %511 = vmatpush.bf16.msra.mxu1 %v1019_v9  ;;  %v1031_v30 = vld [vmem:[#allocation2 + $0x88] sm:$0xff]  ;;  %v1014_v33 = vld [vmem:[#allocation2] sm:$0xff] }
  0x1f   : > { %601 = vmatpush.bf16.msra.mxu2 %v1035_v10  ;;  %v542_v24 = vpack.c.b16 %v541_v19, %v541_v19  ;;  %v1039_v31 = vld [vmem:[#allocation4 + $0x8] sm:$0xff]  ;;  %v1030_v36 = vld [vmem:[#allocation2 + $0x80] sm:$0xff] }
  0x20   : > { %692 = vmatpush.bf16.msra.mxu3 %v1043_v11  ;;  %v1038_v37 = vld [vmem:[#allocation4] sm:$0xff] }
  0x21   : > { %451 = vmatpush.bf16.msra.mxu0 %v1026_v12  ;;  %v546_v29 = vshll.u32 %v542_v24, 16  ;;  %v544_v34 = vshrl.u32 %v542_v24, 16  ;;  %v382_v38 = vld [vmem:[%s1283_s19 + $0x4] sm:$0x3]  ;;  %v365_v39 = vld [vmem:[%s1283_s19] sm:$0x3] }
  0x22   : > { %512 = vmatpush.bf16.msra.mxu1 %v1018_v13  ;;  %v621_v41 = vld [vmem:[%s1283_s19 + $0x4] sm:$0x3]  ;;  %v1094_v45 = vld [vmem:[%s1315_s4] ss:$0 sm:$0xff] }
  0x23   : > { %602 = vmatpush.bf16.msra.mxu2 %v1034_v14  ;;  %v548_v35 = vrot.slane %v546_v29, 1  ;;  %v1093_v46 = vld [vmem:[%s1313_s2] ss:$0 sm:$0xff] }
  0x24   : > { %693 = vmatpush.bf16.msra.mxu3 %v1042_v15 }
  0x25   : > { %452 = vmatpush.bf16.msra.mxu0 %v1025_v17  ;;  %v549_v40 = vor.u32 %v548_v35, %v544_v34 }
  0x26   : > { %513 = vmatpush.bf16.msra.mxu1 %v1017_v18 }
  0x27   : > { %603 = vmatpush.bf16.msra.mxu2 %v1033_v20 }
  0x28   : > { %694 = vmatpush.bf16.msra.mxu3 %v1041_v21 }
  0x29   : > { %453 = vmatpush.bf16.msra.mxu0 %v1024_v22 }
  0x2a   : > { %514 = vmatpush.bf16.msra.mxu1 %v1016_v23 }
  0x2b   : > { %604 = vmatpush.bf16.msra.mxu2 %v1032_v25 }
  0x2c   : > { %695 = vmatpush.bf16.msra.mxu3 %v1040_v26 }
  0x2d   : > { %454 = vmatpush.bf16.msra.mxu0 %v1023_v27 }
  0x2e   : > { %515 = vmatpush.bf16.msra.mxu1 %v1015_v28 }
  0x2f   : > { %605 = vmatpush.bf16.msra.mxu2 %v1031_v30 }
  0x30   : > { %696 = vmatpush.bf16.msra.mxu3 %v1039_v31 }
  0x31   : > { %455 = vmatpush.bf16.msra.mxu0 %v1022_v32 }
  0x32   : > { %516 = vmatpush.bf16.msra.mxu1 %v1014_v33 }
  0x33   : > { %606 = vmatpush.bf16.msra.mxu2 %v1030_v36 }
  0x34   : > { %697 = vmatpush.bf16.msra.mxu3 %v1038_v37  ;;  %456 = vmatmul.bf16.vlgmr.msra.gmra.mxu0 %v382_v38 }
  0x35   : > { %517 = vmatmul.bf16.vlgmr.msra.gmra.mxu1 %v365_v39 }
  0x36   : > { %607 = vmatmul.bf16.vlgmr.msra.gmra.mxu2 %v549_v40 }
  0x37   : > { %698 = vmatmul.bf16.vlgmr.msra.gmra.mxu3 %v621_v41 }
  0xb1   : > { %v457_v42 = vpop.f32.mrf.mxu0 }
  0xb2   : > { %v518_v43 = vpop.f32.mrf.mxu1 }
  0xb3   : > { %v519_v44 = vadd.f32 %v518_v43, %v457_v42 }
  0xb9   : > { %v608_v47 = vpop.f32.mrf.mxu2  ;;  %v459_v51 = vpop.f32.mrf.mxu0 }
  0xba   : > { %v699_v48 = vpop.f32.mrf.mxu3  ;;  %v612_v49 = vadd.f32 %v608_v47, %v519_v44  ;;  %v520_v52 = vpop.f32.mrf.mxu1 }
  0xbb   : > { %v700_v50 = vadd.f32 %v1094_v45, %v699_v48 }
  0xbc   : > { %v617_v53 = vadd.f32 %v1093_v46, %v612_v49 }
  0xbd   : > { %v703_v54 = vpack.c.bf16 %v700_v50, %v700_v50 }
  0xbe   : > { %v618_v55 = vmax.f32 %v617_v53, 0.0 }
  0xbf   : > { %704 = vst [vmem:[%s364_s7] sm:$0x3] %v703_v54 }
  0xc0   : > { %v619_v56 = vpack.c.bf16 %v618_v55, %v618_v55 }
  0xc1   : > { %v610_v57 = vpop.f32.mrf.mxu2 }
  0xc2   : > { %v701_v58 = vpop.f32.mrf.mxu3  ;;  %620 = vst [vmem:[%s357_s9] sm:$0x3] %v619_v56 }
  0xc3 PF: > { %s19_s23 = sadd.s32 1, %s1185_s23   ;;  %s1320_s21 = smov %s1181_s22 }
  0xc4   : > { %p16_p8 = scmp.ge.s32.totalorder %s19_s23, 4   ;;  %s1321_s22 = smov %s1323_s25 }
  0xc6   :  { %18 = sbr.rel (!%p16_p8) target bundleno = 3 (0x3), region = 101 }
  0xcb   :  { %750 = vsyncpa [#allocation3], 1 }
  0xcc   :  { %752 = vsyncpa [#allocation3 + $0x1], 1 }
  0xcd   :  { %753 = vsyncpa [#allocation5], 1 }

// kernel: _lambda_.16
= control target key start
LH: loop header
LB: loop body
LE: loop exit
PB: predicated region body
PF: predicated region fallthrough
CT: control target
= control target key end

     0   :  { %9 = vsyncpa [#allocation3], 0  ;;  %s913_s15 = smov 0   ;;  %s915_s16 = smov 0   ;;  %s965_s0 = inlined_call_operand.vmem [shape: bf16[2,6,128], index: 0, kind: input, shape index: {}]   ;;  %s966_s1 = inlined_call_operand.hbm [shape: bf16[3,128,128], index: 1, kind: input, shape index: {}]   ;;  %s967_s2 = inlined_call_operand.vmem [shape: f32[1,128], index: 2, kind: input, shape index: {}]   ;;  %s968_s3 = inlined_call_operand.vmem [shape: bf16[2,4,128], index: 3, kind: input, shape index: {}]   ;;  %s969_s4 = inlined_call_operand.vmem [shape: bf16[2,4,128], index: 4, kind: output, shape index: {}]  }
   0x1   :  { %s917_s17 = smov 0  }
   0x2 LB: > { %s656_s18 = sadd.s32 4294967295, %s883_s17   ;;  %s27_s19 = sadd.s32 1, %s879_s16  ;;  %s883_s17 = sphi %s917_s17, %s15_s17   ;;  %s879_s16 = sphi %s915_s16, %s971_s16   ;;  %s875_s15 = sphi %s913_s15, %s970_s15  }
   0x3   : > { %p29_p0 = scmp.ge.s32.totalorder %s27_s19, 2  ;;  %p658_p1 = scmp.ge.s32.totalorder %s883_s17, 1 }
   0x4   : > { %p166_p2 = scmp.lt.s32.totalorder %s883_s17, 3  ;;  %p797_p4 = scmp.eq.s32.totalorder %s656_s18, 0 }
   0x5   : > { %s973_s19 = smov (%p29_p0, %s27_s19), 0  ;;  %s179_s22 = sshll.u32 %s966_s1, 4  ;;  %s180_s22 = int_to_ptr.hbm [resolvable:$true] %s179_s22 }
   0x6   : > { %p167_p3 = pnand %p658_p1, %p166_p2  ;;  %s885_s23 = smov [#allocation2]  }
   0x7   : > { %s181_s24 = sshll.u32 %s885_s23, 4  ;;  %s886_s25 = smov 64   ;;  %s182_s24 = int_to_ptr.vmem [resolvable:$true] %s181_s24 }
   0x8   : > { %p793_p5 = pneg %p167_p3  ;;  %s887_s26 = smov 4  }
   0x9   : > { %220 = sbr.rel (%p167_p3) target bundleno = 192 (0xc0), region = 36 }
   0xa   : > { %p794_p6 = pnand %p797_p4, %p793_p5 }
   0xc   : > { %796 = dma.hbm_to_vmem [thread:$0]  (!%p794_p6), %s180_s22, 3072, %s182_s24, [#allocation3], %s886_s25, %s886_s25, %s887_s26  }
   0xe   : > { %870 = dma.done.wait (%p797_p4), [#allocation3], 3072  }
   0xf   : > { %872 = vsyncadd (%p797_p4), [#allocation3], 4294964224  ;;  %p258_p7 = scmp.lt.s32.totalorder %s875_s15, 1  ;;  %v780_v0 = vld [vmem:[#allocation2 + $0x78] sm:$0xff]  ;;  %v779_v3 = vld [vmem:[#allocation2 + $0x70] sm:$0xff] }
  0x10   : > { %v772_v1 = vld [vmem:[#allocation2 + $0x38] sm:$0xff]  ;;  %373 = vmatpush.bf16.msra.mxu0 %v780_v0  ;;  %v771_v4 = vld [vmem:[#allocation2 + $0x30] sm:$0xff]  ;;  %v778_v6 = vld [vmem:[#allocation2 + $0x68] sm:$0xff] }
  0x11   : > { %v788_v2 = vld [vmem:[#allocation2 + $0xb8] sm:$0xff]  ;;  %s975_s15 = smov (!%p258_p7, %s875_s15), 1  ;;  %434 = vmatpush.bf16.msra.mxu1 %v772_v1  ;;  %v787_v5 = vld [vmem:[#allocation2 + $0xb0] sm:$0xff]  ;;  %v770_v7 = vld [vmem:[#allocation2 + $0x28] sm:$0xff] }
  0x12   : > { %518 = vmatpush.bf16.msra.mxu2 %v788_v2  ;;  %s664_s27 = sshll.u32 %s975_s15, 2  ;;  %v786_v8 = vld [vmem:[#allocation2 + $0xa8] sm:$0xff]  ;;  %v777_v9 = vld [vmem:[#allocation2 + $0x60] sm:$0xff]  ;;  %v776_v14 = vld [vmem:[#allocation2 + $0x58] sm:$0xff]  ;;  %s665_s5 = sshll.u32 %s975_s15, 1 }
  0x13   : > { %s941_s30 = scalar_lea.vmem %s965_s0, %s664_s27  ;;  %v769_v10 = vld [vmem:[#allocation2 + $0x20] sm:$0xff]  ;;  %v768_v15 = vld [vmem:[#allocation2 + $0x18] sm:$0xff]  ;;  %v775_v18 = vld [vmem:[#allocation2 + $0x50] sm:$0xff]  ;;  %s271_s8 = scalar_lea.vmem %s968_s3, %s665_s5 }
  0x14   : > { %374 = vmatpush.bf16.msra.mxu0 %v779_v3  ;;  %v296_v11 = vld [vmem:[%s941_s30] sm:$0x7]  ;;  %v784_v16 = vld [vmem:[#allocation2 + $0x98] sm:$0xff]  ;;  %v767_v19 = vld [vmem:[#allocation2 + $0x10] sm:$0xff]  ;;  %s278_s13 = scalar_lea.vmem %s969_s4, %s665_s5 }
  0x15   : > { %435 = vmatpush.bf16.msra.mxu1 %v771_v4  ;;  %v785_v12 = vld [vmem:[#allocation2 + $0xa0] sm:$0xff]  ;;  %v315_v13 = vunpack.c.l.b16 %v296_v11  ;;  %v783_v20 = vld [vmem:[#allocation2 + $0x90] sm:$0xff]  ;;  %v774_v23 = vld [vmem:[#allocation2 + $0x48] sm:$0xff] }
  0x16   : > { %519 = vmatpush.bf16.msra.mxu2 %v787_v5  ;;  %v447_v21 = vld [vmem:[%s941_s30] sm:$0x6]  ;;  %v766_v24 = vld [vmem:[#allocation2 + $0x8] sm:$0xff]  ;;  %v826_v40 = vld [vmem:[%s967_s2] ss:$0 sm:$0xff] }
  0x17   : > { %v316_v17 = vpack.c.b16 %v315_v13, %v315_v13  ;;  %v466_v25 = vunpack.c.l.b16 %v447_v21  ;;  %v782_v26 = vld [vmem:[#allocation2 + $0x88] sm:$0xff]  ;;  %v773_v29 = vld [vmem:[#allocation2 + $0x40] sm:$0xff] }
  0x18   : > { %375 = vmatpush.bf16.msra.mxu0 %v778_v6  ;;  %v765_v30 = vld [vmem:[#allocation2] sm:$0xff] }
  0x19   : > { %436 = vmatpush.bf16.msra.mxu1 %v770_v7  ;;  %v320_v22 = vshll.u32 %v316_v17, 16  ;;  %v318_v27 = vshrl.u32 %v316_v17, 16  ;;  %v467_v31 = vpack.c.b16 %v466_v25, %v466_v25  ;;  %v781_v32 = vld [vmem:[#allocation2 + $0x80] sm:$0xff] }
  0x1a   : > { %520 = vmatpush.bf16.msra.mxu2 %v786_v8  ;;  %v279_v34 = vld [vmem:[%s941_s30] sm:$0x3] }
  0x1b   : > { %v322_v28 = vrot.slane %v320_v22, 1  ;;  %v468_v35 = vrot.slane %v467_v31, 1  ;;  %v537_v39 = vld [vmem:[%s271_s8] sm:$0x3] }
  0x1c   : > { %376 = vmatpush.bf16.msra.mxu0 %v777_v9  ;;  %v538_v43 = vunpack.c.l.bf16 %v537_v39 }
  0x1d   : > { %437 = vmatpush.bf16.msra.mxu1 %v769_v10  ;;  %v323_v33 = vor.u32 %v322_v28, %v318_v27 }
  0x1e   : > { %521 = vmatpush.bf16.msra.mxu2 %v785_v12 }
  0x20   : > { %377 = vmatpush.bf16.msra.mxu0 %v776_v14 }
  0x21   : > { %438 = vmatpush.bf16.msra.mxu1 %v768_v15 }
  0x22   : > { %522 = vmatpush.bf16.msra.mxu2 %v784_v16 }
  0x24   : > { %378 = vmatpush.bf16.msra.mxu0 %v775_v18 }
  0x25   : > { %439 = vmatpush.bf16.msra.mxu1 %v767_v19 }
  0x26   : > { %523 = vmatpush.bf16.msra.mxu2 %v783_v20 }
  0x28   : > { %379 = vmatpush.bf16.msra.mxu0 %v774_v23 }
  0x29   : > { %440 = vmatpush.bf16.msra.mxu1 %v766_v24 }
  0x2a   : > { %524 = vmatpush.bf16.msra.mxu2 %v782_v26 }
  0x2c   : > { %380 = vmatpush.bf16.msra.mxu0 %v773_v29 }
  0x2d   : > { %441 = vmatpush.bf16.msra.mxu1 %v765_v30 }
  0x2e   : > { %525 = vmatpush.bf16.msra.mxu2 %v781_v32 }
  0x2f   : > { %381 = vmatmul.bf16.vlgmr.msra.gmra.mxu0 %v323_v33 }
  0x30   : > { %442 = vmatmul.bf16.vlgmr.msra.gmra.mxu1 %v279_v34 }
  0x31   : > { %526 = vmatmul.bf16.vlgmr.msra.gmra.mxu2 %v468_v35 }
  0xac   : > { %v382_v36 = vpop.f32.mrf.mxu0 }
  0xad   : > { %v443_v37 = vpop.f32.mrf.mxu1 }
  0xae   : > { %v444_v38 = vadd.f32 %v443_v37, %v382_v36 }
  0xb4   : > { %v527_v41 = vpop.f32.mrf.mxu2  ;;  %v384_v44 = vpop.f32.mrf.mxu0 }
  0xb5   : > { %v531_v42 = vadd.f32 %v527_v41, %v444_v38  ;;  %v445_v45 = vpop.f32.mrf.mxu1 }
  0xb7   : > { %v536_v46 = vadd.f32 %v826_v40, %v531_v42 }
  0xb9   : > { %v539_v47 = vadd.f32 %v538_v43, %v536_v46 }
  0xbb   : > { %v540_v48 = vmax.f32 %v539_v47, 0.0 }
  0xbc   : > { %v529_v49 = vpop.f32.mrf.mxu2 }
  0xbd   : > { %v541_v50 = vpack.c.bf16 %v540_v48, %v540_v48 }
  0xbf   : > { %542 = vst [vmem:[%s278_s13] sm:$0x3] %v541_v50 }
  0xc0 PF: > { %s15_s17 = sadd.s32 1, %s883_s17   ;;  %s970_s15 = smov %s879_s16 }
  0xc1   : > { %p12_p8 = scmp.ge.s32.totalorder %s15_s17, 4   ;;  %s971_s16 = smov %s973_s19 }
  0xc3   :  { %14 = sbr.rel (!%p12_p8) target bundleno = 2 (0x2), region = 80 }
  0xc8   :  { %568 = vsyncpa [#allocation3], 1 }
  0xc9   :  { %570 = vsyncpa [#allocation3 + $0x1], 1 }

// kernel: _lambda_.17
= control target key start
LH: loop header
LB: loop body
LE: loop exit
PB: predicated region body
PF: predicated region fallthrough
CT: control target
= control target key end

     0   :  { %12 = vsyncpa [#allocation3], 0  ;;  %s1846_s0 = inlined_call_operand.vmem [shape: bf16[2,3,256], index: 0, kind: input, shape index: {}]   ;;  %s1847_s1 = inlined_call_operand.hbm [shape: bf16[3,128,256], index: 1, kind: input, shape index: {}]   ;;  %s1848_s2 = inlined_call_operand.hbm [shape: f32[1,256], index: 2, kind: input, shape index: {}]   ;;  %s1849_s3 = inlined_call_operand.vmem [shape: bf16[128,256], index: 3, kind: input, shape index: {}]   ;;  %s1850_s4 = inlined_call_operand.hbm [shape: f32[1,256], index: 4, kind: input, shape index: {}]   ;;  %s1851_s5 = inlined_call_operand.vmem [shape: bf16[2,2,256], index: 5, kind: output, shape index: {0}]   ;;  %s1852_s6 = inlined_call_operand.vmem [shape: bf16[2,2,256], index: 6, kind: output, shape index: {1}]  }
   0x1   :  { %13 = vsyncpa [#allocation5], 0  ;;  %s1656_s21 = smov 0   ;;  %s1658_s22 = smov 0  }
   0x2   :  { %s1660_s23 = smov 0  }
   0x3 LB: > { %s253_s26 = sshll.u32 %s1848_s2, 4  ;;  %s1098_s27 = sadd.s32 4294967295, %s1614_s23   ;;  %s1614_s23 = sphi %s1660_s23, %s19_s23   ;;  %s1610_s22 = sphi %s1658_s22, %s1857_s22   ;;  %s1606_s21 = sphi %s1656_s21, %s1856_s21   ;;  %s254_s26 = int_to_ptr.hbm [resolvable:$true] %s253_s26 }
   0x4   : > { %p1100_p0 = scmp.ge.s32.totalorder %s1614_s23, 1  ;;  %p222_p1 = scmp.lt.s32.totalorder %s1614_s23, 3 }
   0x5   : > { %p1677_p2 = scmp.eq.s32.totalorder %s1098_s27, 0  ;;  %s1616_s30 = smov [#allocation4]  }
   0x6   : > { %p1681_p3 = pnand %p1100_p0, %p222_p1  ;;  %s255_s7 = sshll.u32 %s1616_s30, 4  ;;  %s256_s7 = int_to_ptr.vmem [resolvable:$true] %s255_s7 }
   0x7   : > { %s31_s9 = sadd.s32 1, %s1610_s22  ;;  %s236_s12 = sshll.u32 %s1847_s1, 4  ;;  %s237_s12 = int_to_ptr.hbm [resolvable:$true] %s236_s12 }
   0x8   : > { %p1449_p4 = pneg %p1681_p3  ;;  %p33_p6 = scmp.ge.s32.totalorder %s31_s9, 2 }
   0x9   : > { %s1617_s13 = smov [#allocation2]   ;;  %s276_s17 = sshll.u32 %s1850_s4, 4  ;;  %s277_s17 = int_to_ptr.hbm [resolvable:$true] %s276_s17 }
   0xa   : > { %p1689_p5 = pnand %p1677_p2, %p1449_p4  ;;  %s1859_s9 = smov (%p33_p6, %s31_s9), 0 }
   0xb   : > { %s238_s14 = sshll.u32 %s1617_s13, 4  ;;  %s1618_s18 = smov 128   ;;  %s239_s14 = int_to_ptr.vmem [resolvable:$true] %s238_s14 }
   0xc   : > { %1455 = dma.hbm_to_vmem [thread:$0]  (!%p1689_p5), %s254_s26, 32, %s256_s7, [#allocation5]  }
   0xd   : > { %s1619_s19 = smov 8   ;;  %s1620_s20 = smov [#allocation6]  }
   0xe   : > { %1452 = dma.hbm_to_vmem [thread:$0]  (!%p1689_p5), %s237_s12, 6144, %s239_s14, [#allocation3], %s1618_s18, %s1618_s18, %s1619_s19  }
   0xf   : > { %s278_s24 = sshll.u32 %s1620_s20, 4  ;;  %299 = sbr.rel (%p1681_p3) target bundleno = 231 (0xe7), region = 40  ;;  %s279_s24 = int_to_ptr.vmem [resolvable:$true] %s278_s24 }
  0x10   : > { %1458 = dma.hbm_to_vmem [thread:$0]  (!%p1689_p5), %s277_s17, 32, %s279_s24, [#allocation5]  }
  0x14   : > { %1597 = dma.done.wait (%p1677_p2), [#allocation3], 6144  }
  0x15   : > { %1599 = vsyncadd (%p1677_p2), [#allocation3], 4294961152 }
  0x16   : > { %1601 = dma.done.wait (%p1677_p2), [#allocation5], 64  }
  0x17   : > { %1603 = vsyncadd (%p1677_p2), [#allocation5], 4294967232  ;;  %v1172_v0 = vld [vmem:[#allocation2 + $0xf0] sm:$0xf]  ;;  %v1404_v1 = vld [vmem:[#allocation2 + $0xf4] sm:$0xf0] }
  0x18   : > { %v1403_v2 = vld [vmem:[#allocation2 + $0xf4] sm:$0xf]  ;;  %v1173_v3 = vor.u32 %v1404_v1, %v1172_v0  ;;  %v1174_v4 = vld [vmem:[#allocation2 + $0xf8] sm:$0xf0]  ;;  %v1236_v5 = vld [vmem:[#allocation2 + $0x70] sm:$0xf] }
  0x19   : > { %v1388_v6 = vld [vmem:[#allocation2 + $0x74] sm:$0xf0]  ;;  %v1177_v7 = vor.u32 %v1403_v2, %v1174_v4  ;;  %v1387_v9 = vld [vmem:[#allocation2 + $0x74] sm:$0xf]  ;;  %v1238_v10 = vld [vmem:[#allocation2 + $0x78] sm:$0xf0] }
  0x1a   : > { %v1237_v8 = vor.u32 %v1388_v6, %v1236_v5  ;;  %v1164_v11 = vld [vmem:[#allocation2 + $0xe0] sm:$0xf]  ;;  %503 = vmatpush.bf16.msra.mxu0 %v1173_v3  ;;  %v1241_v12 = vor.u32 %v1387_v9, %v1238_v10  ;;  %v1402_v13 = vld [vmem:[#allocation2 + $0xe4] sm:$0xf0]  ;;  %v1401_v14 = vld [vmem:[#allocation2 + $0xe4] sm:$0xf] }
  0x1b   : > { %v1166_v15 = vld [vmem:[#allocation2 + $0xe8] sm:$0xf0]  ;;  %516 = vmatpush.bf16.msra.mxu1 %v1177_v7  ;;  %v1165_v16 = vor.u32 %v1402_v13, %v1164_v11  ;;  %v1228_v18 = vld [vmem:[#allocation2 + $0x60] sm:$0xf]  ;;  %v1386_v19 = vld [vmem:[#allocation2 + $0x64] sm:$0xf0] }
  0x1c   : > { %609 = vmatpush.bf16.msra.mxu2 %v1237_v8  ;;  %v1169_v17 = vor.u32 %v1401_v14, %v1166_v15  ;;  %v1385_v20 = vld [vmem:[#allocation2 + $0x64] sm:$0xf]  ;;  %622 = vmatpush.bf16.msra.mxu3 %v1241_v12  ;;  %v1229_v21 = vor.u32 %v1386_v19, %v1228_v18  ;;  %v1230_v22 = vld [vmem:[#allocation2 + $0x68] sm:$0xf0]  ;;  %v1156_v23 = vld [vmem:[#allocation2 + $0xd0] sm:$0xf] }
  0x1d   : > { %v1400_v24 = vld [vmem:[#allocation2 + $0xd4] sm:$0xf0]  ;;  %v1233_v25 = vor.u32 %v1385_v20, %v1230_v22  ;;  %v1399_v26 = vld [vmem:[#allocation2 + $0xd4] sm:$0xf]  ;;  %v1158_v27 = vld [vmem:[#allocation2 + $0xd8] sm:$0xf0] }
  0x1e   : > { %v1220_v28 = vld [vmem:[#allocation2 + $0x50] sm:$0xf]  ;;  %504 = vmatpush.bf16.msra.mxu0 %v1165_v16  ;;  %v1157_v29 = vor.u32 %v1400_v24, %v1156_v23  ;;  %v1384_v30 = vld [vmem:[#allocation2 + $0x54] sm:$0xf0]  ;;  %v1383_v31 = vld [vmem:[#allocation2 + $0x54] sm:$0xf]  ;;  %v1161_v33 = vor.u32 %v1399_v26, %v1158_v27 }
  0x1f   : > { %v1222_v32 = vld [vmem:[#allocation2 + $0x58] sm:$0xf0]  ;;  %517 = vmatpush.bf16.msra.mxu1 %v1169_v17  ;;  %v1221_v34 = vor.u32 %v1384_v30, %v1220_v28  ;;  %v1148_v35 = vld [vmem:[#allocation2 + $0xc0] sm:$0xf]  ;;  %v1398_v36 = vld [vmem:[#allocation2 + $0xc4] sm:$0xf0] }
  0x20   : > { %610 = vmatpush.bf16.msra.mxu2 %v1229_v21  ;;  %v1397_v37 = vld [vmem:[#allocation2 + $0xc4] sm:$0xf]  ;;  %623 = vmatpush.bf16.msra.mxu3 %v1233_v25  ;;  %v1225_v38 = vor.u32 %v1383_v31, %v1222_v32  ;;  %v1150_v39 = vld [vmem:[#allocation2 + $0xc8] sm:$0xf0]  ;;  %v1212_v40 = vld [vmem:[#allocation2 + $0x40] sm:$0xf]  ;;  %v1149_v44 = vor.u32 %v1398_v36, %v1148_v35 }
  0x21   : > { %v1382_v41 = vld [vmem:[#allocation2 + $0x44] sm:$0xf0]  ;;  %v1381_v42 = vld [vmem:[#allocation2 + $0x44] sm:$0xf]  ;;  %v1214_v43 = vld [vmem:[#allocation2 + $0x48] sm:$0xf0]  ;;  %v1153_v45 = vor.u32 %v1397_v37, %v1150_v39 }
  0x22   : > { %505 = vmatpush.bf16.msra.mxu0 %v1157_v29  ;;  %v1213_v46 = vor.u32 %v1382_v41, %v1212_v40  ;;  %v1140_v47 = vld [vmem:[#allocation2 + $0xb0] sm:$0xf]  ;;  %v1396_v48 = vld [vmem:[#allocation2 + $0xb4] sm:$0xf0]  ;;  %v1395_v49 = vld [vmem:[#allocation2 + $0xb4] sm:$0xf]  ;;  %v1217_v50 = vor.u32 %v1381_v42, %v1214_v43 }
  0x23   : > { %518 = vmatpush.bf16.msra.mxu1 %v1161_v33  ;;  %v1142_v51 = vld [vmem:[#allocation2 + $0xb8] sm:$0xf0]  ;;  %v1204_v52 = vld [vmem:[#allocation2 + $0x30] sm:$0xf]  ;;  %v1380_v53 = vld [vmem:[#allocation2 + $0x34] sm:$0xf0]  ;;  %v1141_v56 = vor.u32 %v1396_v48, %v1140_v47 }
  0x24   : > { %611 = vmatpush.bf16.msra.mxu2 %v1221_v34  ;;  %624 = vmatpush.bf16.msra.mxu3 %v1225_v38  ;;  %v1379_v54 = vld [vmem:[#allocation2 + $0x34] sm:$0xf]  ;;  %v1206_v55 = vld [vmem:[#allocation2 + $0x38] sm:$0xf0]  ;;  %p356_p7 = scmp.lt.s32.totalorder %s1606_s21, 1  ;;  %v1145_v57 = vor.u32 %v1395_v49, %v1142_v51  ;;  %v1205_v58 = vor.u32 %v1380_v53, %v1204_v52  ;;  %vm784_vm0 = vcmask 1040384  }
  0x25   : > { %v1132_v59 = vld [vmem:[#allocation2 + $0xa0] sm:$0xf]  ;;  %v1394_v60 = vld [vmem:[#allocation2 + $0xa4] sm:$0xf0]  ;;  %v1393_v61 = vld [vmem:[#allocation2 + $0xa4] sm:$0xf]  ;;  %v1209_v62 = vor.u32 %v1379_v54, %v1206_v55 }
  0x26   : > { %506 = vmatpush.bf16.msra.mxu0 %v1149_v44  ;;  %v1134_v63 = vld [vmem:[#allocation2 + $0xa8] sm:$0xf0]  ;;  %v1196_v0 = vld [vmem:[#allocation2 + $0x20] sm:$0xf]  ;;  %v1378_v1 = vld [vmem:[#allocation2 + $0x24] sm:$0xf0]  ;;  %v1133_v4 = vor.u32 %v1394_v60, %v1132_v59 }
  0x27   : > { %519 = vmatpush.bf16.msra.mxu1 %v1153_v45  ;;  %v1377_v2 = vld [vmem:[#allocation2 + $0x24] sm:$0xf]  ;;  %v1198_v3 = vld [vmem:[#allocation2 + $0x28] sm:$0xf0]  ;;  %s1861_s21 = smov (!%p356_p7, %s1606_s21), 1  ;;  %v1137_v5 = vor.u32 %v1393_v61, %v1134_v63  ;;  %v1197_v6 = vor.u32 %v1378_v1, %v1196_v0 }
  0x28   : > { %612 = vmatpush.bf16.msra.mxu2 %v1213_v46  ;;  %625 = vmatpush.bf16.msra.mxu3 %v1217_v50  ;;  %v1124_v7 = vld [vmem:[#allocation2 + $0x90] sm:$0xf]  ;;  %v1392_v8 = vld [vmem:[#allocation2 + $0x94] sm:$0xf0]  ;;  %v1391_v9 = vld [vmem:[#allocation2 + $0x94] sm:$0xf]  ;;  %v1201_v10 = vor.u32 %v1377_v2, %v1198_v3 }
  0x29   : > { %v1126_v11 = vld [vmem:[#allocation2 + $0x98] sm:$0xf0]  ;;  %v1188_v12 = vld [vmem:[#allocation2 + $0x10] sm:$0xf]  ;;  %v1376_v13 = vld [vmem:[#allocation2 + $0x14] sm:$0xf0]  ;;  %v1125_v16 = vor.u32 %v1392_v8, %v1124_v7 }
  0x2a   : > { %507 = vmatpush.bf16.msra.mxu0 %v1141_v56  ;;  %v1375_v14 = vld [vmem:[#allocation2 + $0x14] sm:$0xf]  ;;  %v1190_v15 = vld [vmem:[#allocation2 + $0x18] sm:$0xf0]  ;;  %s1372_s25 = sshll.u32 %s1861_s21, 2  ;;  %v1129_v20 = vor.u32 %v1391_v9, %v1126_v11  ;;  %v1189_v21 = vor.u32 %v1376_v13, %v1188_v12 }
  0x2b   : > { %520 = vmatpush.bf16.msra.mxu1 %v1145_v57  ;;  %v1116_v17 = vld [vmem:[#allocation2 + $0x80] sm:$0xf]  ;;  %v1390_v18 = vld [vmem:[#allocation2 + $0x84] sm:$0xf0]  ;;  %v1389_v19 = vld [vmem:[#allocation2 + $0x84] sm:$0xf]  ;;  %v1193_v25 = vor.u32 %v1375_v14, %v1190_v15  ;;  %s1728_s28 = scalar_lea.vmem %s1846_s0, %s1372_s25 }
  0x2c   : > { %613 = vmatpush.bf16.msra.mxu2 %v1205_v58  ;;  %626 = vmatpush.bf16.msra.mxu3 %v1209_v62  ;;  %v1118_v22 = vld [vmem:[#allocation2 + $0x88] sm:$0xf0]  ;;  %v1180_v23 = vld [vmem:[#allocation2] sm:$0xf]  ;;  %v1374_v24 = vld [vmem:[#allocation2 + $0x4] sm:$0xf0]  ;;  %v1117_v32 = vor.u32 %v1390_v18, %v1116_v17 }
  0x2d   : > { %v1373_v26 = vld [vmem:[#allocation2 + $0x4] sm:$0xf]  ;;  %v1182_v27 = vld [vmem:[#allocation2 + $0x8] sm:$0xf0]  ;;  %v1300_v28 = vld [vmem:[#allocation2 + $0x170] sm:$0xf]  ;;  %v1121_v36 = vor.u32 %v1389_v19, %v1118_v22  ;;  %v1181_v37 = vor.u32 %v1374_v24, %v1180_v23 }
  0x2e   : > { %508 = vmatpush.bf16.msra.mxu0 %v1133_v4  ;;  %v1420_v29 = vld [vmem:[#allocation2 + $0x174] sm:$0xf0]  ;;  %v1419_v30 = vld [vmem:[#allocation2 + $0x174] sm:$0xf]  ;;  %v1302_v31 = vld [vmem:[#allocation2 + $0x178] sm:$0xf0]  ;;  %v1185_v40 = vor.u32 %v1373_v26, %v1182_v27 }
  0x2f   : > { %521 = vmatpush.bf16.msra.mxu1 %v1137_v5  ;;  %v1364_v33 = vld [vmem:[%s1849_s3 + $0x70] sm:$0xf]  ;;  %v1436_v34 = vld [vmem:[%s1849_s3 + $0x74] sm:$0xf0]  ;;  %v635_v35 = vld [vmem:[%s1728_s28] sm:$0x3]  ;;  %v1301_v41 = vor.u32 %v1420_v29, %v1300_v28  ;;  %v1305_v42 = vor.u32 %v1419_v30, %v1302_v31 }
  0x30   : > { %614 = vmatpush.bf16.msra.mxu2 %v1197_v6  ;;  %627 = vmatpush.bf16.msra.mxu3 %v1201_v10  ;;  %v1435_v38 = vld [vmem:[%s1849_s3 + $0x74] sm:$0xf]  ;;  %v1366_v39 = vld [vmem:[%s1849_s3 + $0x78] sm:$0xf0]  ;;  %654 = vst [vmem:[#allocation1] ss:$4 sm:$0xff] %v635_v35  ;;  %v1365_v43 = vor.u32 %v1436_v34, %v1364_v33 }
  0x31   : > { %v1292_v44 = vld [vmem:[#allocation2 + $0x160] sm:$0xf]  ;;  %v1418_v45 = vld [vmem:[#allocation2 + $0x164] sm:$0xf0]  ;;  %v1417_v46 = vld [vmem:[#allocation2 + $0x164] sm:$0xf]  ;;  %v1369_v47 = vor.u32 %v1435_v38, %v1366_v39 }
  0x32   : > { %509 = vmatpush.bf16.msra.mxu0 %v1125_v16  ;;  %v1294_v48 = vld [vmem:[#allocation2 + $0x168] sm:$0xf0]  ;;  %v1356_v49 = vld [vmem:[%s1849_s3 + $0x60] sm:$0xf]  ;;  %v1434_v50 = vld [vmem:[%s1849_s3 + $0x64] sm:$0xf0]  ;;  %v1293_v54 = vor.u32 %v1418_v45, %v1292_v44 }
  0x33   : > { %522 = vmatpush.bf16.msra.mxu1 %v1129_v20  ;;  %v1433_v51 = vld [vmem:[%s1849_s3 + $0x64] sm:$0xf]  ;;  %v1358_v52 = vld [vmem:[%s1849_s3 + $0x68] sm:$0xf0]  ;;  %v388_v53 = vld [vmem:[%s1728_s28] sm:$0x1]  ;;  %v1297_v56 = vor.u32 %v1417_v46, %v1294_v48  ;;  %v1357_v57 = vor.u32 %v1434_v50, %v1356_v49 }
  0x34   : > { %615 = vmatpush.bf16.msra.mxu2 %v1189_v21  ;;  %628 = vmatpush.bf16.msra.mxu3 %v1193_v25  ;;  %v405_v55 = vld [vmem:[%s1728_s28 + $0x2] sm:$0x1]  ;;  %v1284_v58 = vld [vmem:[#allocation2 + $0x150] sm:$0xf]  ;;  %v1415_v60 = vld [vmem:[#allocation2 + $0x154] sm:$0xf]  ;;  %v1361_v61 = vor.u32 %v1433_v51, %v1358_v52 }
  0x35   : > { %v1416_v59 = vld [vmem:[#allocation2 + $0x154] sm:$0xf0]  ;;  %v1286_v62 = vld [vmem:[#allocation2 + $0x158] sm:$0xf0]  ;;  %v1348_v63 = vld [vmem:[%s1849_s3 + $0x50] sm:$0xf] }
  0x36   : > { %510 = vmatpush.bf16.msra.mxu0 %v1117_v32  ;;  %v1432_v0 = vld [vmem:[%s1849_s3 + $0x54] sm:$0xf0]  ;;  %v1431_v1 = vld [vmem:[%s1849_s3 + $0x54] sm:$0xf]  ;;  %v1350_v2 = vld [vmem:[%s1849_s3 + $0x58] sm:$0xf0]  ;;  %v1285_v3 = vor.u32 %v1416_v59, %v1284_v58  ;;  %v1289_v4 = vor.u32 %v1415_v60, %v1286_v62 }
  0x37   : > { %523 = vmatpush.bf16.msra.mxu1 %v1121_v36  ;;  %v1349_v5 = vor.u32 %v1432_v0, %v1348_v63  ;;  %v1276_v6 = vld [vmem:[#allocation2 + $0x140] sm:$0xf]  ;;  %v1414_v7 = vld [vmem:[#allocation2 + $0x144] sm:$0xf0]  ;;  %v1413_v8 = vld [vmem:[#allocation2 + $0x144] sm:$0xf]  ;;  %v1353_v9 = vor.u32 %v1431_v1, %v1350_v2 }
  0x38   : > { %616 = vmatpush.bf16.msra.mxu2 %v1181_v37  ;;  %629 = vmatpush.bf16.msra.mxu3 %v1185_v40  ;;  %v1278_v10 = vld [vmem:[#allocation2 + $0x148] sm:$0xf0]  ;;  %v1340_v11 = vld [vmem:[%s1849_s3 + $0x40] sm:$0xf]  ;;  %v1430_v12 = vld [vmem:[%s1849_s3 + $0x44] sm:$0xf0]  ;;  %v1277_v15 = vor.u32 %v1414_v7, %v1276_v6 }
  0x39   : > { %511 = vmatmul.bf16.vlgmr.msra.gmra.mxu0 %v405_v55  ;;  %v1429_v13 = vld [vmem:[%s1849_s3 + $0x44] sm:$0xf]  ;;  %v1342_v14 = vld [vmem:[%s1849_s3 + $0x48] sm:$0xf0]  ;;  %v1281_v16 = vor.u32 %v1413_v8, %v1278_v10  ;;  %v1341_v17 = vor.u32 %v1430_v12, %v1340_v11  ;;  %v1268_v18 = vld [vmem:[#allocation2 + $0x130] sm:$0xf] }
  0x3a   : > { %743 = vmatpush.bf16.msrb.mxu0 %v1301_v41  ;;  %524 = vmatmul.bf16.vlgmr.msra.gmra.mxu1 %v405_v55  ;;  %v1412_v19 = vld [vmem:[#allocation2 + $0x134] sm:$0xf0]  ;;  %v1411_v20 = vld [vmem:[#allocation2 + $0x134] sm:$0xf]  ;;  %v1345_v21 = vor.u32 %v1429_v13, %v1342_v14  ;;  %v1270_v22 = vld [vmem:[#allocation2 + $0x138] sm:$0xf0] }
  0x3b   : > { %756 = vmatpush.bf16.msrb.mxu1 %v1305_v42  ;;  %617 = vmatmul.bf16.vlgmr.msra.gmra.mxu2 %v388_v53  ;;  %v1332_v23 = vld [vmem:[%s1849_s3 + $0x30] sm:$0xf]  ;;  %v1428_v24 = vld [vmem:[%s1849_s3 + $0x34] sm:$0xf0]  ;;  %v1427_v25 = vld [vmem:[%s1849_s3 + $0x34] sm:$0xf]  ;;  %v1269_v27 = vor.u32 %v1412_v19, %v1268_v18  ;;  %v1273_v28 = vor.u32 %v1411_v20, %v1270_v22 }
  0x3c   : > { %893 = vmatpush.bf16.msrb.mxu2 %v1365_v43  ;;  %906 = vmatpush.bf16.msrb.mxu3 %v1369_v47  ;;  %v1334_v26 = vld [vmem:[%s1849_s3 + $0x38] sm:$0xf0]  ;;  %v1333_v29 = vor.u32 %v1428_v24, %v1332_v23  ;;  %v1260_v30 = vld [vmem:[#allocation2 + $0x120] sm:$0xf]  ;;  %v1410_v31 = vld [vmem:[#allocation2 + $0x124] sm:$0xf0] }
  0x3d   : > { %630 = vmatmul.bf16.vlgmr.msra.gmra.mxu3 %v388_v53  ;;  %v1409_v32 = vld [vmem:[#allocation2 + $0x124] sm:$0xf]  ;;  %v1337_v33 = vor.u32 %v1427_v25, %v1334_v26  ;;  %v1262_v34 = vld [vmem:[#allocation2 + $0x128] sm:$0xf0]  ;;  %v1324_v35 = vld [vmem:[%s1849_s3 + $0x20] sm:$0xf]  ;;  %v1261_v39 = vor.u32 %v1410_v31, %v1260_v30 }
  0x3e   : > { %744 = vmatpush.bf16.msrb.mxu0 %v1293_v54  ;;  %v1426_v36 = vld [vmem:[%s1849_s3 + $0x24] sm:$0xf0]  ;;  %v1425_v37 = vld [vmem:[%s1849_s3 + $0x24] sm:$0xf]  ;;  %v1326_v38 = vld [vmem:[%s1849_s3 + $0x28] sm:$0xf0]  ;;  %v1265_v41 = vor.u32 %v1409_v32, %v1262_v34 }
  0x3f   : > { %757 = vmatpush.bf16.msrb.mxu1 %v1297_v56  ;;  %v655_v40 = vld.sshfl [vmem:[#allocation1] sm:$0xff pattern:$0x73625140]  ;;  %v1325_v42 = vor.u32 %v1426_v36, %v1324_v35  ;;  %v1252_v43 = vld [vmem:[#allocation2 + $0x110] sm:$0xf]  ;;  %v1329_v46 = vor.u32 %v1425_v37, %v1326_v38 }
  0x40   : > { %894 = vmatpush.bf16.msrb.mxu2 %v1357_v57  ;;  %907 = vmatpush.bf16.msrb.mxu3 %v1361_v61  ;;  %v1408_v44 = vld [vmem:[#allocation2 + $0x114] sm:$0xf0]  ;;  %v1407_v45 = vld [vmem:[#allocation2 + $0x114] sm:$0xf]  ;;  %v1254_v47 = vld [vmem:[#allocation2 + $0x118] sm:$0xf0] }
  0x41   : > { %v1316_v48 = vld [vmem:[%s1849_s3 + $0x10] sm:$0xf]  ;;  %v1424_v49 = vld [vmem:[%s1849_s3 + $0x14] sm:$0xf0]  ;;  %v1423_v50 = vld [vmem:[%s1849_s3 + $0x14] sm:$0xf]  ;;  %v1253_v53 = vor.u32 %v1408_v44, %v1252_v43  ;;  %v1257_v54 = vor.u32 %v1407_v45, %v1254_v47 }
  0x42   : > { %745 = vmatpush.bf16.msrb.mxu0 %v1285_v3  ;;  %v1318_v51 = vld [vmem:[%s1849_s3 + $0x18] sm:$0xf0]  ;;  %v658_v52 = vshll.u32 %v655_v40, 16  ;;  %v1317_v55 = vor.u32 %v1424_v49, %v1316_v48  ;;  %v1244_v56 = vld [vmem:[#allocation2 + $0x100] sm:$0xf]  ;;  %v656_v1 = vshrl.u32 %v655_v40, 16 }
  0x43   : > { %758 = vmatpush.bf16.msrb.mxu1 %v1289_v4  ;;  %v1406_v57 = vld [vmem:[#allocation2 + $0x104] sm:$0xf0]  ;;  %v1405_v58 = vld [vmem:[#allocation2 + $0x104] sm:$0xf]  ;;  %v1321_v59 = vor.u32 %v1423_v50, %v1318_v51  ;;  %v1246_v60 = vld [vmem:[#allocation2 + $0x108] sm:$0xf0] }
  0x44   : > { %895 = vmatpush.bf16.msrb.mxu2 %v1349_v5  ;;  %908 = vmatpush.bf16.msrb.mxu3 %v1353_v9  ;;  %v1308_v61 = vld [vmem:[%s1849_s3] sm:$0xf]  ;;  %v1422_v62 = vld [vmem:[%s1849_s3 + $0x4] sm:$0xf0]  ;;  %v1421_v63 = vld [vmem:[%s1849_s3 + $0x4] sm:$0xf]  ;;  %v1245_v3 = vor.u32 %v1406_v57, %v1244_v56  ;;  %v1249_v4 = vor.u32 %v1405_v58, %v1246_v60 }
  0x45   : > { %v1310_v0 = vld [vmem:[%s1849_s3 + $0x8] sm:$0xf0]  ;;  %v660_v2 = vrot.slane %v658_v52, 1  ;;  %v1309_v5 = vor.u32 %v1422_v62, %v1308_v61  ;;  %v790_v8 = vld [vmem:[%s1728_s28 + $0x2] sm:$0x1]  ;;  %s1112_s28 = sshll.u32 %s1861_s21, 1 }
  0x46   : > { %746 = vmatpush.bf16.msrb.mxu0 %v1277_v15  ;;  %v1313_v6 = vor.u32 %v1421_v63, %v1310_v0  ;;  %v807_v25 = vld [vmem:[#allocation6] sm:$0x3]  ;;  %s377_s15 = scalar_lea.vmem %s1851_s5, %s1112_s28  ;;  %s386_s18 = scalar_lea.vmem %s1852_s6, %s1112_s28 }
  0x47   : > { %759 = vmatpush.bf16.msrb.mxu1 %v1281_v16  ;;  %v661_v7 = vor.u32 %v660_v2, %v656_v1  ;;  %v810_v31 = vperm.slane %v807_v25, 1 }
  0x48   : > { %896 = vmatpush.bf16.msrb.mxu2 %v1341_v17  ;;  %909 = vmatpush.bf16.msrb.mxu3 %v1345_v21  ;;  %v771_v17 = vld [vmem:[#allocation4] sm:$0x3] }
  0x49   : > { %v773_v19 = vperm.slane %v771_v17, 0  ;;  %v774_v22 = vperm.slane %v771_v17, 1 }
  0x4a   : > { %747 = vmatpush.bf16.msrb.mxu0 %v1269_v27 }
  0x4b   : > { %760 = vmatpush.bf16.msrb.mxu1 %v1273_v28 }
  0x4c   : > { %897 = vmatpush.bf16.msrb.mxu2 %v1333_v29  ;;  %910 = vmatpush.bf16.msrb.mxu3 %v1337_v33  ;;  %v809_v29 = vperm.slane %v807_v25, 0 }
  0x4e   : > { %748 = vmatpush.bf16.msrb.mxu0 %v1261_v39 }
  0x4f   : > { %761 = vmatpush.bf16.msrb.mxu1 %v1265_v41 }
  0x50   : > { %898 = vmatpush.bf16.msrb.mxu2 %v1325_v42  ;;  %911 = vmatpush.bf16.msrb.mxu3 %v1329_v46 }
  0x52   : > { %749 = vmatpush.bf16.msrb.mxu0 %v1253_v53 }
  0x53   : > { %762 = vmatpush.bf16.msrb.mxu1 %v1257_v54 }
  0x54   : > { %899 = vmatpush.bf16.msrb.mxu2 %v1317_v55  ;;  %912 = vmatpush.bf16.msrb.mxu3 %v1321_v59 }
  0x56   : > { %750 = vmatpush.bf16.msrb.mxu0 %v1245_v3 }
  0x57   : > { %763 = vmatpush.bf16.msrb.mxu1 %v1249_v4 }
  0x58   : > { %900 = vmatpush.bf16.msrb.mxu2 %v1309_v5  ;;  %913 = vmatpush.bf16.msrb.mxu3 %v1313_v6 }
  0x59   : > { %751 = vmatmul.bf16.vlgmr.msrb.gmra.mxu0 %v661_v7 }
  0x5a   : > { %764 = vmatmul.bf16.vlgmr.msrb.gmra.mxu1 %v661_v7 }
  0x5b   : > { %901 = vmatmul.bf16.vlgmr.msrb.gmra.mxu2 %v790_v8  ;;  %914 = vmatmul.bf16.vlgmr.msrb.gmra.mxu3 %v790_v8 }
  0xb6   : > { %v512_v9 = vpop.f32.mrf.mxu0 }
  0xb7   : > { %v525_v10 = vpop.f32.mrf.mxu1 }
  0xbe   : > { %v618_v11 = vpop.f32.mrf.mxu2  ;;  %v514_v13 = vpop.f32.mrf.mxu0 }
  0xbf   : > { %v527_v14 = vpop.f32.mrf.mxu1  ;;  %v619_v18 = vadd.f32 %v618_v11, %v512_v9 }
  0xc0   : > { %v631_v12 = vpop.f32.mrf.mxu3 }
  0xc1   : > { %v632_v20 = vadd.f32 %v631_v12, %v525_v10 }
  0xc6   : > { %v620_v15 = vpop.f32.mrf.mxu2 }
  0xc8   : > { %v633_v16 = vpop.f32.mrf.mxu3 }
  0xd6   : > { %v752_v21 = vpop.f32.mrf.mxu0 }
  0xd7   : > { %v769_v23 = vadd.f32 %v752_v21, %v619_v18  ;;  %v765_v24 = vpop.f32.mrf.mxu1 }
  0xd8   : > { %v770_v26 = vadd.f32 %v765_v24, %v632_v20 }
  0xd9   : > { %v777_v27 = vadd.f32 %v773_v19, %v769_v23 }
  0xda   : > { %v778_v28 = vadd.f32 %v774_v22, %v770_v26 }
  0xdb   : > { %v779_v30 = vmax.f32 %v777_v27, 0.0 }
  0xdc   : > { %v780_v32 = vmax.f32 %v778_v28, 0.0 }
  0xde   : > { %v902_v33 = vpop.f32.mrf.mxu2  ;;  %v781_v34 = vpack.c.bf16 %v780_v32, %v779_v30  ;;  %v915_v36 = vpop.f32.mrf.mxu3 }
  0xdf   : > { %v903_v35 = vadd.f32 %v902_v33, %v809_v29  ;;  %v754_v37 = vpop.f32.mrf.mxu0  ;;  %v916_v38 = vadd.f32 %v915_v36, %v810_v31  ;;  %v767_v39 = vpop.f32.mrf.mxu1 }
  0xe0   : > { %v783_v40 = vrot.slane %v781_v34, 3 }
  0xe1   : > { %v919_v41 = vpack.c.bf16 %v916_v38, %v903_v35 }
  0xe2   : > { %v787_v42 = vsel %vm784_vm0, %v781_v34, %v783_v40 }
  0xe3   : > { %789 = vst [vmem:[%s377_s15] sm:$0x3] %v787_v42  ;;  %v921_v43 = vrot.slane %v919_v41, 3 }
  0xe5   : > { %v924_v44 = vsel %vm784_vm0, %v919_v41, %v921_v43 }
  0xe6   : > { %v904_v45 = vpop.f32.mrf.mxu2  ;;  %926 = vst [vmem:[%s386_s18] sm:$0x3] %v924_v44  ;;  %v917_v46 = vpop.f32.mrf.mxu3 }
  0xe7 PF: > { %s19_s23 = sadd.s32 1, %s1614_s23   ;;  %s1856_s21 = smov %s1610_s22 }
  0xe8   : > { %p16_p8 = scmp.ge.s32.totalorder %s19_s23, 4   ;;  %s1857_s22 = smov %s1859_s9 }
  0xea   :  { %18 = sbr.rel (!%p16_p8) target bundleno = 3 (0x3), region = 103 }
  0xef   :  { %978 = vsyncpa [#allocation3], 1 }
  0xf0   :  { %980 = vsyncpa [#allocation3 + $0x1], 1 }
  0xf1   :  { %981 = vsyncpa [#allocation5], 1 }

// kernel: _lambda_.18
= control target key start
LH: loop header
LB: loop body
LE: loop exit
PB: predicated region body
PF: predicated region fallthrough
CT: control target
= control target key end

     0   :  { %9 = vsyncpa [#allocation3], 0  ;;  %s1983_s0 = inlined_call_operand.vmem [shape: bf16[2,4,256], index: 0, kind: input, shape index: {}]   ;;  %s1984_s1 = inlined_call_operand.hbm [shape: bf16[3,256,256], index: 1, kind: input, shape index: {}]   ;;  %s1985_s2 = inlined_call_operand.hbm [shape: f32[1,256], index: 2, kind: input, shape index: {}]   ;;  %s1986_s3 = inlined_call_operand.vmem [shape: bf16[2,2,256], index: 3, kind: input, shape index: {}]   ;;  %s1987_s4 = inlined_call_operand.vmem [shape: bf16[2,2,256], index: 4, kind: output, shape index: {}]  }
   0x1   :  { %10 = vsyncpa [#allocation5], 0  ;;  %s1883_s15 = smov 0   ;;  %s1885_s16 = smov 0  }
   0x2   :  { %s1887_s17 = smov 0  }
   0x3 LB: > { %s1219_s18 = sadd.s32 4294967295, %s1852_s17   ;;  %s28_s19 = sadd.s32 1, %s1848_s16  ;;  %s1852_s17 = sphi %s1887_s17, %s16_s17   ;;  %s1848_s16 = sphi %s1885_s16, %s1991_s16   ;;  %s1844_s15 = sphi %s1883_s15, %s1990_s15  }
   0x4   : > { %p30_p0 = scmp.ge.s32.totalorder %s28_s19, 2  ;;  %p1221_p1 = scmp.ge.s32.totalorder %s1852_s17, 1 }
   0x5   : > { %p167_p2 = scmp.lt.s32.totalorder %s1852_s17, 3  ;;  %p1908_p4 = scmp.eq.s32.totalorder %s1219_s18, 0 }
   0x6   : > { %s1993_s19 = smov (%p30_p0, %s28_s19), 0  ;;  %s181_s24 = sshll.u32 %s1984_s1, 4  ;;  %s182_s24 = int_to_ptr.hbm [resolvable:$true] %s181_s24 }
   0x7   : > { %p1904_p3 = pnand %p1221_p1, %p167_p2  ;;  %s1854_s25 = smov [#allocation2]  }
   0x8   : > { %s183_s26 = sshll.u32 %s1854_s25, 4  ;;  %s198_s29 = sshll.u32 %s1985_s2, 4  ;;  %s184_s26 = int_to_ptr.vmem [resolvable:$true] %s183_s26  ;;  %s199_s29 = int_to_ptr.hbm [resolvable:$true] %s198_s29 }
   0x9   : > { %p1723_p5 = pneg %p1904_p3  ;;  %s1855_s30 = smov 128  }
   0xa   : > { %s1856_s5 = smov 8   ;;  %s1857_s6 = smov [#allocation4]  }
   0xb   : > { %p1724_p6 = pnand %p1908_p4, %p1723_p5  ;;  %s200_s7 = sshll.u32 %s1857_s6, 4  ;;  %s201_s7 = int_to_ptr.vmem [resolvable:$true] %s200_s7 }
   0xc   : > { %233 = sbr.rel (%p1904_p3) target bundleno = 269 (0x10d), region = 36 }
   0xd   : > { %1726 = dma.hbm_to_vmem [thread:$0]  (!%p1724_p6), %s182_s24, 12288, %s184_s26, [#allocation3], %s1855_s30, %s1855_s30, %s1856_s5  }
   0xe   : > { %1729 = dma.hbm_to_vmem [thread:$0]  (!%p1724_p6), %s199_s29, 32, %s201_s7, [#allocation5]  }
  0x11   : > { %1835 = dma.done.wait (%p1908_p4), [#allocation3], 12288  }
  0x12   : > { %1837 = vsyncadd (%p1908_p4), [#allocation3], 4294955008 }
  0x13   : > { %1839 = dma.done.wait (%p1908_p4), [#allocation5], 32  }
  0x14   : > { %1841 = vsyncadd (%p1908_p4), [#allocation5], 4294967264  ;;  %v1290_v0 = vld [vmem:[#allocation2 + $0x170] sm:$0xf]  ;;  %v1666_v1 = vld [vmem:[#allocation2 + $0x174] sm:$0xf0] }
  0x15   : > { %v1354_v2 = vld [vmem:[#allocation2 + $0x1f0] sm:$0xf]  ;;  %v1291_v3 = vor.u32 %v1666_v1, %v1290_v0  ;;  %v1682_v4 = vld [vmem:[#allocation2 + $0x1f4] sm:$0xf0]  ;;  %v1665_v5 = vld [vmem:[#allocation2 + $0x174] sm:$0xf] }
  0x16   : > { %v1292_v6 = vld [vmem:[#allocation2 + $0x178] sm:$0xf0]  ;;  %v1355_v7 = vor.u32 %v1682_v4, %v1354_v2  ;;  %v1681_v9 = vld [vmem:[#allocation2 + $0x1f4] sm:$0xf]  ;;  %v1282_v11 = vld [vmem:[#allocation2 + $0x160] sm:$0xf] }
  0x17   : > { %v1295_v8 = vor.u32 %v1665_v5, %v1292_v6  ;;  %v1356_v10 = vld [vmem:[#allocation2 + $0x1f8] sm:$0xf0]  ;;  %546 = vmatpush.bf16.msra.mxu0 %v1291_v3  ;;  %v1664_v13 = vld [vmem:[#allocation2 + $0x164] sm:$0xf0]  ;;  %v1346_v14 = vld [vmem:[#allocation2 + $0x1e0] sm:$0xf] }
  0x18   : > { %v1359_v12 = vor.u32 %v1681_v9, %v1356_v10  ;;  %v1680_v15 = vld [vmem:[#allocation2 + $0x1e4] sm:$0xf0]  ;;  %559 = vmatpush.bf16.msra.mxu1 %v1355_v7  ;;  %v1283_v16 = vor.u32 %v1664_v13, %v1282_v11  ;;  %v1663_v18 = vld [vmem:[#allocation2 + $0x164] sm:$0xf]  ;;  %v1284_v19 = vld [vmem:[#allocation2 + $0x168] sm:$0xf0] }
  0x19   : > { %572 = vmatpush.bf16.msra.mxu2 %v1295_v8  ;;  %v1347_v17 = vor.u32 %v1680_v15, %v1346_v14  ;;  %v1679_v20 = vld [vmem:[#allocation2 + $0x1e4] sm:$0xf]  ;;  %v1287_v21 = vor.u32 %v1663_v18, %v1284_v19  ;;  %v1348_v22 = vld [vmem:[#allocation2 + $0x1e8] sm:$0xf0]  ;;  %v1274_v23 = vld [vmem:[#allocation2 + $0x150] sm:$0xf] }
  0x1a   : > { %585 = vmatpush.bf16.msra.mxu3 %v1359_v12  ;;  %v1662_v24 = vld [vmem:[#allocation2 + $0x154] sm:$0xf0]  ;;  %v1351_v25 = vor.u32 %v1679_v20, %v1348_v22  ;;  %v1338_v26 = vld [vmem:[#allocation2 + $0x1d0] sm:$0xf]  ;;  %v1661_v28 = vld [vmem:[#allocation2 + $0x154] sm:$0xf] }
  0x1b   : > { %v1678_v27 = vld [vmem:[#allocation2 + $0x1d4] sm:$0xf0]  ;;  %547 = vmatpush.bf16.msra.mxu0 %v1283_v16  ;;  %v1275_v29 = vor.u32 %v1662_v24, %v1274_v23  ;;  %v1276_v30 = vld [vmem:[#allocation2 + $0x158] sm:$0xf0]  ;;  %v1677_v31 = vld [vmem:[#allocation2 + $0x1d4] sm:$0xf] }
  0x1c   : > { %v1340_v32 = vld [vmem:[#allocation2 + $0x1d8] sm:$0xf0]  ;;  %560 = vmatpush.bf16.msra.mxu1 %v1347_v17  ;;  %v1339_v33 = vor.u32 %v1678_v27, %v1338_v26  ;;  %v1279_v34 = vor.u32 %v1661_v28, %v1276_v30  ;;  %v1266_v35 = vld [vmem:[#allocation2 + $0x140] sm:$0xf]  ;;  %v1660_v36 = vld [vmem:[#allocation2 + $0x144] sm:$0xf0] }
  0x1d   : > { %573 = vmatpush.bf16.msra.mxu2 %v1287_v21  ;;  %v1330_v37 = vld [vmem:[#allocation2 + $0x1c0] sm:$0xf]  ;;  %v1343_v38 = vor.u32 %v1677_v31, %v1340_v32  ;;  %v1676_v39 = vld [vmem:[#allocation2 + $0x1c4] sm:$0xf0]  ;;  %v1659_v40 = vld [vmem:[#allocation2 + $0x144] sm:$0xf]  ;;  %v1267_v44 = vor.u32 %v1660_v36, %v1266_v35 }
  0x1e   : > { %586 = vmatpush.bf16.msra.mxu3 %v1351_v25  ;;  %v1268_v41 = vld [vmem:[#allocation2 + $0x148] sm:$0xf0]  ;;  %v1675_v42 = vld [vmem:[#allocation2 + $0x1c4] sm:$0xf]  ;;  %v1331_v45 = vor.u32 %v1676_v39, %v1330_v37  ;;  %v1258_v47 = vld [vmem:[#allocation2 + $0x130] sm:$0xf] }
  0x1f   : > { %v1332_v43 = vld [vmem:[#allocation2 + $0x1c8] sm:$0xf0]  ;;  %548 = vmatpush.bf16.msra.mxu0 %v1275_v29  ;;  %v1271_v46 = vor.u32 %v1659_v40, %v1268_v41  ;;  %v1658_v48 = vld [vmem:[#allocation2 + $0x134] sm:$0xf0]  ;;  %v1322_v49 = vld [vmem:[#allocation2 + $0x1b0] sm:$0xf] }
  0x20   : > { %561 = vmatpush.bf16.msra.mxu1 %v1339_v33  ;;  %v1335_v50 = vor.u32 %v1675_v42, %v1332_v43  ;;  %v1674_v51 = vld [vmem:[#allocation2 + $0x1b4] sm:$0xf0]  ;;  %v1657_v52 = vld [vmem:[#allocation2 + $0x134] sm:$0xf]  ;;  %v1260_v53 = vld [vmem:[#allocation2 + $0x138] sm:$0xf0]  ;;  %v1259_v56 = vor.u32 %v1658_v48, %v1258_v47 }
  0x21   : > { %574 = vmatpush.bf16.msra.mxu2 %v1279_v34  ;;  %v1673_v54 = vld [vmem:[#allocation2 + $0x1b4] sm:$0xf]  ;;  %v1324_v55 = vld [vmem:[#allocation2 + $0x1b8] sm:$0xf0]  ;;  %p276_p7 = scmp.lt.s32.totalorder %s1844_s15, 1  ;;  %v1323_v57 = vor.u32 %v1674_v51, %v1322_v49  ;;  %v1263_v58 = vor.u32 %v1657_v52, %v1260_v53  ;;  %vm1097_vm0 = vcmask 1040384  }
  0x22   : > { %587 = vmatpush.bf16.msra.mxu3 %v1343_v38  ;;  %v1250_v59 = vld [vmem:[#allocation2 + $0x120] sm:$0xf]  ;;  %v1656_v60 = vld [vmem:[#allocation2 + $0x124] sm:$0xf0]  ;;  %v1327_v62 = vor.u32 %v1673_v54, %v1324_v55  ;;  %v1655_v0 = vld [vmem:[#allocation2 + $0x124] sm:$0xf] }
  0x23   : > { %549 = vmatpush.bf16.msra.mxu0 %v1267_v44  ;;  %v1314_v61 = vld [vmem:[#allocation2 + $0x1a0] sm:$0xf]  ;;  %v1672_v63 = vld [vmem:[#allocation2 + $0x1a4] sm:$0xf0]  ;;  %v1252_v1 = vld [vmem:[#allocation2 + $0x128] sm:$0xf0]  ;;  %v1251_v4 = vor.u32 %v1656_v60, %v1250_v59 }
  0x24   : > { %562 = vmatpush.bf16.msra.mxu1 %v1331_v45  ;;  %v1671_v2 = vld [vmem:[#allocation2 + $0x1a4] sm:$0xf]  ;;  %v1316_v3 = vld [vmem:[#allocation2 + $0x1a8] sm:$0xf0]  ;;  %s1995_s15 = smov (!%p276_p7, %s1844_s15), 1  ;;  %v1315_v5 = vor.u32 %v1672_v63, %v1314_v61  ;;  %v1255_v6 = vor.u32 %v1655_v0, %v1252_v1 }
  0x25   : > { %575 = vmatpush.bf16.msra.mxu2 %v1271_v46  ;;  %v1242_v7 = vld [vmem:[#allocation2 + $0x110] sm:$0xf]  ;;  %v1654_v8 = vld [vmem:[#allocation2 + $0x114] sm:$0xf0]  ;;  %v1319_v10 = vor.u32 %v1671_v2, %v1316_v3  ;;  %v1653_v12 = vld [vmem:[#allocation2 + $0x114] sm:$0xf] }
  0x26   : > { %588 = vmatpush.bf16.msra.mxu3 %v1335_v50  ;;  %v1306_v9 = vld [vmem:[#allocation2 + $0x190] sm:$0xf]  ;;  %v1670_v11 = vld [vmem:[#allocation2 + $0x194] sm:$0xf0]  ;;  %v1244_v13 = vld [vmem:[#allocation2 + $0x118] sm:$0xf0]  ;;  %v1243_v16 = vor.u32 %v1654_v8, %v1242_v7 }
  0x27   : > { %550 = vmatpush.bf16.msra.mxu0 %v1259_v56  ;;  %v1669_v14 = vld [vmem:[#allocation2 + $0x194] sm:$0xf]  ;;  %v1308_v15 = vld [vmem:[#allocation2 + $0x198] sm:$0xf0]  ;;  %v1234_v17 = vld [vmem:[#allocation2 + $0x100] sm:$0xf]  ;;  %v1307_v19 = vor.u32 %v1670_v11, %v1306_v9  ;;  %v1247_v20 = vor.u32 %v1653_v12, %v1244_v13 }
  0x28   : > { %563 = vmatpush.bf16.msra.mxu1 %v1323_v57  ;;  %v1652_v18 = vld [vmem:[#allocation2 + $0x104] sm:$0xf0]  ;;  %s1618_s8 = sshll.u32 %s1995_s15, 2  ;;  %v1298_v21 = vld [vmem:[#allocation2 + $0x180] sm:$0xf]  ;;  %v1311_v24 = vor.u32 %v1669_v14, %v1308_v15  ;;  %s1230_s12 = sshll.u32 %s1995_s15, 1 }
  0x29   : > { %576 = vmatpush.bf16.msra.mxu2 %v1263_v58  ;;  %v1668_v22 = vld [vmem:[#allocation2 + $0x184] sm:$0xf0]  ;;  %v1651_v23 = vld [vmem:[#allocation2 + $0x104] sm:$0xf]  ;;  %v1236_v25 = vld [vmem:[#allocation2 + $0x108] sm:$0xf0]  ;;  %v1235_v31 = vor.u32 %v1652_v18, %v1234_v17  ;;  %s1944_s11 = scalar_lea.vmem %s1983_s0, %s1618_s8  ;;  %s290_s18 = scalar_lea.vmem %s1986_s3, %s1230_s12 }
  0x2a   : > { %589 = vmatpush.bf16.msra.mxu3 %v1327_v62  ;;  %v1667_v26 = vld [vmem:[#allocation2 + $0x184] sm:$0xf]  ;;  %v1300_v27 = vld [vmem:[#allocation2 + $0x188] sm:$0xf0]  ;;  %v1418_v28 = vld [vmem:[#allocation2 + $0x70] sm:$0xf]  ;;  %v1299_v35 = vor.u32 %v1668_v22, %v1298_v21  ;;  %v1239_v36 = vor.u32 %v1651_v23, %v1236_v25  ;;  %s299_s22 = scalar_lea.vmem %s1987_s4, %s1230_s12 }
  0x2b   : > { %551 = vmatpush.bf16.msra.mxu0 %v1251_v4  ;;  %v1634_v29 = vld [vmem:[#allocation2 + $0x74] sm:$0xf0]  ;;  %v1482_v30 = vld [vmem:[#allocation2 + $0xf0] sm:$0xf]  ;;  %v1633_v33 = vld [vmem:[#allocation2 + $0x74] sm:$0xf]  ;;  %v1303_v39 = vor.u32 %v1667_v26, %v1300_v27 }
  0x2c   : > { %564 = vmatpush.bf16.msra.mxu1 %v1315_v5  ;;  %v1650_v32 = vld [vmem:[#allocation2 + $0xf4] sm:$0xf0]  ;;  %v1420_v34 = vld [vmem:[#allocation2 + $0x78] sm:$0xf0]  ;;  %v1649_v37 = vld [vmem:[#allocation2 + $0xf4] sm:$0xf]  ;;  %v1419_v40 = vor.u32 %v1634_v29, %v1418_v28 }
  0x2d   : > { %577 = vmatpush.bf16.msra.mxu2 %v1255_v6  ;;  %v1484_v38 = vld [vmem:[#allocation2 + $0xf8] sm:$0xf0]  ;;  %v1483_v41 = vor.u32 %v1650_v32, %v1482_v30  ;;  %v1423_v42 = vor.u32 %v1633_v33, %v1420_v34  ;;  %v1410_v43 = vld [vmem:[#allocation2 + $0x60] sm:$0xf]  ;;  %v1632_v44 = vld [vmem:[#allocation2 + $0x64] sm:$0xf0] }
  0x2e   : > { %590 = vmatpush.bf16.msra.mxu3 %v1319_v10  ;;  %v1474_v45 = vld [vmem:[#allocation2 + $0xe0] sm:$0xf]  ;;  %v1487_v46 = vor.u32 %v1649_v37, %v1484_v38  ;;  %v1648_v47 = vld [vmem:[#allocation2 + $0xe4] sm:$0xf0]  ;;  %v1631_v48 = vld [vmem:[#allocation2 + $0x64] sm:$0xf]  ;;  %v1411_v53 = vor.u32 %v1632_v44, %v1410_v43 }
  0x2f   : > { %552 = vmatpush.bf16.msra.mxu0 %v1243_v16  ;;  %v1412_v49 = vld [vmem:[#allocation2 + $0x68] sm:$0xf0]  ;;  %v1647_v50 = vld [vmem:[#allocation2 + $0xe4] sm:$0xf]  ;;  %v334_v52 = vld [vmem:[%s1944_s11] sm:$0xf]  ;;  %v1475_v54 = vor.u32 %v1648_v47, %v1474_v45 }
  0x30   : > { %565 = vmatpush.bf16.msra.mxu1 %v1307_v19  ;;  %v1476_v51 = vld [vmem:[#allocation2 + $0xe8] sm:$0xf0]  ;;  %369 = vst [vmem:[#allocation1] ss:$4 sm:$0xff] %v334_v52  ;;  %v1415_v55 = vor.u32 %v1631_v48, %v1412_v49  ;;  %v1402_v56 = vld [vmem:[#allocation2 + $0x50] sm:$0xf] }
  0x31   : > { %578 = vmatpush.bf16.msra.mxu2 %v1247_v20  ;;  %v1630_v57 = vld [vmem:[#allocation2 + $0x54] sm:$0xf0]  ;;  %v1466_v58 = vld [vmem:[#allocation2 + $0xd0] sm:$0xf]  ;;  %v1479_v59 = vor.u32 %v1647_v50, %v1476_v51  ;;  %v1629_v61 = vld [vmem:[#allocation2 + $0x54] sm:$0xf] }
  0x32   : > { %591 = vmatpush.bf16.msra.mxu3 %v1311_v24  ;;  %v1646_v60 = vld [vmem:[#allocation2 + $0xd4] sm:$0xf0]  ;;  %v1404_v62 = vld [vmem:[#allocation2 + $0x58] sm:$0xf0]  ;;  %v1645_v63 = vld [vmem:[#allocation2 + $0xd4] sm:$0xf]  ;;  %v1403_v1 = vor.u32 %v1630_v57, %v1402_v56 }
  0x33   : > { %553 = vmatpush.bf16.msra.mxu0 %v1235_v31  ;;  %v1468_v0 = vld [vmem:[#allocation2 + $0xd8] sm:$0xf0]  ;;  %v1394_v2 = vld [vmem:[#allocation2 + $0x40] sm:$0xf]  ;;  %v1628_v3 = vld [vmem:[#allocation2 + $0x44] sm:$0xf0]  ;;  %v1467_v5 = vor.u32 %v1646_v60, %v1466_v58  ;;  %v1407_v6 = vor.u32 %v1629_v61, %v1404_v62 }
  0x34   : > { %566 = vmatpush.bf16.msra.mxu1 %v1299_v35  ;;  %v1458_v4 = vld [vmem:[#allocation2 + $0xc0] sm:$0xf]  ;;  %v1644_v7 = vld [vmem:[#allocation2 + $0xc4] sm:$0xf0]  ;;  %v1627_v8 = vld [vmem:[#allocation2 + $0x44] sm:$0xf]  ;;  %v1471_v10 = vor.u32 %v1645_v63, %v1468_v0  ;;  %v1395_v14 = vor.u32 %v1628_v3, %v1394_v2 }
  0x35   : > { %579 = vmatpush.bf16.msra.mxu2 %v1239_v36  ;;  %v301_v9 = vld [vmem:[%s1944_s11] sm:$0x5]  ;;  %v1396_v11 = vld [vmem:[#allocation2 + $0x48] sm:$0xf0]  ;;  %v1643_v12 = vld [vmem:[#allocation2 + $0xc4] sm:$0xf]  ;;  %v1459_v22 = vor.u32 %v1644_v7, %v1458_v4 }
  0x36   : > { %592 = vmatpush.bf16.msra.mxu3 %v1303_v39  ;;  %v1460_v13 = vld [vmem:[#allocation2 + $0xc8] sm:$0xf0]  ;;  %v1386_v16 = vld [vmem:[#allocation2 + $0x30] sm:$0xf]  ;;  %v1399_v23 = vor.u32 %v1627_v8, %v1396_v11  ;;  %v1626_v24 = vld [vmem:[#allocation2 + $0x34] sm:$0xf0] }
  0x37   : > { %764 = vmatpush.bf16.msrb.mxu0 %v1419_v40  ;;  %v370_v15 = vld.sshfl [vmem:[#allocation1] sm:$0xff pattern:$0x73625140]  ;;  %v371_v17 = vld.sshfl [vmem:[#allocation1 + $0x8] sm:$0xff pattern:$0x73625140]  ;;  %v1463_v27 = vor.u32 %v1643_v12, %v1460_v13  ;;  %v1387_v35 = vor.u32 %v1626_v24, %v1386_v16 }
  0x38   : > { %777 = vmatpush.bf16.msrb.mxu1 %v1483_v41  ;;  %v372_v18 = vshrl.u32 %v370_v15, 16  ;;  %v374_v19 = vshll.u32 %v370_v15, 16  ;;  %v378_v20 = vshrl.u32 %v371_v17, 16  ;;  %v380_v21 = vshll.u32 %v371_v17, 16  ;;  %599 = vst [vmem:[#allocation1] ss:$4 sm:$0xff] %v301_v9 }
  0x39   : > { %790 = vmatpush.bf16.msrb.mxu2 %v1423_v42  ;;  %v1450_v25 = vld [vmem:[#allocation2 + $0xb0] sm:$0xf]  ;;  %v1642_v26 = vld [vmem:[#allocation2 + $0xb4] sm:$0xf0]  ;;  %v1625_v29 = vld [vmem:[#allocation2 + $0x34] sm:$0xf] }
  0x3a   : > { %803 = vmatpush.bf16.msrb.mxu3 %v1487_v46  ;;  %v376_v28 = vrot.slane %v374_v19, 1  ;;  %v1388_v30 = vld [vmem:[#allocation2 + $0x38] sm:$0xf0]  ;;  %v382_v31 = vrot.slane %v380_v21, 1  ;;  %v1641_v32 = vld [vmem:[#allocation2 + $0xb4] sm:$0xf]  ;;  %v1451_v38 = vor.u32 %v1642_v26, %v1450_v25 }
  0x3b   : > { %765 = vmatpush.bf16.msrb.mxu0 %v1411_v53  ;;  %v1452_v33 = vld [vmem:[#allocation2 + $0xb8] sm:$0xf0]  ;;  %v1378_v37 = vld [vmem:[#allocation2 + $0x20] sm:$0xf]  ;;  %v1391_v39 = vor.u32 %v1625_v29, %v1388_v30  ;;  %v1624_v40 = vld [vmem:[#allocation2 + $0x24] sm:$0xf0] }
  0x3c   : > { %778 = vmatpush.bf16.msrb.mxu1 %v1475_v54  ;;  %v377_v34 = vor.u32 %v376_v28, %v372_v18  ;;  %v383_v36 = vor.u32 %v382_v31, %v378_v20  ;;  %v1442_v41 = vld [vmem:[#allocation2 + $0xa0] sm:$0xf]  ;;  %v1640_v42 = vld [vmem:[#allocation2 + $0xa4] sm:$0xf0]  ;;  %v1455_v43 = vor.u32 %v1641_v32, %v1452_v33  ;;  %v1623_v44 = vld [vmem:[#allocation2 + $0x24] sm:$0xf]  ;;  %v1379_v50 = vor.u32 %v1624_v40, %v1378_v37 }
  0x3d   : > { %791 = vmatpush.bf16.msrb.mxu2 %v1415_v55  ;;  %v1380_v45 = vld [vmem:[#allocation2 + $0x28] sm:$0xf0]  ;;  %v1639_v46 = vld [vmem:[#allocation2 + $0xa4] sm:$0xf]  ;;  %v1370_v48 = vld [vmem:[#allocation2 + $0x10] sm:$0xf]  ;;  %v1443_v54 = vor.u32 %v1640_v42, %v1442_v41 }
  0x3e   : > { %804 = vmatpush.bf16.msrb.mxu3 %v1479_v59  ;;  %580 = vmatmul.bf16.vlgmr.msra.gmra.mxu2 %v377_v34  ;;  %v1444_v47 = vld [vmem:[#allocation2 + $0xa8] sm:$0xf0]  ;;  %v1622_v49 = vld [vmem:[#allocation2 + $0x14] sm:$0xf0]  ;;  %v1434_v51 = vld [vmem:[#allocation2 + $0x90] sm:$0xf]  ;;  %v1383_v55 = vor.u32 %v1623_v44, %v1380_v45 }
  0x3f   : > { %766 = vmatpush.bf16.msrb.mxu0 %v1403_v1  ;;  %593 = vmatmul.bf16.vlgmr.msra.gmra.mxu3 %v383_v36  ;;  %v1638_v52 = vld [vmem:[#allocation2 + $0x94] sm:$0xf0]  ;;  %v1950_v56 = vld.sshfl [vmem:[#allocation1 + $0x8] sm:$0xff pattern:$0x73625140]  ;;  %v1447_v58 = vor.u32 %v1639_v46, %v1444_v47  ;;  %v1371_v63 = vor.u32 %v1622_v49, %v1370_v48 }
  0x40   : > { %779 = vmatpush.bf16.msrb.mxu1 %v1467_v5  ;;  %554 = vmatmul.bf16.vlgmr.msra.gmra.mxu0 %v377_v34  ;;  %v1948_v53 = vld.sshfl [vmem:[#allocation1] sm:$0xff pattern:$0x73625140]  ;;  %v1621_v59 = vld [vmem:[#allocation2 + $0x14] sm:$0xf]  ;;  %v1435_v2 = vor.u32 %v1638_v52, %v1434_v51 }
  0x41   : > { %792 = vmatpush.bf16.msrb.mxu2 %v1407_v6  ;;  %567 = vmatmul.bf16.vlgmr.msra.gmra.mxu1 %v383_v36  ;;  %v816_v57 = vld [vmem:[%s1944_s11] sm:$0xa]  ;;  %v1372_v60 = vld [vmem:[#allocation2 + $0x18] sm:$0xf0]  ;;  %v1637_v61 = vld [vmem:[#allocation2 + $0x94] sm:$0xf] }
  0x42   : > { %805 = vmatpush.bf16.msrb.mxu3 %v1471_v10  ;;  %851 = vst [vmem:[#allocation1] ss:$4 sm:$0xff] %v816_v57  ;;  %v1436_v62 = vld [vmem:[#allocation2 + $0x98] sm:$0xf0]  ;;  %v1362_v0 = vld [vmem:[#allocation2] sm:$0xf]  ;;  %v1375_v3 = vor.u32 %v1621_v59, %v1372_v60 }
  0x43   : > { %767 = vmatpush.bf16.msrb.mxu0 %v1395_v14  ;;  %v1620_v1 = vld [vmem:[#allocation2 + $0x4] sm:$0xf0]  ;;  %v1426_v4 = vld [vmem:[#allocation2 + $0x80] sm:$0xf]  ;;  %v1619_v6 = vld [vmem:[#allocation2 + $0x4] sm:$0xf]  ;;  %v1439_v7 = vor.u32 %v1637_v61, %v1436_v62 }
  0x44   : > { %780 = vmatpush.bf16.msrb.mxu1 %v1459_v22  ;;  %v1636_v5 = vld [vmem:[#allocation2 + $0x84] sm:$0xf0]  ;;  %v1364_v8 = vld [vmem:[#allocation2 + $0x8] sm:$0xf0]  ;;  %v1635_v9 = vld [vmem:[#allocation2 + $0x84] sm:$0xf]  ;;  %v1363_v14 = vor.u32 %v1620_v1, %v1362_v0 }
  0x45   : > { %793 = vmatpush.bf16.msrb.mxu2 %v1399_v23  ;;  %v1428_v10 = vld [vmem:[#allocation2 + $0x88] sm:$0xf0]  ;;  %v1546_v11 = vld [vmem:[#allocation2 + $0x270] sm:$0xf]  ;;  %v1698_v12 = vld [vmem:[#allocation2 + $0x274] sm:$0xf0]  ;;  %v1427_v18 = vor.u32 %v1636_v5, %v1426_v4  ;;  %v1367_v19 = vor.u32 %v1619_v6, %v1364_v8 }
  0x46   : > { %806 = vmatpush.bf16.msrb.mxu3 %v1463_v27  ;;  %v1610_v13 = vld [vmem:[#allocation2 + $0x2f0] sm:$0xf]  ;;  %v1714_v15 = vld [vmem:[#allocation2 + $0x2f4] sm:$0xf0]  ;;  %v1697_v16 = vld [vmem:[#allocation2 + $0x274] sm:$0xf]  ;;  %v1431_v22 = vor.u32 %v1635_v9, %v1428_v10  ;;  %v1547_v23 = vor.u32 %v1698_v12, %v1546_v11 }
  0x47   : > { %768 = vmatpush.bf16.msrb.mxu0 %v1387_v35  ;;  %v1548_v17 = vld [vmem:[#allocation2 + $0x278] sm:$0xf0]  ;;  %v1713_v20 = vld [vmem:[#allocation2 + $0x2f4] sm:$0xf]  ;;  %v1611_v24 = vor.u32 %v1714_v15, %v1610_v13  ;;  %v1538_v26 = vld [vmem:[#allocation2 + $0x260] sm:$0xf] }
  0x48   : > { %781 = vmatpush.bf16.msrb.mxu1 %v1451_v38  ;;  %v1612_v21 = vld [vmem:[#allocation2 + $0x2f8] sm:$0xf0]  ;;  %v1551_v25 = vor.u32 %v1697_v16, %v1548_v17  ;;  %v1696_v27 = vld [vmem:[#allocation2 + $0x264] sm:$0xf0]  ;;  %v1602_v28 = vld [vmem:[#allocation2 + $0x2e0] sm:$0xf] }
  0x49   : > { %794 = vmatpush.bf16.msrb.mxu2 %v1391_v39  ;;  %v1615_v29 = vor.u32 %v1713_v20, %v1612_v21  ;;  %v1712_v30 = vld [vmem:[#allocation2 + $0x2e4] sm:$0xf0]  ;;  %v1695_v31 = vld [vmem:[#allocation2 + $0x264] sm:$0xf]  ;;  %v1540_v32 = vld [vmem:[#allocation2 + $0x268] sm:$0xf0]  ;;  %v1539_v36 = vor.u32 %v1696_v27, %v1538_v26 }
  0x4a   : > { %807 = vmatpush.bf16.msrb.mxu3 %v1455_v43  ;;  %v1711_v33 = vld [vmem:[#allocation2 + $0x2e4] sm:$0xf]  ;;  %v1604_v34 = vld [vmem:[#allocation2 + $0x2e8] sm:$0xf0]  ;;  %v1082_v35 = vld [vmem:[%s290_s18] sm:$0x3]  ;;  %v1603_v37 = vor.u32 %v1712_v30, %v1602_v28  ;;  %v1543_v38 = vor.u32 %v1695_v31, %v1540_v32 }
  0x4b   : > { %769 = vmatpush.bf16.msrb.mxu0 %v1379_v50  ;;  %v1530_v39 = vld [vmem:[#allocation2 + $0x250] sm:$0xf]  ;;  %v1694_v40 = vld [vmem:[#allocation2 + $0x254] sm:$0xf0]  ;;  %v1607_v42 = vor.u32 %v1711_v33, %v1604_v34  ;;  %v1693_v44 = vld [vmem:[#allocation2 + $0x254] sm:$0xf]  ;;  %v1083_v48 = vunpack.c.l.bf16 %v1082_v35 }
  0x4c   : > { %782 = vmatpush.bf16.msrb.mxu1 %v1443_v54  ;;  %v1594_v41 = vld [vmem:[#allocation2 + $0x2d0] sm:$0xf]  ;;  %v1710_v43 = vld [vmem:[#allocation2 + $0x2d4] sm:$0xf0]  ;;  %v1532_v45 = vld [vmem:[#allocation2 + $0x258] sm:$0xf0]  ;;  %v1531_v49 = vor.u32 %v1694_v40, %v1530_v39 }
  0x4d   : > { %795 = vmatpush.bf16.msrb.mxu2 %v1383_v55  ;;  %v1709_v46 = vld [vmem:[#allocation2 + $0x2d4] sm:$0xf]  ;;  %v1596_v47 = vld [vmem:[#allocation2 + $0x2d8] sm:$0xf0]  ;;  %v1522_v50 = vld [vmem:[#allocation2 + $0x240] sm:$0xf]  ;;  %v1595_v52 = vor.u32 %v1710_v43, %v1594_v41  ;;  %v1535_v54 = vor.u32 %v1693_v44, %v1532_v45 }
  0x4e   : > { %808 = vmatpush.bf16.msrb.mxu3 %v1447_v58  ;;  %v1692_v51 = vld [vmem:[#allocation2 + $0x244] sm:$0xf0]  ;;  %v1586_v55 = vld [vmem:[#allocation2 + $0x2c0] sm:$0xf]  ;;  %v1691_v58 = vld [vmem:[#allocation2 + $0x244] sm:$0xf]  ;;  %v1599_v59 = vor.u32 %v1709_v46, %v1596_v47 }
  0x4f   : > { %770 = vmatpush.bf16.msrb.mxu0 %v1371_v63  ;;  %v1708_v57 = vld [vmem:[#allocation2 + $0x2c4] sm:$0xf0]  ;;  %v1524_v60 = vld [vmem:[#allocation2 + $0x248] sm:$0xf0]  ;;  %v1578_v4 = vld [vmem:[#allocation2 + $0x2b0] sm:$0xf] }
  0x50   : > { %783 = vmatpush.bf16.msrb.mxu1 %v1435_v2  ;;  %v1588_v61 = vld [vmem:[#allocation2 + $0x2c8] sm:$0xf0]  ;;  %v1963_v62 = vld.sshfl [vmem:[#allocation1] sm:$0xff pattern:$0x73625140]  ;;  %v1587_v0 = vor.u32 %v1708_v57, %v1586_v55  ;;  %v1527_v1 = vor.u32 %v1691_v58, %v1524_v60 }
  0x51   : > { %796 = vmatpush.bf16.msrb.mxu2 %v1375_v3  ;;  %v1965_v63 = vld.sshfl [vmem:[#allocation1 + $0x8] sm:$0xff pattern:$0x73625140]  ;;  %v1514_v2 = vld [vmem:[#allocation2 + $0x230] sm:$0xf] }
  0x52   : > { %809 = vmatpush.bf16.msrb.mxu3 %v1439_v7  ;;  %1085 = vst [vmem:[#allocation1] ss:$4 sm:$0xff] %v1083_v48  ;;  %v1690_v3 = vld [vmem:[#allocation2 + $0x234] sm:$0xf0]  ;;  %v1689_v7 = vld [vmem:[#allocation2 + $0x234] sm:$0xf] }
  0x53   : > { %771 = vmatpush.bf16.msrb.mxu0 %v1363_v14  ;;  %v1706_v6 = vld [vmem:[#allocation2 + $0x2b4] sm:$0xf0]  ;;  %v1516_v8 = vld [vmem:[#allocation2 + $0x238] sm:$0xf0]  ;;  %v1705_v9 = vld [vmem:[#allocation2 + $0x2b4] sm:$0xf]  ;;  %v1515_v11 = vor.u32 %v1690_v3, %v1514_v2 }
  0x54   : > { %784 = vmatpush.bf16.msrb.mxu1 %v1427_v18  ;;  %v1580_v10 = vld [vmem:[#allocation2 + $0x2b8] sm:$0xf0]  ;;  %v1579_v12 = vor.u32 %v1706_v6, %v1578_v4  ;;  %v1519_v13 = vor.u32 %v1689_v7, %v1516_v8  ;;  %v1506_v14 = vld [vmem:[#allocation2 + $0x220] sm:$0xf]  ;;  %v1688_v15 = vld [vmem:[#allocation2 + $0x224] sm:$0xf0] }
  0x55   : > { %797 = vmatpush.bf16.msrb.mxu2 %v1367_v19  ;;  %v1570_v16 = vld [vmem:[#allocation2 + $0x2a0] sm:$0xf]  ;;  %v1583_v17 = vor.u32 %v1705_v9, %v1580_v10  ;;  %v1704_v18 = vld [vmem:[#allocation2 + $0x2a4] sm:$0xf0]  ;;  %v1687_v19 = vld [vmem:[#allocation2 + $0x224] sm:$0xf] }
  0x56   : > { %810 = vmatpush.bf16.msrb.mxu3 %v1431_v22  ;;  %772 = vmatmul.bf16.vlgmr.msrb.gmra.mxu0 %v1948_v53  ;;  %v1508_v20 = vld [vmem:[#allocation2 + $0x228] sm:$0xf0]  ;;  %v1703_v21 = vld [vmem:[#allocation2 + $0x2a4] sm:$0xf]  ;;  %v1498_v26 = vld [vmem:[#allocation2 + $0x210] sm:$0xf] }
  0x57   : > { %1020 = vmatpush.bf16.msra.mxu0 %v1547_v23  ;;  %785 = vmatmul.bf16.vlgmr.msrb.gmra.mxu1 %v1950_v56  ;;  %v1572_v22 = vld [vmem:[#allocation2 + $0x2a8] sm:$0xf0]  ;;  %v1507_v23 = vor.u32 %v1688_v15, %v1506_v14  ;;  %v1686_v27 = vld [vmem:[#allocation2 + $0x214] sm:$0xf0]  ;;  %v1562_v28 = vld [vmem:[#allocation2 + $0x290] sm:$0xf] }
  0x58   : > { %1033 = vmatpush.bf16.msra.mxu1 %v1611_v24  ;;  %798 = vmatmul.bf16.vlgmr.msrb.gmra.mxu2 %v1948_v53  ;;  %v1707_v53 = vld [vmem:[#allocation2 + $0x2c4] sm:$0xf]  ;;  %v1571_v24 = vor.u32 %v1704_v18, %v1570_v16  ;;  %v1702_v30 = vld [vmem:[#allocation2 + $0x294] sm:$0xf0]  ;;  %v1685_v31 = vld [vmem:[#allocation2 + $0x214] sm:$0xf]  ;;  %v1499_v35 = vor.u32 %v1686_v27, %v1498_v26 }
  0x59   : > { %1046 = vmatpush.bf16.msra.mxu2 %v1551_v25  ;;  %811 = vmatmul.bf16.vlgmr.msrb.gmra.mxu3 %v1950_v56  ;;  %v1523_v56 = vor.u32 %v1692_v51, %v1522_v50  ;;  %v1591_v5 = vor.u32 %v1707_v53, %v1588_v61  ;;  %v1511_v25 = vor.u32 %v1687_v19, %v1508_v20  ;;  %v1500_v32 = vld [vmem:[#allocation2 + $0x218] sm:$0xf0]  ;;  %v1701_v33 = vld [vmem:[#allocation2 + $0x294] sm:$0xf]  ;;  %v1684_v39 = vld [vmem:[#allocation2 + $0x204] sm:$0xf0] }
  0x5a   : > { %1059 = vmatpush.bf16.msra.mxu3 %v1615_v29  ;;  %v1575_v29 = vor.u32 %v1703_v21, %v1572_v22  ;;  %v1564_v34 = vld [vmem:[#allocation2 + $0x298] sm:$0xf0]  ;;  %v1554_v40 = vld [vmem:[#allocation2 + $0x280] sm:$0xf]  ;;  %v1683_v43 = vld [vmem:[#allocation2 + $0x204] sm:$0xf] }
  0x5b   : > { %1021 = vmatpush.bf16.msra.mxu0 %v1539_v36  ;;  %v1563_v36 = vor.u32 %v1702_v30, %v1562_v28  ;;  %v1567_v41 = vor.u32 %v1701_v33, %v1564_v34  ;;  %v1492_v44 = vld [vmem:[#allocation2 + $0x208] sm:$0xf0]  ;;  %v1699_v45 = vld [vmem:[#allocation2 + $0x284] sm:$0xf]  ;;  %v856_v51 = vrot.slane %v1963_v62, 1 }
  0x5c   : > { %1034 = vmatpush.bf16.msra.mxu1 %v1603_v37  ;;  %v1503_v37 = vor.u32 %v1685_v31, %v1500_v32  ;;  %v1556_v46 = vld [vmem:[#allocation2 + $0x288] sm:$0xf0]  ;;  %v1087_v26 = vld.sshfl [vmem:[#allocation1 + $0x8] sm:$0xff pattern:$0x73625140] }
  0x5d   : > { %1047 = vmatpush.bf16.msra.mxu2 %v1543_v38  ;;  %v1490_v38 = vld [vmem:[#allocation2 + $0x200] sm:$0xf]  ;;  %v1559_v50 = vor.u32 %v1699_v45, %v1556_v46 }
  0x5e   : > { %1060 = vmatpush.bf16.msra.mxu3 %v1607_v42  ;;  %v1700_v42 = vld [vmem:[#allocation2 + $0x284] sm:$0xf0]  ;;  %v1491_v47 = vor.u32 %v1684_v39, %v1490_v38 }
  0x5f   : > { %1022 = vmatpush.bf16.msra.mxu0 %v1531_v49  ;;  %v1555_v48 = vor.u32 %v1700_v42, %v1554_v40  ;;  %v1495_v49 = vor.u32 %v1683_v43, %v1492_v44 }
  0x60   : > { %1035 = vmatpush.bf16.msra.mxu1 %v1595_v52  ;;  %v857_v52 = vrot.slane %v1965_v63, 1 }
  0x61   : > { %1048 = vmatpush.bf16.msra.mxu2 %v1535_v54 }
  0x62   : > { %1061 = vmatpush.bf16.msra.mxu3 %v1599_v59 }
  0x63   : > { %1023 = vmatpush.bf16.msra.mxu0 %v1523_v56 }
  0x64   : > { %1036 = vmatpush.bf16.msra.mxu1 %v1587_v0 }
  0x65   : > { %1049 = vmatpush.bf16.msra.mxu2 %v1527_v1 }
  0x66   : > { %1062 = vmatpush.bf16.msra.mxu3 %v1591_v5 }
  0x67   : > { %1024 = vmatpush.bf16.msra.mxu0 %v1515_v11  ;;  %v1074_v11 = vld [vmem:[#allocation4] sm:$0x3] }
  0x68   : > { %1037 = vmatpush.bf16.msra.mxu1 %v1579_v12  ;;  %v1076_v15 = vperm.slane %v1074_v11, 0  ;;  %v1077_v22 = vperm.slane %v1074_v11, 1 }
  0x69   : > { %1050 = vmatpush.bf16.msra.mxu2 %v1519_v13 }
  0x6a   : > { %1063 = vmatpush.bf16.msra.mxu3 %v1583_v17 }
  0x6b   : > { %1025 = vmatpush.bf16.msra.mxu0 %v1507_v23 }
  0x6c   : > { %1038 = vmatpush.bf16.msra.mxu1 %v1571_v24  ;;  %v1086_v24 = vld.sshfl [vmem:[#allocation1] sm:$0xff pattern:$0x73625140] }
  0x6d   : > { %1051 = vmatpush.bf16.msra.mxu2 %v1511_v25 }
  0x6e   : > { %1064 = vmatpush.bf16.msra.mxu3 %v1575_v29 }
  0x6f   : > { %1026 = vmatpush.bf16.msra.mxu0 %v1499_v35 }
  0x70   : > { %1039 = vmatpush.bf16.msra.mxu1 %v1563_v36 }
  0x71   : > { %1052 = vmatpush.bf16.msra.mxu2 %v1503_v37 }
  0x72   : > { %1065 = vmatpush.bf16.msra.mxu3 %v1567_v41 }
  0x73   : > { %1027 = vmatpush.bf16.msra.mxu0 %v1491_v47 }
  0x74   : > { %1040 = vmatpush.bf16.msra.mxu1 %v1555_v48 }
  0x75   : > { %1053 = vmatpush.bf16.msra.mxu2 %v1495_v49 }
  0x76   : > { %1066 = vmatpush.bf16.msra.mxu3 %v1559_v50  ;;  %1028 = vmatmul.bf16.vlgmr.msra.gmra.mxu0 %v856_v51 }
  0x77   : > { %1041 = vmatmul.bf16.vlgmr.msra.gmra.mxu1 %v857_v52 }
  0x78   : > { %1054 = vmatmul.bf16.vlgmr.msra.gmra.mxu2 %v856_v51 }
  0x79   : > { %1067 = vmatmul.bf16.vlgmr.msra.gmra.mxu3 %v857_v52 }
  0xbd   : > { %v555_v54 = vpop.f32.mrf.mxu0 }
  0xbe   : > { %v568_v55 = vpop.f32.mrf.mxu1 }
  0xbf   : > { %v569_v5 = vadd.f32 %v568_v55, %v555_v54 }
  0xc1   : > { %v581_v57 = vpop.f32.mrf.mxu2 }
  0xc2   : > { %v594_v58 = vpop.f32.mrf.mxu3 }
  0xc3   : > { %v595_v8 = vadd.f32 %v594_v58, %v581_v57 }
  0xc5   : > { %v557_v59 = vpop.f32.mrf.mxu0 }
  0xc6   : > { %v570_v60 = vpop.f32.mrf.mxu1 }
  0xc9   : > { %v583_v53 = vpop.f32.mrf.mxu2 }
  0xca   : > { %v596_v61 = vpop.f32.mrf.mxu3 }
  0xd3   : > { %v773_v56 = vpop.f32.mrf.mxu0 }
  0xd4   : > { %v786_v62 = vpop.f32.mrf.mxu1  ;;  %v774_v6 = vadd.f32 %v773_v56, %v569_v5 }
  0xd6   : > { %v787_v12 = vadd.f32 %v786_v62, %v774_v6 }
  0xdb   : > { %v799_v0 = vpop.f32.mrf.mxu2  ;;  %v775_v63 = vpop.f32.mrf.mxu0 }
  0xdc   : > { %v812_v1 = vpop.f32.mrf.mxu3  ;;  %v788_v2 = vpop.f32.mrf.mxu1  ;;  %v800_v13 = vadd.f32 %v799_v0, %v595_v8 }
  0xde   : > { %v813_v19 = vadd.f32 %v812_v1, %v800_v13 }
  0xe3   : > { %v801_v3 = vpop.f32.mrf.mxu2 }
  0xe4   : > { %v814_v4 = vpop.f32.mrf.mxu3 }
  0xf3   : > { %v1029_v7 = vpop.f32.mrf.mxu0 }
  0xf4   : > { %v1042_v9 = vpop.f32.mrf.mxu1 }
  0xf5   : > { %v1043_v10 = vadd.f32 %v1042_v9, %v1029_v7 }
  0xf7   : > { %v1072_v14 = vadd.f32 %v1043_v10, %v787_v12 }
  0xf9   : > { %v1080_v20 = vadd.f32 %v1076_v15, %v1072_v14 }
  0xfb   : > { %v1055_v16 = vpop.f32.mrf.mxu2  ;;  %v1031_v18 = vpop.f32.mrf.mxu0  ;;  %v1090_v27 = vadd.f32 %v1086_v24, %v1080_v20 }
  0xfc   : > { %v1068_v17 = vpop.f32.mrf.mxu3  ;;  %v1044_v23 = vpop.f32.mrf.mxu1 }
  0xfd   : > { %v1069_v21 = vadd.f32 %v1068_v17, %v1055_v16  ;;  %v1092_v32 = vmax.f32 %v1090_v27, 0.0 }
  0xff   : > { %v1073_v25 = vadd.f32 %v1069_v21, %v813_v19 }
 0x101   : > { %v1081_v28 = vadd.f32 %v1077_v22, %v1073_v25 }
 0x103   : > { %v1091_v29 = vadd.f32 %v1087_v26, %v1081_v28  ;;  %v1057_v30 = vpop.f32.mrf.mxu2 }
 0x104   : > { %v1070_v31 = vpop.f32.mrf.mxu3 }
 0x105   : > { %v1093_v33 = vmax.f32 %v1091_v29, 0.0 }
 0x107   : > { %v1094_v34 = vpack.c.bf16 %v1093_v33, %v1092_v32 }
 0x109   : > { %v1096_v35 = vrot.slane %v1094_v34, 3 }
 0x10b   : > { %v1100_v36 = vsel %vm1097_vm0, %v1094_v34, %v1096_v35 }
 0x10c   : > { %1102 = vst [vmem:[%s299_s22] sm:$0x3] %v1100_v36 }
 0x10d PF: > { %s16_s17 = sadd.s32 1, %s1852_s17   ;;  %s1990_s15 = smov %s1848_s16 }
 0x10e   : > { %p13_p8 = scmp.ge.s32.totalorder %s16_s17, 4   ;;  %s1991_s16 = smov %s1993_s19 }
 0x110   :  { %15 = sbr.rel (!%p13_p8) target bundleno = 3 (0x3), region = 82 }
 0x115   :  { %1131 = vsyncpa [#allocation3], 1 }
 0x116   :  { %1133 = vsyncpa [#allocation3 + $0x1], 1 }
 0x117   :  { %1134 = vsyncpa [#allocation5], 1 }

// kernel: _lambda_.19
= control target key start
LH: loop header
LB: loop body
LE: loop exit
PB: predicated region body
PF: predicated region fallthrough
CT: control target
= control target key end

     0   :  { %v225_v4 = vmov 0.0   ;;  %s361_s0 = inlined_call_operand.vmem [shape: bf16[2,2,256], index: 0, kind: input, shape index: {}]   ;;  %s362_s1 = inlined_call_operand.vmem [shape: f32[256,2], index: 1, kind: input, shape index: {}]   ;;  %s363_s2 = inlined_call_operand.vmem [shape: f32[1,2], index: 2, kind: input, shape index: {}]   ;;  %s364_s3 = inlined_call_operand.hbm [shape: f32[2,2], index: 3, kind: output, shape index: {}]  }
   0x1   :  { %v111_v0 = vld [vmem:[%s362_s1 + $0x78] sm:$0xff]  ;;  %v110_v1 = vld [vmem:[%s362_s1 + $0x70] sm:$0xff]  ;;  %19 = vst [vmem:[#allocation2] sm:$0xf] %v225_v4  ;;  %v109_v5 = vld [vmem:[%s362_s1 + $0x68] sm:$0xff] }
   0x2   :  { %v127_v2 = vld [vmem:[%s362_s1 + $0xf8] sm:$0xff]  ;;  %138 = vmatpush.msra.mxu0 %v111_v0  ;;  %v126_v3 = vld [vmem:[%s362_s1 + $0xf0] sm:$0xff]  ;;  %v125_v6 = vld [vmem:[%s362_s1 + $0xe8] sm:$0xff] }
   0x3   :  { %158 = vmatpush.msra.mxu1 %v127_v2  ;;  %v108_v7 = vld [vmem:[%s362_s1 + $0x60] sm:$0xff]  ;;  %v107_v9 = vld [vmem:[%s362_s1 + $0x58] sm:$0xff]  ;;  %v106_v11 = vld [vmem:[%s362_s1 + $0x50] sm:$0xff] }
   0x4   :  { %139 = vmatpush.msra.mxu0 %v110_v1  ;;  %v124_v8 = vld [vmem:[%s362_s1 + $0xe0] sm:$0xff]  ;;  %v123_v10 = vld [vmem:[%s362_s1 + $0xd8] sm:$0xff]  ;;  %v122_v12 = vld [vmem:[%s362_s1 + $0xd0] sm:$0xff] }
   0x5   :  { %159 = vmatpush.msra.mxu1 %v126_v3  ;;  %v105_v13 = vld [vmem:[%s362_s1 + $0x48] sm:$0xff]  ;;  %v21_v15 = vld [vmem:[%s361_s0] sm:$0x3]  ;;  %v22_v16 = vld [vmem:[%s361_s0 + $0x2] sm:$0x3] }
   0x6   :  { %140 = vmatpush.msra.mxu0 %v109_v5  ;;  %v121_v14 = vld [vmem:[%s362_s1 + $0xc8] sm:$0xff]  ;;  %v23_v17 = vunpack.c.l.bf16 %v21_v15  ;;  %v104_v18 = vld [vmem:[%s362_s1 + $0x40] sm:$0xff]  ;;  %v24_v20 = vunpack.c.l.bf16 %v22_v16 }
   0x7   :  { %160 = vmatpush.msra.mxu1 %v125_v6  ;;  %v120_v19 = vld [vmem:[%s362_s1 + $0xc0] sm:$0xff] }
   0x8   :  { %141 = vmatpush.msra.mxu0 %v108_v7 }
   0x9   :  { %161 = vmatpush.msra.mxu1 %v124_v8 }
   0xa   :  { %142 = vmatpush.msra.mxu0 %v107_v9 }
   0xb   :  { %162 = vmatpush.msra.mxu1 %v123_v10 }
   0xc   :  { %143 = vmatpush.msra.mxu0 %v106_v11 }
   0xd   :  { %163 = vmatpush.msra.mxu1 %v122_v12 }
   0xe   :  { %8 = vsyncpa [#allocation4], 0  ;;  %144 = vmatpush.msra.mxu0 %v105_v13  ;;  %27 = vst [vmem:[#allocation1] ss:$4 sm:$0xff] %v23_v17  ;;  %v103_v21 = vld [vmem:[%s362_s1 + $0x38] sm:$0xff]  ;;  %v102_v23 = vld [vmem:[%s362_s1 + $0x30] sm:$0xff] }
   0xf   :  { %164 = vmatpush.msra.mxu1 %v121_v14  ;;  %v119_v22 = vld [vmem:[%s362_s1 + $0xb8] sm:$0xff]  ;;  %31 = vst [vmem:[#allocation1 + $0x20] ss:$4 sm:$0xff] %v24_v20  ;;  %v118_v24 = vld [vmem:[%s362_s1 + $0xb0] sm:$0xff]  ;;  %v101_v25 = vld [vmem:[%s362_s1 + $0x28] sm:$0xff]  ;;  %vm38_vm0 = vcmask 1041408  }
  0x10   :  { %145 = vmatpush.msra.mxu0 %v104_v18  ;;  %v117_v26 = vld [vmem:[%s362_s1 + $0xa8] sm:$0xff]  ;;  %v100_v27 = vld [vmem:[%s362_s1 + $0x20] sm:$0xff]  ;;  %v99_v33 = vld [vmem:[%s362_s1 + $0x18] sm:$0xff]  ;;  %vm80_vm1 = vcmask 1041409   ;;  %vm82_vm2 = vcmask 1043459   ;;  %vm84_vm3 = vcmask 1045509  }
  0x11   :  { %165 = vmatpush.msra.mxu1 %v120_v19  ;;  %v116_v28 = vld [vmem:[%s362_s1 + $0xa0] sm:$0xff]  ;;  %v115_v34 = vld [vmem:[%s362_s1 + $0x98] sm:$0xff]  ;;  %v98_v43 = vld [vmem:[%s362_s1 + $0x10] sm:$0xff]  ;;  %vm86_vm4 = vcmask 1047559   ;;  %s226_s25 = smov [#allocation3]   ;;  %s187_s29 = sshll.u32 %s364_s3, 4  ;;  %s188_s29 = int_to_ptr.hbm [resolvable:$true] %s187_s29 }
  0x12   :  { %146 = vmatpush.msra.mxu0 %v103_v21  ;;  %v114_v44 = vld [vmem:[%s362_s1 + $0x90] sm:$0xff]  ;;  %v97_v48 = vld [vmem:[%s362_s1 + $0x8] sm:$0xff]  ;;  %v96_v54 = vld [vmem:[%s362_s1] sm:$0xff]  ;;  %s185_s26 = sshll.u32 %s226_s25, 4  ;;  %vm178_vm5 = vcmask 9216   ;;  %s186_s26 = int_to_ptr.vmem [resolvable:$true] %s185_s26 }
  0x13   :  { %166 = vmatpush.msra.mxu1 %v119_v22  ;;  %v113_v49 = vld [vmem:[%s362_s1 + $0x88] sm:$0xff]  ;;  %v112_v1 = vld [vmem:[%s362_s1 + $0x80] sm:$0xff] }
  0x14   :  { %147 = vmatpush.msra.mxu0 %v102_v23  ;;  %v20_v11 = vld [vmem:[#allocation2] sm:$0xf]  ;;  %v198_v20 = vld [vmem:[%s363_s2] ss:$0 sm:$0xff] }
  0x15   :  { %167 = vmatpush.msra.mxu1 %v118_v24  ;;  %v28_v29 = vld.sshfl [vmem:[#allocation1] sm:$0xff pattern:$0x73625140]  ;;  %v29_v30 = vld.sshfl [vmem:[#allocation1 + $0x8] sm:$0xff pattern:$0x73625140] }
  0x16   :  { %148 = vmatpush.msra.mxu0 %v101_v25  ;;  %v32_v31 = vld.sshfl [vmem:[#allocation1 + $0x20] sm:$0xff pattern:$0x73625140]  ;;  %v33_v32 = vld.sshfl [vmem:[#allocation1 + $0x28] sm:$0xff pattern:$0x73625140] }
  0x17   :  { %168 = vmatpush.msra.mxu1 %v117_v26  ;;  %v39_v35 = vsel %vm38_vm0, %v28_v29, 0.0  ;;  %v46_v36 = vsel %vm38_vm0, %v29_v30, 0.0  ;;  %v53_v37 = vsel %vm38_vm0, %v32_v31, 0.0  ;;  %v60_v38 = vsel %vm38_vm0, %v33_v32, 0.0 }
  0x18   :  { %149 = vmatpush.msra.mxu0 %v100_v27  ;;  %v40_v39 = vrot.slane %v39_v35, 4  ;;  %v47_v40 = vrot.slane %v46_v36, 4  ;;  %v54_v41 = vrot.slane %v53_v37, 4  ;;  %v61_v42 = vrot.slane %v60_v38, 4 }
  0x19   :  { %169 = vmatpush.msra.mxu1 %v116_v28 }
  0x1a   :  { %150 = vmatpush.msra.mxu0 %v99_v33  ;;  %v41_v45 = vadd.f32 %v40_v39, %v39_v35  ;;  %v48_v46 = vadd.f32 %v47_v40, %v46_v36  ;;  %v55_v47 = vadd.f32 %v54_v41, %v53_v37  ;;  %v62_v50 = vadd.f32 %v61_v42, %v60_v38 }
  0x1b   :  { %170 = vmatpush.msra.mxu1 %v115_v34 }
  0x1c   :  { %151 = vmatpush.msra.mxu0 %v98_v43  ;;  %v42_v51 = vrot.slane %v41_v45, 2  ;;  %v49_v52 = vrot.slane %v48_v46, 2  ;;  %v56_v53 = vrot.slane %v55_v47, 2  ;;  %v63_v55 = vrot.slane %v62_v50, 2 }
  0x1d   :  { %171 = vmatpush.msra.mxu1 %v114_v44 }
  0x1e   :  { %152 = vmatpush.msra.mxu0 %v97_v48  ;;  %v43_v56 = vadd.f32 %v42_v51, %v41_v45  ;;  %v50_v57 = vadd.f32 %v49_v52, %v48_v46  ;;  %v57_v58 = vadd.f32 %v56_v53, %v55_v47  ;;  %v64_v59 = vadd.f32 %v63_v55, %v62_v50 }
  0x1f   :  { %172 = vmatpush.msra.mxu1 %v113_v49 }
  0x20   :  { %153 = vmatpush.msra.mxu0 %v96_v54  ;;  %v44_v60 = vrot.slane %v43_v56, 1  ;;  %v51_v61 = vrot.slane %v50_v57, 1  ;;  %v58_v62 = vrot.slane %v57_v58, 1  ;;  %v65_v63 = vrot.slane %v64_v59, 1 }
  0x21   :  { %173 = vmatpush.msra.mxu1 %v112_v1 }
  0x22   :  { %v52_v0 = vadd.f32 %v51_v61, %v50_v57  ;;  %v45_v2 = vadd.f32 %v44_v60, %v43_v56  ;;  %v59_v3 = vadd.f32 %v58_v62, %v57_v58  ;;  %v66_v4 = vadd.f32 %v65_v63, %v64_v59 }
  0x24   :  { %v71_v5 = vrot.slane %v52_v0, 6  ;;  %v72_v6 = vrot.slane %v66_v4, 6 }
  0x26   :  { %v73_v7 = vsel %vm38_vm0, %v45_v2, %v71_v5  ;;  %v74_v8 = vsel %vm38_vm0, %v59_v3, %v72_v6 }
  0x27   :  { %v79_v9 = vrot.slane %v74_v8, 7 }
  0x29   :  { %v81_v10 = vsel %vm80_vm1, %v79_v9, %v73_v7 }
  0x2a   :  { %v83_v12 = vsel %vm82_vm2, %v79_v9, %v81_v10 }
  0x2b   :  { %v85_v13 = vsel %vm84_vm3, %v79_v9, %v83_v12 }
  0x2c   :  { %v87_v14 = vsel %vm86_vm4, %v79_v9, %v85_v13 }
  0x2d   :  { %v89_v15 = vadd.f32 %v87_v14, %v20_v11 }
  0x2f   :  { %90 = vst [vmem:[#allocation2] sm:$0xf] %v89_v15 }
  0x36   :  { %v94_v16 = vld [vmem:[#allocation2] sm:$0xf] }
  0x37   :  { %v95_v17 = vmul.f32 0.5, %v94_v16 }
  0x39   :  { %133 = vst [vmem:[#allocation1] ss:$4 sm:$0xff] %v95_v17 }
  0x40   :  { %v134_v18 = vld.sshfl [vmem:[#allocation1] sm:$0xff pattern:$0x73625140]  ;;  %v135_v19 = vld.sshfl [vmem:[#allocation1 + $0x8] sm:$0xff pattern:$0x73625140] }
  0x41   :  { %154 = vmatmul.f32.vlgmr.msra.gmra.mxu0 %v134_v18  ;;  %174 = vmatmul.f32.vlgmr.msra.gmra.mxu1 %v135_v19 }
  0xbe   :  { %v155_v21 = vpop.f32.mrf.mxu0  ;;  %v175_v22 = vpop.f32.mrf.mxu1 }
  0xbf   :  { %v156_v23 = vadd.f32 %v198_v20, %v155_v21 }
  0xc1   :  { %v176_v24 = vadd.f32 %v175_v22, %v156_v23 }
  0xc3   :  { %179 = vst.msk [vmem:[#allocation3] sm:$0x3] %vm178_vm5, %v176_v24 }
  0xc4   :  { %190 = dma.vmem_to_hbm [thread:$0]  %s186_s26, 32, %s188_s29, [#allocation4]  }
  0xc5   :  { %223 = dma.done.wait [#allocation4], 32  }
  0xc6   :  { %224 = vsyncadd [#allocation4], 4294967264 }
  0xc7   :  { %195 = vsyncpa [#allocation4], 1 }

</bundles_post_ra>
